<compile_context>
chip_gen: v7x
topology: tpu7x:2x2x1
jax: 0.10.0
libtpu: 0.0.40
codegen_flags: <defaults>
</compile_context>

<pallas_src>
import functools

import jax
import jax.numpy as jnp
from jax.experimental import pallas as pl
from jax.experimental.pallas import tpu as pltpu

LEAKY_SLOPE = 0.2
IN_EPS = 1e-5
SCALES = (0.5, 0.25, 0.125)


def _make_conv_compiler_params():
    # ~half of physical VMEM: 64 MiB on v5e/v6e (128 MiB), 32 MiB on v7x (64 MiB).
    try:
        cap = int(getattr(pltpu.get_tpu_info(), "vmem_capacity_bytes",
                          64 * 1024 * 1024))
    except Exception:
        cap = 64 * 1024 * 1024
    limit = max(32 * 1024 * 1024, min(cap // 2, 96 * 1024 * 1024))
    return pltpu.CompilerParams(
        dimension_semantics=("parallel",),   # batch axis: shard across TCs on v7x
        vmem_limit_bytes=limit,
    )


_CONV_PARAMS = _make_conv_compiler_params()


# ----------------------------------------------------------------------------
# Fused conv3x3/s2/p1 block kernel.  One grid step == one image.
#   x_ref   : (planes, rows_tot, K)  bf16   -- per-tap contiguous row windows
#   w_ref   : (n_taps, K, Cout)      bf16
#   aux_ref : (8, Cout)              f32    -- row0 bias, row1 gamma, row2 beta,
#                                              row3 head weight, row4[0] head bias
# Normal layers emit the bf16 activation; the last layer instead fuses the 1x1 head
# and emits per-image sum((p-1)^2), sum(p^2)  (GAN-MSE partial sums).
# ----------------------------------------------------------------------------
def _disc_conv_kernel(x_ref, w_ref, aux_ref, *out_refs,
                      taps, m_rows, apply_in, fuse_head, slope):
    cout = w_ref.shape[-1]
    acc = jnp.zeros((m_rows, cout), jnp.float32)
    # one accumulating MXU dot per tap; each lhs is a contiguous row window.
    # NOTE: for odd Wo the `off` window start is not 8-aligned (perf-review item 9);
    # accepted here since it only affects the tiny late blocks.
    for t, (plane, off) in enumerate(taps):
        lhs = x_ref[plane, off:off + m_rows, :]
        acc = acc + jnp.dot(lhs, w_ref[t], preferred_element_type=jnp.float32)

    acc = acc + aux_ref[0:1, :]                         # bias
    acc = jnp.where(acc >= 0.0, acc, slope * acc)       # LeakyReLU(0.2)

    if apply_in:                                        # InstanceNorm2d(affine), single pass
        inv_m = 1.0 / m_rows
        mean = jnp.sum(acc, axis=0, keepdims=True) * inv_m
        msq = jnp.sum(acc * acc, axis=0, keepdims=True) * inv_m
        var = msq - mean * mean
        scale = jax.lax.rsqrt(var + IN_EPS) * aux_ref[1:2, :]
        shift = aux_ref[2:3, :] - mean * scale
        acc = acc * scale + shift

    if fuse_head:                                       # 1x1 conv (Cout=1) + MSE sums
        s1_ref, s0_ref = out_refs
        p = jnp.sum(acc * aux_ref[3:4, :], axis=-1, keepdims=True) + aux_ref[4:5, 0:1]
        d1 = p - 1.0
        s1_ref[...] = jnp.sum(d1 * d1, keepdims=True)   # vs target 1
        s0_ref[...] = jnp.sum(p * p, keepdims=True)     # vs target 0
    else:
        (o_ref,) = out_refs
        o_ref[...] = acc.astype(o_ref.dtype)


def _conv_layer(xfold, wmat, aux, *, m_rows, apply_in, fuse_head):
    n, planes, rows_tot, k = xfold.shape
    ntaps, _, cout = wmat.shape
    if planes == 1:                                     # first layer: kh,kw folded into K
        taps = ((0, 0),)
    else:                                               # kh taps: (hs plane, row offset)
        wo = rows_tot - m_rows                          # rows_tot = (Ho+1)*Wo, m_rows = Ho*Wo
        taps = ((0, 0), (1, 0), (0, wo))

    kern = functools.partial(_disc_conv_kernel, taps=taps, m_rows=m_rows,
                             apply_in=apply_in, fuse_head=fuse_head, slope=LEAKY_SLOPE)
    in_specs = [
        pl.BlockSpec((None, planes, rows_tot, k), lambda i: (i, 0, 0, 0)),
        pl.BlockSpec((ntaps, k, cout), lambda i: (0, 0, 0)),
        pl.BlockSpec((8, cout), lambda i: (0, 0)),
    ]
    if fuse_head:
        out_shape = (jax.ShapeDtypeStruct((n, 1, 1), jnp.float32),
                     jax.ShapeDtypeStruct((n, 1, 1), jnp.float32))
        out_specs = (pl.BlockSpec((None, 1, 1), lambda i: (i, 0, 0)),
                     pl.BlockSpec((None, 1, 1), lambda i: (i, 0, 0)))
    else:
        out_shape = jax.ShapeDtypeStruct((n, m_rows, cout), jnp.bfloat16)
        out_specs = pl.BlockSpec((None, m_rows, cout), lambda i: (i, 0, 0))

    return pl.pallas_call(
        kern, grid=(n,), in_specs=in_specs, out_specs=out_specs,
        out_shape=out_shape, compiler_params=_CONV_PARAMS,
    )(xfold, wmat, aux)


# ----------------------------------------------------------------------------
# XLA-side layout helpers (cheap for the 3-channel first layer; per-layer fold for the rest).
# ----------------------------------------------------------------------------
def _fold_first(x_nhwc):
    """K=27 im2col (kh,kw,c folded into K) for the Cin=3 first layer -> single MXU dot."""
    n, h, w, c = x_nhwc.shape
    ho, wo = (h + 1) // 2, (w + 1) // 2
    xp = jnp.pad(x_nhwc, ((0, 0), (1, 2 * ho - h), (1, 2 * wo - w), (0, 0)))
    cols = [xp[:, kh:kh + 2 * ho:2, kw:kw + 2 * wo:2, :]
            for kh in range(3) for kw in range(3)]
    xf = jnp.concatenate(cols, axis=-1).reshape(n, 1, ho * wo, 9 * c)
    return xf, ho, wo


def _fold_next(y_nhwc):
    """(2, (Ho+1)*Wo, 3*C) layout: kw folded into channels, H split even/odd."""
    n, h, w, c = y_nhwc.shape
    ho, wo = (h + 1) // 2, (w + 1) // 2
    hp, wp = 2 * ho + 2, 2 * wo + 2
    xp = jnp.pad(y_nhwc, ((0, 0), (1, hp - 1 - h), (1, wp - 1 - w), (0, 0)))
    xw = jnp.concatenate([xp[:, :, kw:kw + 2 * wo:2, :] for kw in range(3)], axis=-1)
    xw = xw.reshape(n, ho + 1, 2, wo, 3 * c).transpose(0, 2, 1, 3, 4)
    xw = xw.reshape(n, 2, (ho + 1) * wo, 3 * c)
    return xw, ho, wo


def _reshape_w_first(w_oihw):   # (64, 3, 3, 3) -> (1, 27, 64), (kh,kw,c)-major K
    cout = w_oihw.shape[0]
    return jnp.transpose(w_oihw, (2, 3, 1, 0)).reshape(1, 27, cout).astype(jnp.bfloat16)


def _reshape_w(w_oihw):         # (Cout, Cin, 3, 3) -> (3, 3*Cin, Cout), (kw,c)-major K
    cout, cin = w_oihw.shape[:2]
    return jnp.transpose(w_oihw, (2, 3, 1, 0)).reshape(3, 3 * cin, cout).astype(jnp.bfloat16)


def _pack_aux(bias, gamma=None, beta=None, head_w=None, head_b=None):
    cout = bias.shape[0]
    aux = jnp.zeros((8, cout), jnp.float32)
    aux = aux.at[0].set(bias.astype(jnp.float32))
    aux = aux.at[1].set((gamma if gamma is not None else jnp.ones((cout,))).astype(jnp.float32))
    aux = aux.at[2].set((beta if beta is not None else jnp.zeros((cout,))).astype(jnp.float32))
    if head_w is not None:
        aux = aux.at[3].set(head_w.reshape(cout).astype(jnp.float32))
        aux = aux.at[4, 0].set(jnp.asarray(head_b, jnp.float32).reshape(()))
    return aux


# ----------------------------------------------------------------------------
# L1 loss: lane-dense (rows, 128) tiled reduction into a resident (1,1) accumulator.
# Native dtype, no wrapper cast; padding only if the flattened size is not tileable.
# ----------------------------------------------------------------------------
def _l1_sum_kernel(a_ref, b_ref, o_ref):
    @pl.when(pl.program_id(0) == 0)
    def _():
        o_ref[...] = jnp.zeros_like(o_ref)
    d = jnp.abs(a_ref[...].astype(jnp.float32) - b_ref[...].astype(jnp.float32))
    o_ref[...] = o_ref[...] + jnp.sum(d, keepdims=True)


def l1_mean(a, b, max_tile_rows=2048):
    total = a.size
    cols = 128
    rows = pl.cdiv(total, cols)
    rows8 = -(-rows // 8) * 8
    if rows8 <= max_tile_rows:
        tile, rows_p = rows8, rows8
    else:
        tile = max_tile_rows
        rows_p = -(-rows8 // tile) * tile
    pad = rows_p * cols - total
    af, bf = a.reshape(-1), b.reshape(-1)
    if pad:
        af = jnp.pad(af, (0, pad))
        bf = jnp.pad(bf, (0, pad))
    af = af.reshape(rows_p, cols)
    bf = bf.reshape(rows_p, cols)
    out = pl.pallas_call(
        _l1_sum_kernel,
        grid=(rows_p // tile,),
        in_specs=[pl.BlockSpec((tile, cols), lambda i: (i, 0)),
                  pl.BlockSpec((tile, cols), lambda i: (i, 0))],
        out_specs=pl.BlockSpec((1, 1), lambda i: (0, 0)),
        out_shape=jax.ShapeDtypeStruct((1, 1), jnp.float32),
        compiler_params=pltpu.CompilerParams(dimension_semantics=("arbitrary",)),
    )(af, bf)
    return out[0, 0] / total


# ----------------------------------------------------------------------------
# PatchDiscriminator forward (per scale) -> per-image GAN-MSE partial sums
# ----------------------------------------------------------------------------
def discriminator_mse_sums(x_nhwc, params, scale):
    n, h, w, _ = x_nhwc.shape
    nh, nw = max(1, int(h * scale)), max(1, int(w * scale))
    # F.interpolate(..., mode='bilinear', align_corners=False)
    x = jax.image.resize(x_nhwc, (n, nh, nw, x_nhwc.shape[-1]),
                         method="bilinear", antialias=False).astype(jnp.bfloat16)

    xf, ho, wo = _fold_first(x)
    y = _conv_layer(xf, _reshape_w_first(params["conv0_w"]),
                    _pack_aux(params["conv0_b"], params["in0_g"], params["in0_b"]),
                    m_rows=ho * wo, apply_in=True, fuse_head=False)
    h_cur, w_cur, c_cur = ho, wo, y.shape[-1]

    for i in range(1, 6):
        xw, ho, wo = _fold_next(y.reshape(n, h_cur, w_cur, c_cur))
        if i == 5:   # last conv (no IN) + fused 1x1 head + MSE sums
            aux = _pack_aux(params["conv5_b"], None, None,
                            params["conv6_w"], params["conv6_b"])
            s1, s0 = _conv_layer(xw, _reshape_w(params["conv5_w"]), aux,
                                 m_rows=ho * wo, apply_in=False, fuse_head=True)
            return s1.reshape(n), s0.reshape(n), ho * wo
        y = _conv_layer(xw, _reshape_w(params[f"conv{i}_w"]),
                        _pack_aux(params[f"conv{i}_b"], params[f"in{i}_g"], params[f"in{i}_b"]),
                        m_rows=ho * wo, apply_in=True, fuse_head=False)
        h_cur, w_cur, c_cur = ho, wo, y.shape[-1]


# ----------------------------------------------------------------------------
# GANModel loss forward (no autograd / optimizer step)
# ----------------------------------------------------------------------------
@functools.partial(jax.jit, static_argnames=("scales",))
def gan_model_losses(fake_image, real_image, disc_params, scales=SCALES):
    nf, nr = fake_image.shape[0], real_image.shape[0]
    both = jnp.concatenate([fake_image, real_image], axis=0)  # run fake+real in one pass

    per_g, per_d = [], []
    loss_g_gan = jnp.float32(0.0)
    loss_d = jnp.float32(0.0)
    for params, scale in zip(disc_params, scales):
        s1, s0, p_elems = discriminator_mse_sums(both, params, scale)
        mse_fake_vs1 = jnp.sum(s1[:nf]) / (nf * p_elems)   # criterionGAN(pred_fake, True)
        mse_fake_vs0 = jnp.sum(s0[:nf]) / (nf * p_elems)   # criterionGAN(pred_fake, False)
        mse_real_vs1 = jnp.sum(s1[nf:]) / (nr * p_elems)   # criterionGAN(pred_real, True)
        g_i = mse_fake_vs1
        d_i = 0.5 * (mse_fake_vs0 + mse_real_vs1)
        per_g.append(g_i)
        per_d.append(d_i)
        loss_g_gan = loss_g_gan + g_i
        loss_d = loss_d + d_i
    loss_g_gan = loss_g_gan / len(scales)
    loss_d = loss_d / len(scales)

    loss_g_l1 = l1_mean(fake_image, real_image)
    # TODO(synk): utils.image_gradient_loss not defined in the source; grad term omitted.
    loss_g = 100.0 * loss_g_l1 + 1.0 * loss_g_gan
    return {
        "L1-Loss": loss_g_l1,
        "GAN-Loss": loss_g_gan,
        "Total-Loss": loss_g,
        "Disc-Loss": loss_d,
        **{f"Disc-Loss-{s}": v for s, v in zip(scales, per_d)},
        **{f"GAN-Loss-{s}": v for s, v in zip(scales, per_g)},
    }


# ----------------------------------------------------------------------------
# Deterministic parameter init (shapes from PatchDiscriminator.__init__)
# ----------------------------------------------------------------------------
def init_disc_params(key):
    chans = [(3, 64), (64, 128), (128, 128), (128, 128), (128, 128), (128, 128)]
    keys = jax.random.split(key, 2 * len(chans) + 1)
    params = {}
    ki = 0
    for i, (cin, cout) in enumerate(chans):
        params[f"conv{i}_w"] = 0.05 * jax.random.normal(keys[ki], (cout, cin, 3, 3), jnp.float32)
        ki += 1
        params[f"conv{i}_b"] = 0.05 * jax.random.normal(keys[ki], (cout,), jnp.float32)
        ki += 1
        if i < 5:  # InstanceNorm2d(affine=True) default init: weight=1, bias=0
            params[f"in{i}_g"] = jnp.ones((cout,), jnp.float32)
            params[f"in{i}_b"] = jnp.zeros((cout,), jnp.float32)
    params["conv6_w"] = 0.05 * jax.random.normal(keys[ki], (1, 128, 1, 1), jnp.float32)
    params["conv6_b"] = jnp.zeros((1,), jnp.float32)
    return params


if __name__ == "__main__":
    key = jax.random.PRNGKey(0)
    k_fake, k_real, k_params = jax.random.split(key, 3)

    N, C, H, W = 2, 3, 32, 32  # small NCHW shapes consistent with a 3-channel image GAN
    fake_nchw = jax.random.uniform(k_fake, (N, C, H, W), jnp.float32)
    real_nchw = jax.random.uniform(k_real, (N, C, H, W), jnp.float32)
    # NCHW -> NHWC kernel layout
    fake_image = jnp.transpose(fake_nchw, (0, 2, 3, 1))
    real_image = jnp.transpose(real_nchw, (0, 2, 3, 1))

    disc_params = tuple(init_disc_params(k) for k in jax.random.split(k_params, len(SCALES)))

    losses = gan_model_losses(fake_image, real_image, disc_params)
    jax.block_until_ready(losses)
    print("KERNEL_OK")
</pallas_src>

<mosaic_0001>
module attributes {stable_mosaic.version = 11 : i64} {
  func.func @_disc_conv_kernel(%arg0: i32, %arg1: memref<1x1x4x27xbf16, #tpu.memory_space<vmem>>, %arg2: memref<1x27x64xbf16, #tpu.memory_space<vmem>>, %arg3: memref<8x64xf32, #tpu.memory_space<vmem>>, %arg4: memref<1x4x64xbf16, #tpu.memory_space<vmem>>) attributes {dimension_semantics = [#tpu.dimension_semantics<parallel>], iteration_bounds = array<i64: 4>, scalar_prefetch = 0 : i64, scratch_operands = 0 : i64, tpu.core_type = #tpu.core_type<tc>, window_params = [{transform_indices = @transform_0, window_bounds = array<i64: 1, 1, 4, 27>}, {pipeline_mode = #tpu.pipeline_mode<synchronous>, transform_indices = @transform_1, window_bounds = array<i64: 1, 27, 64>}, {pipeline_mode = #tpu.pipeline_mode<synchronous>, transform_indices = @transform_2, window_bounds = array<i64: 8, 64>}, {transform_indices = @transform_3, window_bounds = array<i64: 1, 4, 64>}]} {
    %cst = arith.constant 0.000000e+00 : f32
    %0 = vector.broadcast %cst : f32 to vector<4x64xf32>
    %c0 = arith.constant 0 : index
    %c0_0 = arith.constant 0 : index
    %c0_1 = arith.constant 0 : index
    %c0_2 = arith.constant 0 : index
    %1 = vector.load %arg1[%c0, %c0_0, %c0_1, %c0_2] : memref<1x1x4x27xbf16, #tpu.memory_space<vmem>>, vector<1x1x4x27xbf16>
    %2 = vector.shape_cast %1 : vector<1x1x4x27xbf16> to vector<4x27xbf16>
    %c0_3 = arith.constant 0 : index
    %c0_4 = arith.constant 0 : index
    %c0_5 = arith.constant 0 : index
    %3 = vector.load %arg2[%c0_3, %c0_4, %c0_5] : memref<1x27x64xbf16, #tpu.memory_space<vmem>>, vector<1x27x64xbf16>
    %4 = vector.shape_cast %3 : vector<1x27x64xbf16> to vector<27x64xbf16>
    %cst_6 = arith.constant dense<0.000000e+00> : vector<4x64xf32>
    %5 = tpu.matmul %2, %4, %cst_6 {dimension_numbers = #tpu.dot_dimension_numbers<[1], [0], [0], [1], [0, 0, 1, 1], [], []>} : vector<4x27xbf16>, vector<27x64xbf16>, vector<4x64xf32> -> vector<4x64xf32>
    %6 = arith.addf %0, %5 : vector<4x64xf32>
    %c0_7 = arith.constant 0 : index
    %c0_8 = arith.constant 0 : index
    %7 = vector.load %arg3[%c0_7, %c0_8] : memref<8x64xf32, #tpu.memory_space<vmem>>, vector<1x64xf32>
    %8 = vector.broadcast %7 : vector<1x64xf32> to vector<4x64xf32>
    %9 = arith.addf %6, %8 : vector<4x64xf32>
    %cst_9 = arith.constant 0.000000e+00 : f32
    %10 = vector.broadcast %cst_9 : f32 to vector<4x64xf32>
    %11 = arith.cmpf oge, %9, %10 : vector<4x64xf32>
    %cst_10 = arith.constant 2.000000e-01 : f32
    %12 = vector.broadcast %cst_10 : f32 to vector<4x64xf32>
    %13 = arith.mulf %12, %9 : vector<4x64xf32>
    %14 = arith.select %11, %9, %13 : vector<4x64xi1>, vector<4x64xf32>
    %cst_11 = arith.constant dense<0.000000e+00> : vector<64xf32>
    %15 = vector.multi_reduction <add>, %14, %cst_11 [0] : vector<4x64xf32> to vector<64xf32>
    %16 = vector.shape_cast %15 : vector<64xf32> to vector<1x64xf32>
    %cst_12 = arith.constant 2.500000e-01 : f32
    %17 = vector.broadcast %cst_12 : f32 to vector<1x64xf32>
    %18 = arith.mulf %16, %17 : vector<1x64xf32>
    %19 = arith.mulf %14, %14 : vector<4x64xf32>
    %cst_13 = arith.constant dense<0.000000e+00> : vector<64xf32>
    %20 = vector.multi_reduction <add>, %19, %cst_13 [0] : vector<4x64xf32> to vector<64xf32>
    %21 = vector.shape_cast %20 : vector<64xf32> to vector<1x64xf32>
    %cst_14 = arith.constant 2.500000e-01 : f32
    %22 = vector.broadcast %cst_14 : f32 to vector<1x64xf32>
    %23 = arith.mulf %21, %22 : vector<1x64xf32>
    %24 = arith.mulf %18, %18 : vector<1x64xf32>
    %25 = arith.subf %23, %24 : vector<1x64xf32>
    %cst_15 = arith.constant 9.99999974E-6 : f32
    %26 = vector.broadcast %cst_15 : f32 to vector<1x64xf32>
    %27 = arith.addf %25, %26 : vector<1x64xf32>
    %28 = math.rsqrt %27 : vector<1x64xf32>
    %c1 = arith.constant 1 : index
    %c0_16 = arith.constant 0 : index
    %29 = vector.load %arg3[%c1, %c0_16] : memref<8x64xf32, #tpu.memory_space<vmem>>, vector<1x64xf32>
    %30 = arith.mulf %28, %29 : vector<1x64xf32>
    %c2 = arith.constant 2 : index
    %c0_17 = arith.constant 0 : index
    %31 = vector.load %arg3[%c2, %c0_17] : memref<8x64xf32, #tpu.memory_space<vmem>>, vector<1x64xf32>
    %32 = arith.mulf %18, %30 : vector<1x64xf32>
    %33 = arith.subf %31, %32 : vector<1x64xf32>
    %34 = vector.broadcast %30 : vector<1x64xf32> to vector<4x64xf32>
    %35 = arith.mulf %14, %34 : vector<4x64xf32>
    %36 = vector.broadcast %33 : vector<1x64xf32> to vector<4x64xf32>
    %37 = arith.addf %35, %36 : vector<4x64xf32>
    %38 = arith.truncf %37 : vector<4x64xf32> to vector<4x64xbf16>
    %c0_18 = arith.constant 0 : index
    %c0_19 = arith.constant 0 : index
    %c0_20 = arith.constant 0 : index
    %39 = vector.load %arg4[%c0_18, %c0_19, %c0_20] : memref<1x4x64xbf16, #tpu.memory_space<vmem>>, vector<1x4x64xbf16>
    %40 = vector.shape_cast %39 : vector<1x4x64xbf16> to vector<4x64xbf16>
    %41 = vector.shape_cast %38 : vector<4x64xbf16> to vector<1x4x64xbf16>
    tpu.vector_store %arg4[%c0_18, %c0_19, %c0_20], %41 {strides = array<i32>} : memref<1x4x64xbf16, #tpu.memory_space<vmem>>, vector<1x4x64xbf16>,
    return
  }
  func.func @transform_0(%arg0: i32) -> (i32, i32, i32, i32) {
    %c0_i32 = arith.constant 0 : i32
    %c0_i32_0 = arith.constant 0 : i32
    %c0_i32_1 = arith.constant 0 : i32
    %c0_i32_2 = arith.constant 0 : i32
    return %arg0, %c0_i32, %c0_i32_0, %c0_i32_1 : i32, i32, i32, i32
  }
  func.func @transform_1(%arg0: i32) -> (i32, i32, i32) {
    %c0_i32 = arith.constant 0 : i32
    %c0_i32_0 = arith.constant 0 : i32
    %c0_i32_1 = arith.constant 0 : i32
    %c0_i32_2 = arith.constant 0 : i32
    return %c0_i32, %c0_i32_0, %c0_i32_1 : i32, i32, i32
  }
  func.func @transform_2(%arg0: i32) -> (i32, i32) {
    %c0_i32 = arith.constant 0 : i32
    %c0_i32_0 = arith.constant 0 : i32
    %c0_i32_1 = arith.constant 0 : i32
    return %c0_i32, %c0_i32_0 : i32, i32
  }
  func.func @transform_3(%arg0: i32) -> (i32, i32, i32) {
    %c0_i32 = arith.constant 0 : i32
    %c0_i32_0 = arith.constant 0 : i32
    %c0_i32_1 = arith.constant 0 : i32
    return %arg0, %c0_i32, %c0_i32_0 : i32, i32, i32
  }
}

module attributes {stable_mosaic.version = 11 : i64} {
  func.func @_disc_conv_kernel(%arg0: i32, %arg1: memref<1x2x2x192xbf16, #tpu.memory_space<vmem>>, %arg2: memref<3x192x128xbf16, #tpu.memory_space<vmem>>, %arg3: memref<8x128xf32, #tpu.memory_space<vmem>>, %arg4: memref<1x1x128xbf16, #tpu.memory_space<vmem>>) attributes {dimension_semantics = [#tpu.dimension_semantics<parallel>], iteration_bounds = array<i64: 4>, scalar_prefetch = 0 : i64, scratch_operands = 0 : i64, tpu.core_type = #tpu.core_type<tc>, window_params = [{transform_indices = @transform_0, window_bounds = array<i64: 1, 2, 2, 192>}, {pipeline_mode = #tpu.pipeline_mode<synchronous>, transform_indices = @transform_1, window_bounds = array<i64: 3, 192, 128>}, {pipeline_mode = #tpu.pipeline_mode<synchronous>, transform_indices = @transform_2, window_bounds = array<i64: 8, 128>}, {transform_indices = @transform_3, window_bounds = array<i64: 1, 1, 128>}]} {
    %cst = arith.constant 0.000000e+00 : f32
    %0 = vector.broadcast %cst : f32 to vector<1x128xf32>
    %c0 = arith.constant 0 : index
    %c0_0 = arith.constant 0 : index
    %c0_1 = arith.constant 0 : index
    %c0_2 = arith.constant 0 : index
    %1 = vector.load %arg1[%c0, %c0_0, %c0_1, %c0_2] : memref<1x2x2x192xbf16, #tpu.memory_space<vmem>>, vector<1x1x1x192xbf16>
    %2 = vector.shape_cast %1 : vector<1x1x1x192xbf16> to vector<1x192xbf16>
    %c0_3 = arith.constant 0 : index
    %c0_4 = arith.constant 0 : index
    %c0_5 = arith.constant 0 : index
    %3 = vector.load %arg2[%c0_3, %c0_4, %c0_5] : memref<3x192x128xbf16, #tpu.memory_space<vmem>>, vector<1x192x128xbf16>
    %4 = vector.shape_cast %3 : vector<1x192x128xbf16> to vector<192x128xbf16>
    %cst_6 = arith.constant dense<0.000000e+00> : vector<1x128xf32>
    %5 = tpu.matmul %2, %4, %cst_6 {dimension_numbers = #tpu.dot_dimension_numbers<[1], [0], [0], [1], [0, 0, 1, 1], [], []>} : vector<1x192xbf16>, vector<192x128xbf16>, vector<1x128xf32> -> vector<1x128xf32>
    %6 = arith.addf %0, %5 : vector<1x128xf32>
    %c0_7 = arith.constant 0 : index
    %c1 = arith.constant 1 : index
    %c0_8 = arith.constant 0 : index
    %c0_9 = arith.constant 0 : index
    %7 = vector.load %arg1[%c0_7, %c1, %c0_8, %c0_9] : memref<1x2x2x192xbf16, #tpu.memory_space<vmem>>, vector<1x1x1x192xbf16>
    %8 = vector.shape_cast %7 : vector<1x1x1x192xbf16> to vector<1x192xbf16>
    %c1_10 = arith.constant 1 : index
    %c0_11 = arith.constant 0 : index
    %c0_12 = arith.constant 0 : index
    %9 = vector.load %arg2[%c1_10, %c0_11, %c0_12] : memref<3x192x128xbf16, #tpu.memory_space<vmem>>, vector<1x192x128xbf16>
    %10 = vector.shape_cast %9 : vector<1x192x128xbf16> to vector<192x128xbf16>
    %cst_13 = arith.constant dense<0.000000e+00> : vector<1x128xf32>
    %11 = tpu.matmul %8, %10, %cst_13 {dimension_numbers = #tpu.dot_dimension_numbers<[1], [0], [0], [1], [0, 0, 1, 1], [], []>} : vector<1x192xbf16>, vector<192x128xbf16>, vector<1x128xf32> -> vector<1x128xf32>
    %12 = arith.addf %6, %11 : vector<1x128xf32>
    %c0_14 = arith.constant 0 : index
    %c0_15 = arith.constant 0 : index
    %c1_16 = arith.constant 1 : index
    %c0_17 = arith.constant 0 : index
    %13 = vector.load %arg1[%c0_14, %c0_15, %c1_16, %c0_17] : memref<1x2x2x192xbf16, #tpu.memory_space<vmem>>, vector<1x1x1x192xbf16>
    %14 = vector.shape_cast %13 : vector<1x1x1x192xbf16> to vector<1x192xbf16>
    %c2 = arith.constant 2 : index
    %c0_18 = arith.constant 0 : index
    %c0_19 = arith.constant 0 : index
    %15 = vector.load %arg2[%c2, %c0_18, %c0_19] : memref<3x192x128xbf16, #tpu.memory_space<vmem>>, vector<1x192x128xbf16>
    %16 = vector.shape_cast %15 : vector<1x192x128xbf16> to vector<192x128xbf16>
    %cst_20 = arith.constant dense<0.000000e+00> : vector<1x128xf32>
    %17 = tpu.matmul %14, %16, %cst_20 {dimension_numbers = #tpu.dot_dimension_numbers<[1], [0], [0], [1], [0, 0, 1, 1], [], []>} : vector<1x192xbf16>, vector<192x128xbf16>, vector<1x128xf32> -> vector<1x128xf32>
    %18 = arith.addf %12, %17 : vector<1x128xf32>
    %c0_21 = arith.constant 0 : index
    %c0_22 = arith.constant 0 : index
    %19 = vector.load %arg3[%c0_21, %c0_22] : memref<8x128xf32, #tpu.memory_space<vmem>>, vector<1x128xf32>
    %20 = arith.addf %18, %19 : vector<1x128xf32>
    %cst_23 = arith.constant 0.000000e+00 : f32
    %21 = vector.broadcast %cst_23 : f32 to vector<1x128xf32>
    %22 = arith.cmpf oge, %20, %21 : vector<1x128xf32>
    %cst_24 = arith.constant 2.000000e-01 : f32
    %23 = vector.broadcast %cst_24 : f32 to vector<1x128xf32>
    %24 = arith.mulf %23, %20 : vector<1x128xf32>
    %25 = arith.select %22, %20, %24 : vector<1x128xi1>, vector<1x128xf32>
    %cst_25 = arith.constant dense<0.000000e+00> : vector<128xf32>
    %26 = vector.multi_reduction <add>, %25, %cst_25 [0] : vector<1x128xf32> to vector<128xf32>
    %27 = vector.shape_cast %26 : vector<128xf32> to vector<1x128xf32>
    %cst_26 = arith.constant 1.000000e+00 : f32
    %28 = vector.broadcast %cst_26 : f32 to vector<1x128xf32>
    %29 = arith.mulf %27, %28 : vector<1x128xf32>
    %30 = arith.mulf %25, %25 : vector<1x128xf32>
    %cst_27 = arith.constant dense<0.000000e+00> : vector<128xf32>
    %31 = vector.multi_reduction <add>, %30, %cst_27 [0] : vector<1x128xf32> to vector<128xf32>
    %32 = vector.shape_cast %31 : vector<128xf32> to vector<1x128xf32>
    %cst_28 = arith.constant 1.000000e+00 : f32
    %33 = vector.broadcast %cst_28 : f32 to vector<1x128xf32>
    %34 = arith.mulf %32, %33 : vector<1x128xf32>
    %35 = arith.mulf %29, %29 : vector<1x128xf32>
    %36 = arith.subf %34, %35 : vector<1x128xf32>
    %cst_29 = arith.constant 9.99999974E-6 : f32
    %37 = vector.broadcast %cst_29 : f32 to vector<1x128xf32>
    %38 = arith.addf %36, %37 : vector<1x128xf32>
    %39 = math.rsqrt %38 : vector<1x128xf32>
    %c1_30 = arith.constant 1 : index
    %c0_31 = arith.constant 0 : index
    %40 = vector.load %arg3[%c1_30, %c0_31] : memref<8x128xf32, #tpu.memory_space<vmem>>, vector<1x128xf32>
    %41 = arith.mulf %39, %40 : vector<1x128xf32>
    %c2_32 = arith.constant 2 : index
    %c0_33 = arith.constant 0 : index
    %42 = vector.load %arg3[%c2_32, %c0_33] : memref<8x128xf32, #tpu.memory_space<vmem>>, vector<1x128xf32>
    %43 = arith.mulf %29, %41 : vector<1x128xf32>
    %44 = arith.subf %42, %43 : vector<1x128xf32>
    %45 = arith.mulf %25, %41 : vector<1x128xf32>
    %46 = arith.addf %45, %44 : vector<1x128xf32>
    %47 = arith.truncf %46 : vector<1x128xf32> to vector<1x128xbf16>
    %c0_34 = arith.constant 0 : index
    %c0_35 = arith.constant 0 : index
    %c0_36 = arith.constant 0 : index
    %48 = vector.load %arg4[%c0_34, %c0_35, %c0_36] : memref<1x1x128xbf16, #tpu.memory_space<vmem>>, vector<1x1x128xbf16>
    %49 = vector.shape_cast %48 : vector<1x1x128xbf16> to vector<1x128xbf16>
    %50 = vector.shape_cast %47 : vector<1x128xbf16> to vector<1x1x128xbf16>
    tpu.vector_store %arg4[%c0_34, %c0_35, %c0_36], %50 {strides = array<i32>} : memref<1x1x128xbf16, #tpu.memory_space<vmem>>, vector<1x1x128xbf16>,
    return
  }
  func.func @transform_0(%arg0: i32) -> (i32, i32, i32, i32) {
    %c0_i32 = arith.constant 0 : i32
    %c0_i32_0 = arith.constant 0 : i32
    %c0_i32_1 = arith.constant 0 : i32
    %c0_i32_2 = arith.constant 0 : i32
    return %arg0, %c0_i32, %c0_i32_0, %c0_i32_1 : i32, i32, i32, i32
  }
  func.func @transform_1(%arg0: i32) -> (i32, i32, i32) {
    %c0_i32 = arith.constant 0 : i32
    %c0_i32_0 = arith.constant 0 : i32
    %c0_i32_1 = arith.constant 0 : i32
    %c0_i32_2 = arith.constant 0 : i32
    return %c0_i32, %c0_i32_0, %c0_i32_1 : i32, i32, i32
  }
  func.func @transform_2(%arg0: i32) -> (i32, i32) {
    %c0_i32 = arith.constant 0 : i32
    %c0_i32_0 = arith.constant 0 : i32
    %c0_i32_1 = arith.constant 0 : i32
    return %c0_i32, %c0_i32_0 : i32, i32
  }
  func.func @transform_3(%arg0: i32) -> (i32, i32, i32) {
    %c0_i32 = arith.constant 0 : i32
    %c0_i32_0 = arith.constant 0 : i32
    %c0_i32_1 = arith.constant 0 : i32
    return %arg0, %c0_i32, %c0_i32_0 : i32, i32, i32
  }
}

module attributes {stable_mosaic.version = 11 : i64} {
  func.func @_disc_conv_kernel(%arg0: i32, %arg1: memref<1x2x2x384xbf16, #tpu.memory_space<vmem>>, %arg2: memref<3x384x128xbf16, #tpu.memory_space<vmem>>, %arg3: memref<8x128xf32, #tpu.memory_space<vmem>>, %arg4: memref<1x1x128xbf16, #tpu.memory_space<vmem>>) attributes {dimension_semantics = [#tpu.dimension_semantics<parallel>], iteration_bounds = array<i64: 4>, scalar_prefetch = 0 : i64, scratch_operands = 0 : i64, tpu.core_type = #tpu.core_type<tc>, window_params = [{transform_indices = @transform_0, window_bounds = array<i64: 1, 2, 2, 384>}, {pipeline_mode = #tpu.pipeline_mode<synchronous>, transform_indices = @transform_1, window_bounds = array<i64: 3, 384, 128>}, {pipeline_mode = #tpu.pipeline_mode<synchronous>, transform_indices = @transform_2, window_bounds = array<i64: 8, 128>}, {transform_indices = @transform_3, window_bounds = array<i64: 1, 1, 128>}]} {
    %cst = arith.constant 0.000000e+00 : f32
    %0 = vector.broadcast %cst : f32 to vector<1x128xf32>
    %c0 = arith.constant 0 : index
    %c0_0 = arith.constant 0 : index
    %c0_1 = arith.constant 0 : index
    %c0_2 = arith.constant 0 : index
    %1 = vector.load %arg1[%c0, %c0_0, %c0_1, %c0_2] : memref<1x2x2x384xbf16, #tpu.memory_space<vmem>>, vector<1x1x1x384xbf16>
    %2 = vector.shape_cast %1 : vector<1x1x1x384xbf16> to vector<1x384xbf16>
    %c0_3 = arith.constant 0 : index
    %c0_4 = arith.constant 0 : index
    %c0_5 = arith.constant 0 : index
    %3 = vector.load %arg2[%c0_3, %c0_4, %c0_5] : memref<3x384x128xbf16, #tpu.memory_space<vmem>>, vector<1x384x128xbf16>
    %4 = vector.shape_cast %3 : vector<1x384x128xbf16> to vector<384x128xbf16>
    %cst_6 = arith.constant dense<0.000000e+00> : vector<1x128xf32>
    %5 = tpu.matmul %2, %4, %cst_6 {dimension_numbers = #tpu.dot_dimension_numbers<[1], [0], [0], [1], [0, 0, 1, 1], [], []>} : vector<1x384xbf16>, vector<384x128xbf16>, vector<1x128xf32> -> vector<1x128xf32>
    %6 = arith.addf %0, %5 : vector<1x128xf32>
    %c0_7 = arith.constant 0 : index
    %c1 = arith.constant 1 : index
    %c0_8 = arith.constant 0 : index
    %c0_9 = arith.constant 0 : index
    %7 = vector.load %arg1[%c0_7, %c1, %c0_8, %c0_9] : memref<1x2x2x384xbf16, #tpu.memory_space<vmem>>, vector<1x1x1x384xbf16>
    %8 = vector.shape_cast %7 : vector<1x1x1x384xbf16> to vector<1x384xbf16>
    %c1_10 = arith.constant 1 : index
    %c0_11 = arith.constant 0 : index
    %c0_12 = arith.constant 0 : index
    %9 = vector.load %arg2[%c1_10, %c0_11, %c0_12] : memref<3x384x128xbf16, #tpu.memory_space<vmem>>, vector<1x384x128xbf16>
    %10 = vector.shape_cast %9 : vector<1x384x128xbf16> to vector<384x128xbf16>
    %cst_13 = arith.constant dense<0.000000e+00> : vector<1x128xf32>
    %11 = tpu.matmul %8, %10, %cst_13 {dimension_numbers = #tpu.dot_dimension_numbers<[1], [0], [0], [1], [0, 0, 1, 1], [], []>} : vector<1x384xbf16>, vector<384x128xbf16>, vector<1x128xf32> -> vector<1x128xf32>
    %12 = arith.addf %6, %11 : vector<1x128xf32>
    %c0_14 = arith.constant 0 : index
    %c0_15 = arith.constant 0 : index
    %c1_16 = arith.constant 1 : index
    %c0_17 = arith.constant 0 : index
    %13 = vector.load %arg1[%c0_14, %c0_15, %c1_16, %c0_17] : memref<1x2x2x384xbf16, #tpu.memory_space<vmem>>, vector<1x1x1x384xbf16>
    %14 = vector.shape_cast %13 : vector<1x1x1x384xbf16> to vector<1x384xbf16>
    %c2 = arith.constant 2 : index
    %c0_18 = arith.constant 0 : index
    %c0_19 = arith.constant 0 : index
    %15 = vector.load %arg2[%c2, %c0_18, %c0_19] : memref<3x384x128xbf16, #tpu.memory_space<vmem>>, vector<1x384x128xbf16>
    %16 = vector.shape_cast %15 : vector<1x384x128xbf16> to vector<384x128xbf16>
    %cst_20 = arith.constant dense<0.000000e+00> : vector<1x128xf32>
    %17 = tpu.matmul %14, %16, %cst_20 {dimension_numbers = #tpu.dot_dimension_numbers<[1], [0], [0], [1], [0, 0, 1, 1], [], []>} : vector<1x384xbf16>, vector<384x128xbf16>, vector<1x128xf32> -> vector<1x128xf32>
    %18 = arith.addf %12, %17 : vector<1x128xf32>
    %c0_21 = arith.constant 0 : index
    %c0_22 = arith.constant 0 : index
    %19 = vector.load %arg3[%c0_21, %c0_22] : memref<8x128xf32, #tpu.memory_space<vmem>>, vector<1x128xf32>
    %20 = arith.addf %18, %19 : vector<1x128xf32>
    %cst_23 = arith.constant 0.000000e+00 : f32
    %21 = vector.broadcast %cst_23 : f32 to vector<1x128xf32>
    %22 = arith.cmpf oge, %20, %21 : vector<1x128xf32>
    %cst_24 = arith.constant 2.000000e-01 : f32
    %23 = vector.broadcast %cst_24 : f32 to vector<1x128xf32>
    %24 = arith.mulf %23, %20 : vector<1x128xf32>
    %25 = arith.select %22, %20, %24 : vector<1x128xi1>, vector<1x128xf32>
    %cst_25 = arith.constant dense<0.000000e+00> : vector<128xf32>
    %26 = vector.multi_reduction <add>, %25, %cst_25 [0] : vector<1x128xf32> to vector<128xf32>
    %27 = vector.shape_cast %26 : vector<128xf32> to vector<1x128xf32>
    %cst_26 = arith.constant 1.000000e+00 : f32
    %28 = vector.broadcast %cst_26 : f32 to vector<1x128xf32>
    %29 = arith.mulf %27, %28 : vector<1x128xf32>
    %30 = arith.mulf %25, %25 : vector<1x128xf32>
    %cst_27 = arith.constant dense<0.000000e+00> : vector<128xf32>
    %31 = vector.multi_reduction <add>, %30, %cst_27 [0] : vector<1x128xf32> to vector<128xf32>
    %32 = vector.shape_cast %31 : vector<128xf32> to vector<1x128xf32>
    %cst_28 = arith.constant 1.000000e+00 : f32
    %33 = vector.broadcast %cst_28 : f32 to vector<1x128xf32>
    %34 = arith.mulf %32, %33 : vector<1x128xf32>
    %35 = arith.mulf %29, %29 : vector<1x128xf32>
    %36 = arith.subf %34, %35 : vector<1x128xf32>
    %cst_29 = arith.constant 9.99999974E-6 : f32
    %37 = vector.broadcast %cst_29 : f32 to vector<1x128xf32>
    %38 = arith.addf %36, %37 : vector<1x128xf32>
    %39 = math.rsqrt %38 : vector<1x128xf32>
    %c1_30 = arith.constant 1 : index
    %c0_31 = arith.constant 0 : index
    %40 = vector.load %arg3[%c1_30, %c0_31] : memref<8x128xf32, #tpu.memory_space<vmem>>, vector<1x128xf32>
    %41 = arith.mulf %39, %40 : vector<1x128xf32>
    %c2_32 = arith.constant 2 : index
    %c0_33 = arith.constant 0 : index
    %42 = vector.load %arg3[%c2_32, %c0_33] : memref<8x128xf32, #tpu.memory_space<vmem>>, vector<1x128xf32>
    %43 = arith.mulf %29, %41 : vector<1x128xf32>
    %44 = arith.subf %42, %43 : vector<1x128xf32>
    %45 = arith.mulf %25, %41 : vector<1x128xf32>
    %46 = arith.addf %45, %44 : vector<1x128xf32>
    %47 = arith.truncf %46 : vector<1x128xf32> to vector<1x128xbf16>
    %c0_34 = arith.constant 0 : index
    %c0_35 = arith.constant 0 : index
    %c0_36 = arith.constant 0 : index
    %48 = vector.load %arg4[%c0_34, %c0_35, %c0_36] : memref<1x1x128xbf16, #tpu.memory_space<vmem>>, vector<1x1x128xbf16>
    %49 = vector.shape_cast %48 : vector<1x1x128xbf16> to vector<1x128xbf16>
    %50 = vector.shape_cast %47 : vector<1x128xbf16> to vector<1x1x128xbf16>
    tpu.vector_store %arg4[%c0_34, %c0_35, %c0_36], %50 {strides = array<i32>} : memref<1x1x128xbf16, #tpu.memory_space<vmem>>, vector<1x1x128xbf16>,
    return
  }
  func.func @transform_0(%arg0: i32) -> (i32, i32, i32, i32) {
    %c0_i32 = arith.constant 0 : i32
    %c0_i32_0 = arith.constant 0 : i32
    %c0_i32_1 = arith.constant 0 : i32
    %c0_i32_2 = arith.constant 0 : i32
    return %arg0, %c0_i32, %c0_i32_0, %c0_i32_1 : i32, i32, i32, i32
  }
  func.func @transform_1(%arg0: i32) -> (i32, i32, i32) {
    %c0_i32 = arith.constant 0 : i32
    %c0_i32_0 = arith.constant 0 : i32
    %c0_i32_1 = arith.constant 0 : i32
    %c0_i32_2 = arith.constant 0 : i32
    return %c0_i32, %c0_i32_0, %c0_i32_1 : i32, i32, i32
  }
  func.func @transform_2(%arg0: i32) -> (i32, i32) {
    %c0_i32 = arith.constant 0 : i32
    %c0_i32_0 = arith.constant 0 : i32
    %c0_i32_1 = arith.constant 0 : i32
    return %c0_i32, %c0_i32_0 : i32, i32
  }
  func.func @transform_3(%arg0: i32) -> (i32, i32, i32) {
    %c0_i32 = arith.constant 0 : i32
    %c0_i32_0 = arith.constant 0 : i32
    %c0_i32_1 = arith.constant 0 : i32
    return %arg0, %c0_i32, %c0_i32_0 : i32, i32, i32
  }
}

module attributes {stable_mosaic.version = 11 : i64} {
  func.func @_disc_conv_kernel(%arg0: i32, %arg1: memref<1x1x16x27xbf16, #tpu.memory_space<vmem>>, %arg2: memref<1x27x64xbf16, #tpu.memory_space<vmem>>, %arg3: memref<8x64xf32, #tpu.memory_space<vmem>>, %arg4: memref<1x16x64xbf16, #tpu.memory_space<vmem>>) attributes {dimension_semantics = [#tpu.dimension_semantics<parallel>], iteration_bounds = array<i64: 4>, scalar_prefetch = 0 : i64, scratch_operands = 0 : i64, tpu.core_type = #tpu.core_type<tc>, window_params = [{transform_indices = @transform_0, window_bounds = array<i64: 1, 1, 16, 27>}, {pipeline_mode = #tpu.pipeline_mode<synchronous>, transform_indices = @transform_1, window_bounds = array<i64: 1, 27, 64>}, {pipeline_mode = #tpu.pipeline_mode<synchronous>, transform_indices = @transform_2, window_bounds = array<i64: 8, 64>}, {transform_indices = @transform_3, window_bounds = array<i64: 1, 16, 64>}]} {
    %cst = arith.constant 0.000000e+00 : f32
    %0 = vector.broadcast %cst : f32 to vector<16x64xf32>
    %c0 = arith.constant 0 : index
    %c0_0 = arith.constant 0 : index
    %c0_1 = arith.constant 0 : index
    %c0_2 = arith.constant 0 : index
    %1 = vector.load %arg1[%c0, %c0_0, %c0_1, %c0_2] : memref<1x1x16x27xbf16, #tpu.memory_space<vmem>>, vector<1x1x16x27xbf16>
    %2 = vector.shape_cast %1 : vector<1x1x16x27xbf16> to vector<16x27xbf16>
    %c0_3 = arith.constant 0 : index
    %c0_4 = arith.constant 0 : index
    %c0_5 = arith.constant 0 : index
    %3 = vector.load %arg2[%c0_3, %c0_4, %c0_5] : memref<1x27x64xbf16, #tpu.memory_space<vmem>>, vector<1x27x64xbf16>
    %4 = vector.shape_cast %3 : vector<1x27x64xbf16> to vector<27x64xbf16>
    %cst_6 = arith.constant dense<0.000000e+00> : vector<16x64xf32>
    %5 = tpu.matmul %2, %4, %cst_6 {dimension_numbers = #tpu.dot_dimension_numbers<[1], [0], [0], [1], [0, 0, 1, 1], [], []>} : vector<16x27xbf16>, vector<27x64xbf16>, vector<16x64xf32> -> vector<16x64xf32>
    %6 = arith.addf %0, %5 : vector<16x64xf32>
    %c0_7 = arith.constant 0 : index
    %c0_8 = arith.constant 0 : index
    %7 = vector.load %arg3[%c0_7, %c0_8] : memref<8x64xf32, #tpu.memory_space<vmem>>, vector<1x64xf32>
    %8 = vector.broadcast %7 : vector<1x64xf32> to vector<16x64xf32>
    %9 = arith.addf %6, %8 : vector<16x64xf32>
    %cst_9 = arith.constant 0.000000e+00 : f32
    %10 = vector.broadcast %cst_9 : f32 to vector<16x64xf32>
    %11 = arith.cmpf oge, %9, %10 : vector<16x64xf32>
    %cst_10 = arith.constant 2.000000e-01 : f32
    %12 = vector.broadcast %cst_10 : f32 to vector<16x64xf32>
    %13 = arith.mulf %12, %9 : vector<16x64xf32>
    %14 = arith.select %11, %9, %13 : vector<16x64xi1>, vector<16x64xf32>
    %cst_11 = arith.constant dense<0.000000e+00> : vector<64xf32>
    %15 = vector.multi_reduction <add>, %14, %cst_11 [0] : vector<16x64xf32> to vector<64xf32>
    %16 = vector.shape_cast %15 : vector<64xf32> to vector<1x64xf32>
    %cst_12 = arith.constant 6.250000e-02 : f32
    %17 = vector.broadcast %cst_12 : f32 to vector<1x64xf32>
    %18 = arith.mulf %16, %17 : vector<1x64xf32>
    %19 = arith.mulf %14, %14 : vector<16x64xf32>
    %cst_13 = arith.constant dense<0.000000e+00> : vector<64xf32>
    %20 = vector.multi_reduction <add>, %19, %cst_13 [0] : vector<16x64xf32> to vector<64xf32>
    %21 = vector.shape_cast %20 : vector<64xf32> to vector<1x64xf32>
    %cst_14 = arith.constant 6.250000e-02 : f32
    %22 = vector.broadcast %cst_14 : f32 to vector<1x64xf32>
    %23 = arith.mulf %21, %22 : vector<1x64xf32>
    %24 = arith.mulf %18, %18 : vector<1x64xf32>
    %25 = arith.subf %23, %24 : vector<1x64xf32>
    %cst_15 = arith.constant 9.99999974E-6 : f32
    %26 = vector.broadcast %cst_15 : f32 to vector<1x64xf32>
    %27 = arith.addf %25, %26 : vector<1x64xf32>
    %28 = math.rsqrt %27 : vector<1x64xf32>
    %c1 = arith.constant 1 : index
    %c0_16 = arith.constant 0 : index
    %29 = vector.load %arg3[%c1, %c0_16] : memref<8x64xf32, #tpu.memory_space<vmem>>, vector<1x64xf32>
    %30 = arith.mulf %28, %29 : vector<1x64xf32>
    %c2 = arith.constant 2 : index
    %c0_17 = arith.constant 0 : index
    %31 = vector.load %arg3[%c2, %c0_17] : memref<8x64xf32, #tpu.memory_space<vmem>>, vector<1x64xf32>
    %32 = arith.mulf %18, %30 : vector<1x64xf32>
    %33 = arith.subf %31, %32 : vector<1x64xf32>
    %34 = vector.broadcast %30 : vector<1x64xf32> to vector<16x64xf32>
    %35 = arith.mulf %14, %34 : vector<16x64xf32>
    %36 = vector.broadcast %33 : vector<1x64xf32> to vector<16x64xf32>
    %37 = arith.addf %35, %36 : vector<16x64xf32>
    %38 = arith.truncf %37 : vector<16x64xf32> to vector<16x64xbf16>
    %c0_18 = arith.constant 0 : index
    %c0_19 = arith.constant 0 : index
    %c0_20 = arith.constant 0 : index
    %39 = vector.load %arg4[%c0_18, %c0_19, %c0_20] : memref<1x16x64xbf16, #tpu.memory_space<vmem>>, vector<1x16x64xbf16>
    %40 = vector.shape_cast %39 : vector<1x16x64xbf16> to vector<16x64xbf16>
    %41 = vector.shape_cast %38 : vector<16x64xbf16> to vector<1x16x64xbf16>
    tpu.vector_store %arg4[%c0_18, %c0_19, %c0_20], %41 {strides = array<i32>} : memref<1x16x64xbf16, #tpu.memory_space<vmem>>, vector<1x16x64xbf16>,
    return
  }
  func.func @transform_0(%arg0: i32) -> (i32, i32, i32, i32) {
    %c0_i32 = arith.constant 0 : i32
    %c0_i32_0 = arith.constant 0 : i32
    %c0_i32_1 = arith.constant 0 : i32
    %c0_i32_2 = arith.constant 0 : i32
    return %arg0, %c0_i32, %c0_i32_0, %c0_i32_1 : i32, i32, i32, i32
  }
  func.func @transform_1(%arg0: i32) -> (i32, i32, i32) {
    %c0_i32 = arith.constant 0 : i32
    %c0_i32_0 = arith.constant 0 : i32
    %c0_i32_1 = arith.constant 0 : i32
    %c0_i32_2 = arith.constant 0 : i32
    return %c0_i32, %c0_i32_0, %c0_i32_1 : i32, i32, i32
  }
  func.func @transform_2(%arg0: i32) -> (i32, i32) {
    %c0_i32 = arith.constant 0 : i32
    %c0_i32_0 = arith.constant 0 : i32
    %c0_i32_1 = arith.constant 0 : i32
    return %c0_i32, %c0_i32_0 : i32, i32
  }
  func.func @transform_3(%arg0: i32) -> (i32, i32, i32) {
    %c0_i32 = arith.constant 0 : i32
    %c0_i32_0 = arith.constant 0 : i32
    %c0_i32_1 = arith.constant 0 : i32
    return %arg0, %c0_i32, %c0_i32_0 : i32, i32, i32
  }
}

module attributes {stable_mosaic.version = 11 : i64} {
  func.func @_disc_conv_kernel(%arg0: i32, %arg1: memref<1x2x6x192xbf16, #tpu.memory_space<vmem>>, %arg2: memref<3x192x128xbf16, #tpu.memory_space<vmem>>, %arg3: memref<8x128xf32, #tpu.memory_space<vmem>>, %arg4: memref<1x4x128xbf16, #tpu.memory_space<vmem>>) attributes {dimension_semantics = [#tpu.dimension_semantics<parallel>], iteration_bounds = array<i64: 4>, scalar_prefetch = 0 : i64, scratch_operands = 0 : i64, tpu.core_type = #tpu.core_type<tc>, window_params = [{transform_indices = @transform_0, window_bounds = array<i64: 1, 2, 6, 192>}, {pipeline_mode = #tpu.pipeline_mode<synchronous>, transform_indices = @transform_1, window_bounds = array<i64: 3, 192, 128>}, {pipeline_mode = #tpu.pipeline_mode<synchronous>, transform_indices = @transform_2, window_bounds = array<i64: 8, 128>}, {transform_indices = @transform_3, window_bounds = array<i64: 1, 4, 128>}]} {
    %cst = arith.constant 0.000000e+00 : f32
    %0 = vector.broadcast %cst : f32 to vector<4x128xf32>
    %c0 = arith.constant 0 : index
    %c0_0 = arith.constant 0 : index
    %c0_1 = arith.constant 0 : index
    %c0_2 = arith.constant 0 : index
    %1 = vector.load %arg1[%c0, %c0_0, %c0_1, %c0_2] : memref<1x2x6x192xbf16, #tpu.memory_space<vmem>>, vector<1x1x4x192xbf16>
    %2 = vector.shape_cast %1 : vector<1x1x4x192xbf16> to vector<4x192xbf16>
    %c0_3 = arith.constant 0 : index
    %c0_4 = arith.constant 0 : index
    %c0_5 = arith.constant 0 : index
    %3 = vector.load %arg2[%c0_3, %c0_4, %c0_5] : memref<3x192x128xbf16, #tpu.memory_space<vmem>>, vector<1x192x128xbf16>
    %4 = vector.shape_cast %3 : vector<1x192x128xbf16> to vector<192x128xbf16>
    %cst_6 = arith.constant dense<0.000000e+00> : vector<4x128xf32>
    %5 = tpu.matmul %2, %4, %cst_6 {dimension_numbers = #tpu.dot_dimension_numbers<[1], [0], [0], [1], [0, 0, 1, 1], [], []>} : vector<4x192xbf16>, vector<192x128xbf16>, vector<4x128xf32> -> vector<4x128xf32>
    %6 = arith.addf %0, %5 : vector<4x128xf32>
    %c0_7 = arith.constant 0 : index
    %c1 = arith.constant 1 : index
    %c0_8 = arith.constant 0 : index
    %c0_9 = arith.constant 0 : index
    %7 = vector.load %arg1[%c0_7, %c1, %c0_8, %c0_9] : memref<1x2x6x192xbf16, #tpu.memory_space<vmem>>, vector<1x1x4x192xbf16>
    %8 = vector.shape_cast %7 : vector<1x1x4x192xbf16> to vector<4x192xbf16>
    %c1_10 = arith.constant 1 : index
    %c0_11 = arith.constant 0 : index
    %c0_12 = arith.constant 0 : index
    %9 = vector.load %arg2[%c1_10, %c0_11, %c0_12] : memref<3x192x128xbf16, #tpu.memory_space<vmem>>, vector<1x192x128xbf16>
    %10 = vector.shape_cast %9 : vector<1x192x128xbf16> to vector<192x128xbf16>
    %cst_13 = arith.constant dense<0.000000e+00> : vector<4x128xf32>
    %11 = tpu.matmul %8, %10, %cst_13 {dimension_numbers = #tpu.dot_dimension_numbers<[1], [0], [0], [1], [0, 0, 1, 1], [], []>} : vector<4x192xbf16>, vector<192x128xbf16>, vector<4x128xf32> -> vector<4x128xf32>
    %12 = arith.addf %6, %11 : vector<4x128xf32>
    %c0_14 = arith.constant 0 : index
    %c0_15 = arith.constant 0 : index
    %c2 = arith.constant 2 : index
    %c0_16 = arith.constant 0 : index
    %13 = vector.load %arg1[%c0_14, %c0_15, %c2, %c0_16] : memref<1x2x6x192xbf16, #tpu.memory_space<vmem>>, vector<1x1x4x192xbf16>
    %14 = vector.shape_cast %13 : vector<1x1x4x192xbf16> to vector<4x192xbf16>
    %c2_17 = arith.constant 2 : index
    %c0_18 = arith.constant 0 : index
    %c0_19 = arith.constant 0 : index
    %15 = vector.load %arg2[%c2_17, %c0_18, %c0_19] : memref<3x192x128xbf16, #tpu.memory_space<vmem>>, vector<1x192x128xbf16>
    %16 = vector.shape_cast %15 : vector<1x192x128xbf16> to vector<192x128xbf16>
    %cst_20 = arith.constant dense<0.000000e+00> : vector<4x128xf32>
    %17 = tpu.matmul %14, %16, %cst_20 {dimension_numbers = #tpu.dot_dimension_numbers<[1], [0], [0], [1], [0, 0, 1, 1], [], []>} : vector<4x192xbf16>, vector<192x128xbf16>, vector<4x128xf32> -> vector<4x128xf32>
    %18 = arith.addf %12, %17 : vector<4x128xf32>
    %c0_21 = arith.constant 0 : index
    %c0_22 = arith.constant 0 : index
    %19 = vector.load %arg3[%c0_21, %c0_22] : memref<8x128xf32, #tpu.memory_space<vmem>>, vector<1x128xf32>
    %20 = vector.broadcast %19 : vector<1x128xf32> to vector<4x128xf32>
    %21 = arith.addf %18, %20 : vector<4x128xf32>
    %cst_23 = arith.constant 0.000000e+00 : f32
    %22 = vector.broadcast %cst_23 : f32 to vector<4x128xf32>
    %23 = arith.cmpf oge, %21, %22 : vector<4x128xf32>
    %cst_24 = arith.constant 2.000000e-01 : f32
    %24 = vector.broadcast %cst_24 : f32 to vector<4x128xf32>
    %25 = arith.mulf %24, %21 : vector<4x128xf32>
    %26 = arith.select %23, %21, %25 : vector<4x128xi1>, vector<4x128xf32>
    %cst_25 = arith.constant dense<0.000000e+00> : vector<128xf32>
    %27 = vector.multi_reduction <add>, %26, %cst_25 [0] : vector<4x128xf32> to vector<128xf32>
    %28 = vector.shape_cast %27 : vector<128xf32> to vector<1x128xf32>
    %cst_26 = arith.constant 2.500000e-01 : f32
    %29 = vector.broadcast %cst_26 : f32 to vector<1x128xf32>
    %30 = arith.mulf %28, %29 : vector<1x128xf32>
    %31 = arith.mulf %26, %26 : vector<4x128xf32>
    %cst_27 = arith.constant dense<0.000000e+00> : vector<128xf32>
    %32 = vector.multi_reduction <add>, %31, %cst_27 [0] : vector<4x128xf32> to vector<128xf32>
    %33 = vector.shape_cast %32 : vector<128xf32> to vector<1x128xf32>
    %cst_28 = arith.constant 2.500000e-01 : f32
    %34 = vector.broadcast %cst_28 : f32 to vector<1x128xf32>
    %35 = arith.mulf %33, %34 : vector<1x128xf32>
    %36 = arith.mulf %30, %30 : vector<1x128xf32>
    %37 = arith.subf %35, %36 : vector<1x128xf32>
    %cst_29 = arith.constant 9.99999974E-6 : f32
    %38 = vector.broadcast %cst_29 : f32 to vector<1x128xf32>
    %39 = arith.addf %37, %38 : vector<1x128xf32>
    %40 = math.rsqrt %39 : vector<1x128xf32>
    %c1_30 = arith.constant 1 : index
    %c0_31 = arith.constant 0 : index
    %41 = vector.load %arg3[%c1_30, %c0_31] : memref<8x128xf32, #tpu.memory_space<vmem>>, vector<1x128xf32>
    %42 = arith.mulf %40, %41 : vector<1x128xf32>
    %c2_32 = arith.constant 2 : index
    %c0_33 = arith.constant 0 : index
    %43 = vector.load %arg3[%c2_32, %c0_33] : memref<8x128xf32, #tpu.memory_space<vmem>>, vector<1x128xf32>
    %44 = arith.mulf %30, %42 : vector<1x128xf32>
    %45 = arith.subf %43, %44 : vector<1x128xf32>
    %46 = vector.broadcast %42 : vector<1x128xf32> to vector<4x128xf32>
    %47 = arith.mulf %26, %46 : vector<4x128xf32>
    %48 = vector.broadcast %45 : vector<1x128xf32> to vector<4x128xf32>
    %49 = arith.addf %47, %48 : vector<4x128xf32>
    %50 = arith.truncf %49 : vector<4x128xf32> to vector<4x128xbf16>
    %c0_34 = arith.constant 0 : index
    %c0_35 = arith.constant 0 : index
    %c0_36 = arith.constant 0 : index
    %51 = vector.load %arg4[%c0_34, %c0_35, %c0_36] : memref<1x4x128xbf16, #tpu.memory_space<vmem>>, vector<1x4x128xbf16>
    %52 = vector.shape_cast %51 : vector<1x4x128xbf16> to vector<4x128xbf16>
    %53 = vector.shape_cast %50 : vector<4x128xbf16> to vector<1x4x128xbf16>
    tpu.vector_store %arg4[%c0_34, %c0_35, %c0_36], %53 {strides = array<i32>} : memref<1x4x128xbf16, #tpu.memory_space<vmem>>, vector<1x4x128xbf16>,
    return
  }
  func.func @transform_0(%arg0: i32) -> (i32, i32, i32, i32) {
    %c0_i32 = arith.constant 0 : i32
    %c0_i32_0 = arith.constant 0 : i32
    %c0_i32_1 = arith.constant 0 : i32
    %c0_i32_2 = arith.constant 0 : i32
    return %arg0, %c0_i32, %c0_i32_0, %c0_i32_1 : i32, i32, i32, i32
  }
  func.func @transform_1(%arg0: i32) -> (i32, i32, i32) {
    %c0_i32 = arith.constant 0 : i32
    %c0_i32_0 = arith.constant 0 : i32
    %c0_i32_1 = arith.constant 0 : i32
    %c0_i32_2 = arith.constant 0 : i32
    return %c0_i32, %c0_i32_0, %c0_i32_1 : i32, i32, i32
  }
  func.func @transform_2(%arg0: i32) -> (i32, i32) {
    %c0_i32 = arith.constant 0 : i32
    %c0_i32_0 = arith.constant 0 : i32
    %c0_i32_1 = arith.constant 0 : i32
    return %c0_i32, %c0_i32_0 : i32, i32
  }
  func.func @transform_3(%arg0: i32) -> (i32, i32, i32) {
    %c0_i32 = arith.constant 0 : i32
    %c0_i32_0 = arith.constant 0 : i32
    %c0_i32_1 = arith.constant 0 : i32
    return %arg0, %c0_i32, %c0_i32_0 : i32, i32, i32
  }
}

module attributes {stable_mosaic.version = 11 : i64} {
  func.func @_disc_conv_kernel(%arg0: i32, %arg1: memref<1x1x64x27xbf16, #tpu.memory_space<vmem>>, %arg2: memref<1x27x64xbf16, #tpu.memory_space<vmem>>, %arg3: memref<8x64xf32, #tpu.memory_space<vmem>>, %arg4: memref<1x64x64xbf16, #tpu.memory_space<vmem>>) attributes {dimension_semantics = [#tpu.dimension_semantics<parallel>], iteration_bounds = array<i64: 4>, scalar_prefetch = 0 : i64, scratch_operands = 0 : i64, tpu.core_type = #tpu.core_type<tc>, window_params = [{transform_indices = @transform_0, window_bounds = array<i64: 1, 1, 64, 27>}, {pipeline_mode = #tpu.pipeline_mode<synchronous>, transform_indices = @transform_1, window_bounds = array<i64: 1, 27, 64>}, {pipeline_mode = #tpu.pipeline_mode<synchronous>, transform_indices = @transform_2, window_bounds = array<i64: 8, 64>}, {transform_indices = @transform_3, window_bounds = array<i64: 1, 64, 64>}]} {
    %cst = arith.constant 0.000000e+00 : f32
    %0 = vector.broadcast %cst : f32 to vector<64x64xf32>
    %c0 = arith.constant 0 : index
    %c0_0 = arith.constant 0 : index
    %c0_1 = arith.constant 0 : index
    %c0_2 = arith.constant 0 : index
    %1 = vector.load %arg1[%c0, %c0_0, %c0_1, %c0_2] : memref<1x1x64x27xbf16, #tpu.memory_space<vmem>>, vector<1x1x64x27xbf16>
    %2 = vector.shape_cast %1 : vector<1x1x64x27xbf16> to vector<64x27xbf16>
    %c0_3 = arith.constant 0 : index
    %c0_4 = arith.constant 0 : index
    %c0_5 = arith.constant 0 : index
    %3 = vector.load %arg2[%c0_3, %c0_4, %c0_5] : memref<1x27x64xbf16, #tpu.memory_space<vmem>>, vector<1x27x64xbf16>
    %4 = vector.shape_cast %3 : vector<1x27x64xbf16> to vector<27x64xbf16>
    %cst_6 = arith.constant dense<0.000000e+00> : vector<64x64xf32>
    %5 = tpu.matmul %2, %4, %cst_6 {dimension_numbers = #tpu.dot_dimension_numbers<[1], [0], [0], [1], [0, 0, 1, 1], [], []>} : vector<64x27xbf16>, vector<27x64xbf16>, vector<64x64xf32> -> vector<64x64xf32>
    %6 = arith.addf %0, %5 : vector<64x64xf32>
    %c0_7 = arith.constant 0 : index
    %c0_8 = arith.constant 0 : index
    %7 = vector.load %arg3[%c0_7, %c0_8] : memref<8x64xf32, #tpu.memory_space<vmem>>, vector<1x64xf32>
    %8 = vector.broadcast %7 : vector<1x64xf32> to vector<64x64xf32>
    %9 = arith.addf %6, %8 : vector<64x64xf32>
    %cst_9 = arith.constant 0.000000e+00 : f32
    %10 = vector.broadcast %cst_9 : f32 to vector<64x64xf32>
    %11 = arith.cmpf oge, %9, %10 : vector<64x64xf32>
    %cst_10 = arith.constant 2.000000e-01 : f32
    %12 = vector.broadcast %cst_10 : f32 to vector<64x64xf32>
    %13 = arith.mulf %12, %9 : vector<64x64xf32>
    %14 = arith.select %11, %9, %13 : vector<64x64xi1>, vector<64x64xf32>
    %cst_11 = arith.constant dense<0.000000e+00> : vector<64xf32>
    %15 = vector.multi_reduction <add>, %14, %cst_11 [0] : vector<64x64xf32> to vector<64xf32>
    %16 = vector.shape_cast %15 : vector<64xf32> to vector<1x64xf32>
    %cst_12 = arith.constant 1.562500e-02 : f32
    %17 = vector.broadcast %cst_12 : f32 to vector<1x64xf32>
    %18 = arith.mulf %16, %17 : vector<1x64xf32>
    %19 = arith.mulf %14, %14 : vector<64x64xf32>
    %cst_13 = arith.constant dense<0.000000e+00> : vector<64xf32>
    %20 = vector.multi_reduction <add>, %19, %cst_13 [0] : vector<64x64xf32> to vector<64xf32>
    %21 = vector.shape_cast %20 : vector<64xf32> to vector<1x64xf32>
    %cst_14 = arith.constant 1.562500e-02 : f32
    %22 = vector.broadcast %cst_14 : f32 to vector<1x64xf32>
    %23 = arith.mulf %21, %22 : vector<1x64xf32>
    %24 = arith.mulf %18, %18 : vector<1x64xf32>
    %25 = arith.subf %23, %24 : vector<1x64xf32>
    %cst_15 = arith.constant 9.99999974E-6 : f32
    %26 = vector.broadcast %cst_15 : f32 to vector<1x64xf32>
    %27 = arith.addf %25, %26 : vector<1x64xf32>
    %28 = math.rsqrt %27 : vector<1x64xf32>
    %c1 = arith.constant 1 : index
    %c0_16 = arith.constant 0 : index
    %29 = vector.load %arg3[%c1, %c0_16] : memref<8x64xf32, #tpu.memory_space<vmem>>, vector<1x64xf32>
    %30 = arith.mulf %28, %29 : vector<1x64xf32>
    %c2 = arith.constant 2 : index
    %c0_17 = arith.constant 0 : index
    %31 = vector.load %arg3[%c2, %c0_17] : memref<8x64xf32, #tpu.memory_space<vmem>>, vector<1x64xf32>
    %32 = arith.mulf %18, %30 : vector<1x64xf32>
    %33 = arith.subf %31, %32 : vector<1x64xf32>
    %34 = vector.broadcast %30 : vector<1x64xf32> to vector<64x64xf32>
    %35 = arith.mulf %14, %34 : vector<64x64xf32>
    %36 = vector.broadcast %33 : vector<1x64xf32> to vector<64x64xf32>
    %37 = arith.addf %35, %36 : vector<64x64xf32>
    %38 = arith.truncf %37 : vector<64x64xf32> to vector<64x64xbf16>
    %c0_18 = arith.constant 0 : index
    %c0_19 = arith.constant 0 : index
    %c0_20 = arith.constant 0 : index
    %39 = vector.load %arg4[%c0_18, %c0_19, %c0_20] : memref<1x64x64xbf16, #tpu.memory_space<vmem>>, vector<1x64x64xbf16>
    %40 = vector.shape_cast %39 : vector<1x64x64xbf16> to vector<64x64xbf16>
    %41 = vector.shape_cast %38 : vector<64x64xbf16> to vector<1x64x64xbf16>
    tpu.vector_store %arg4[%c0_18, %c0_19, %c0_20], %41 {strides = array<i32>} : memref<1x64x64xbf16, #tpu.memory_space<vmem>>, vector<1x64x64xbf16>,
    return
  }
  func.func @transform_0(%arg0: i32) -> (i32, i32, i32, i32) {
    %c0_i32 = arith.constant 0 : i32
    %c0_i32_0 = arith.constant 0 : i32
    %c0_i32_1 = arith.constant 0 : i32
    %c0_i32_2 = arith.constant 0 : i32
    return %arg0, %c0_i32, %c0_i32_0, %c0_i32_1 : i32, i32, i32, i32
  }
  func.func @transform_1(%arg0: i32) -> (i32, i32, i32) {
    %c0_i32 = arith.constant 0 : i32
    %c0_i32_0 = arith.constant 0 : i32
    %c0_i32_1 = arith.constant 0 : i32
    %c0_i32_2 = arith.constant 0 : i32
    return %c0_i32, %c0_i32_0, %c0_i32_1 : i32, i32, i32
  }
  func.func @transform_2(%arg0: i32) -> (i32, i32) {
    %c0_i32 = arith.constant 0 : i32
    %c0_i32_0 = arith.constant 0 : i32
    %c0_i32_1 = arith.constant 0 : i32
    return %c0_i32, %c0_i32_0 : i32, i32
  }
  func.func @transform_3(%arg0: i32) -> (i32, i32, i32) {
    %c0_i32 = arith.constant 0 : i32
    %c0_i32_0 = arith.constant 0 : i32
    %c0_i32_1 = arith.constant 0 : i32
    return %arg0, %c0_i32, %c0_i32_0 : i32, i32, i32
  }
}

module attributes {stable_mosaic.version = 11 : i64} {
  func.func @_disc_conv_kernel(%arg0: i32, %arg1: memref<1x2x20x192xbf16, #tpu.memory_space<vmem>>, %arg2: memref<3x192x128xbf16, #tpu.memory_space<vmem>>, %arg3: memref<8x128xf32, #tpu.memory_space<vmem>>, %arg4: memref<1x16x128xbf16, #tpu.memory_space<vmem>>) attributes {dimension_semantics = [#tpu.dimension_semantics<parallel>], iteration_bounds = array<i64: 4>, scalar_prefetch = 0 : i64, scratch_operands = 0 : i64, tpu.core_type = #tpu.core_type<tc>, window_params = [{transform_indices = @transform_0, window_bounds = array<i64: 1, 2, 20, 192>}, {pipeline_mode = #tpu.pipeline_mode<synchronous>, transform_indices = @transform_1, window_bounds = array<i64: 3, 192, 128>}, {pipeline_mode = #tpu.pipeline_mode<synchronous>, transform_indices = @transform_2, window_bounds = array<i64: 8, 128>}, {transform_indices = @transform_3, window_bounds = array<i64: 1, 16, 128>}]} {
    %cst = arith.constant 0.000000e+00 : f32
    %0 = vector.broadcast %cst : f32 to vector<16x128xf32>
    %c0 = arith.constant 0 : index
    %c0_0 = arith.constant 0 : index
    %c0_1 = arith.constant 0 : index
    %c0_2 = arith.constant 0 : index
    %1 = vector.load %arg1[%c0, %c0_0, %c0_1, %c0_2] : memref<1x2x20x192xbf16, #tpu.memory_space<vmem>>, vector<1x1x16x192xbf16>
    %2 = vector.shape_cast %1 : vector<1x1x16x192xbf16> to vector<16x192xbf16>
    %c0_3 = arith.constant 0 : index
    %c0_4 = arith.constant 0 : index
    %c0_5 = arith.constant 0 : index
    %3 = vector.load %arg2[%c0_3, %c0_4, %c0_5] : memref<3x192x128xbf16, #tpu.memory_space<vmem>>, vector<1x192x128xbf16>
    %4 = vector.shape_cast %3 : vector<1x192x128xbf16> to vector<192x128xbf16>
    %cst_6 = arith.constant dense<0.000000e+00> : vector<16x128xf32>
    %5 = tpu.matmul %2, %4, %cst_6 {dimension_numbers = #tpu.dot_dimension_numbers<[1], [0], [0], [1], [0, 0, 1, 1], [], []>} : vector<16x192xbf16>, vector<192x128xbf16>, vector<16x128xf32> -> vector<16x128xf32>
    %6 = arith.addf %0, %5 : vector<16x128xf32>
    %c0_7 = arith.constant 0 : index
    %c1 = arith.constant 1 : index
    %c0_8 = arith.constant 0 : index
    %c0_9 = arith.constant 0 : index
    %7 = vector.load %arg1[%c0_7, %c1, %c0_8, %c0_9] : memref<1x2x20x192xbf16, #tpu.memory_space<vmem>>, vector<1x1x16x192xbf16>
    %8 = vector.shape_cast %7 : vector<1x1x16x192xbf16> to vector<16x192xbf16>
    %c1_10 = arith.constant 1 : index
    %c0_11 = arith.constant 0 : index
    %c0_12 = arith.constant 0 : index
    %9 = vector.load %arg2[%c1_10, %c0_11, %c0_12] : memref<3x192x128xbf16, #tpu.memory_space<vmem>>, vector<1x192x128xbf16>
    %10 = vector.shape_cast %9 : vector<1x192x128xbf16> to vector<192x128xbf16>
    %cst_13 = arith.constant dense<0.000000e+00> : vector<16x128xf32>
    %11 = tpu.matmul %8, %10, %cst_13 {dimension_numbers = #tpu.dot_dimension_numbers<[1], [0], [0], [1], [0, 0, 1, 1], [], []>} : vector<16x192xbf16>, vector<192x128xbf16>, vector<16x128xf32> -> vector<16x128xf32>
    %12 = arith.addf %6, %11 : vector<16x128xf32>
    %c0_14 = arith.constant 0 : index
    %c0_15 = arith.constant 0 : index
    %c4 = arith.constant 4 : index
    %c0_16 = arith.constant 0 : index
    %13 = vector.load %arg1[%c0_14, %c0_15, %c4, %c0_16] : memref<1x2x20x192xbf16, #tpu.memory_space<vmem>>, vector<1x1x16x192xbf16>
    %14 = vector.shape_cast %13 : vector<1x1x16x192xbf16> to vector<16x192xbf16>
    %c2 = arith.constant 2 : index
    %c0_17 = arith.constant 0 : index
    %c0_18 = arith.constant 0 : index
    %15 = vector.load %arg2[%c2, %c0_17, %c0_18] : memref<3x192x128xbf16, #tpu.memory_space<vmem>>, vector<1x192x128xbf16>
    %16 = vector.shape_cast %15 : vector<1x192x128xbf16> to vector<192x128xbf16>
    %cst_19 = arith.constant dense<0.000000e+00> : vector<16x128xf32>
    %17 = tpu.matmul %14, %16, %cst_19 {dimension_numbers = #tpu.dot_dimension_numbers<[1], [0], [0], [1], [0, 0, 1, 1], [], []>} : vector<16x192xbf16>, vector<192x128xbf16>, vector<16x128xf32> -> vector<16x128xf32>
    %18 = arith.addf %12, %17 : vector<16x128xf32>
    %c0_20 = arith.constant 0 : index
    %c0_21 = arith.constant 0 : index
    %19 = vector.load %arg3[%c0_20, %c0_21] : memref<8x128xf32, #tpu.memory_space<vmem>>, vector<1x128xf32>
    %20 = vector.broadcast %19 : vector<1x128xf32> to vector<16x128xf32>
    %21 = arith.addf %18, %20 : vector<16x128xf32>
    %cst_22 = arith.constant 0.000000e+00 : f32
    %22 = vector.broadcast %cst_22 : f32 to vector<16x128xf32>
    %23 = arith.cmpf oge, %21, %22 : vector<16x128xf32>
    %cst_23 = arith.constant 2.000000e-01 : f32
    %24 = vector.broadcast %cst_23 : f32 to vector<16x128xf32>
    %25 = arith.mulf %24, %21 : vector<16x128xf32>
    %26 = arith.select %23, %21, %25 : vector<16x128xi1>, vector<16x128xf32>
    %cst_24 = arith.constant dense<0.000000e+00> : vector<128xf32>
    %27 = vector.multi_reduction <add>, %26, %cst_24 [0] : vector<16x128xf32> to vector<128xf32>
    %28 = vector.shape_cast %27 : vector<128xf32> to vector<1x128xf32>
    %cst_25 = arith.constant 6.250000e-02 : f32
    %29 = vector.broadcast %cst_25 : f32 to vector<1x128xf32>
    %30 = arith.mulf %28, %29 : vector<1x128xf32>
    %31 = arith.mulf %26, %26 : vector<16x128xf32>
    %cst_26 = arith.constant dense<0.000000e+00> : vector<128xf32>
    %32 = vector.multi_reduction <add>, %31, %cst_26 [0] : vector<16x128xf32> to vector<128xf32>
    %33 = vector.shape_cast %32 : vector<128xf32> to vector<1x128xf32>
    %cst_27 = arith.constant 6.250000e-02 : f32
    %34 = vector.broadcast %cst_27 : f32 to vector<1x128xf32>
    %35 = arith.mulf %33, %34 : vector<1x128xf32>
    %36 = arith.mulf %30, %30 : vector<1x128xf32>
    %37 = arith.subf %35, %36 : vector<1x128xf32>
    %cst_28 = arith.constant 9.99999974E-6 : f32
    %38 = vector.broadcast %cst_28 : f32 to vector<1x128xf32>
    %39 = arith.addf %37, %38 : vector<1x128xf32>
    %40 = math.rsqrt %39 : vector<1x128xf32>
    %c1_29 = arith.constant 1 : index
    %c0_30 = arith.constant 0 : index
    %41 = vector.load %arg3[%c1_29, %c0_30] : memref<8x128xf32, #tpu.memory_space<vmem>>, vector<1x128xf32>
    %42 = arith.mulf %40, %41 : vector<1x128xf32>
    %c2_31 = arith.constant 2 : index
    %c0_32 = arith.constant 0 : index
    %43 = vector.load %arg3[%c2_31, %c0_32] : memref<8x128xf32, #tpu.memory_space<vmem>>, vector<1x128xf32>
    %44 = arith.mulf %30, %42 : vector<1x128xf32>
    %45 = arith.subf %43, %44 : vector<1x128xf32>
    %46 = vector.broadcast %42 : vector<1x128xf32> to vector<16x128xf32>
    %47 = arith.mulf %26, %46 : vector<16x128xf32>
    %48 = vector.broadcast %45 : vector<1x128xf32> to vector<16x128xf32>
    %49 = arith.addf %47, %48 : vector<16x128xf32>
    %50 = arith.truncf %49 : vector<16x128xf32> to vector<16x128xbf16>
    %c0_33 = arith.constant 0 : index
    %c0_34 = arith.constant 0 : index
    %c0_35 = arith.constant 0 : index
    %51 = vector.load %arg4[%c0_33, %c0_34, %c0_35] : memref<1x16x128xbf16, #tpu.memory_space<vmem>>, vector<1x16x128xbf16>
    %52 = vector.shape_cast %51 : vector<1x16x128xbf16> to vector<16x128xbf16>
    %53 = vector.shape_cast %50 : vector<16x128xbf16> to vector<1x16x128xbf16>
    tpu.vector_store %arg4[%c0_33, %c0_34, %c0_35], %53 {strides = array<i32>} : memref<1x16x128xbf16, #tpu.memory_space<vmem>>, vector<1x16x128xbf16>,
    return
  }
  func.func @transform_0(%arg0: i32) -> (i32, i32, i32, i32) {
    %c0_i32 = arith.constant 0 : i32
    %c0_i32_0 = arith.constant 0 : i32
    %c0_i32_1 = arith.constant 0 : i32
    %c0_i32_2 = arith.constant 0 : i32
    return %arg0, %c0_i32, %c0_i32_0, %c0_i32_1 : i32, i32, i32, i32
  }
  func.func @transform_1(%arg0: i32) -> (i32, i32, i32) {
    %c0_i32 = arith.constant 0 : i32
    %c0_i32_0 = arith.constant 0 : i32
    %c0_i32_1 = arith.constant 0 : i32
    %c0_i32_2 = arith.constant 0 : i32
    return %c0_i32, %c0_i32_0, %c0_i32_1 : i32, i32, i32
  }
  func.func @transform_2(%arg0: i32) -> (i32, i32) {
    %c0_i32 = arith.constant 0 : i32
    %c0_i32_0 = arith.constant 0 : i32
    %c0_i32_1 = arith.constant 0 : i32
    return %c0_i32, %c0_i32_0 : i32, i32
  }
  func.func @transform_3(%arg0: i32) -> (i32, i32, i32) {
    %c0_i32 = arith.constant 0 : i32
    %c0_i32_0 = arith.constant 0 : i32
    %c0_i32_1 = arith.constant 0 : i32
    return %arg0, %c0_i32, %c0_i32_0 : i32, i32, i32
  }
}

module attributes {stable_mosaic.version = 11 : i64} {
  func.func @_disc_conv_kernel(%arg0: i32, %arg1: memref<1x2x6x384xbf16, #tpu.memory_space<vmem>>, %arg2: memref<3x384x128xbf16, #tpu.memory_space<vmem>>, %arg3: memref<8x128xf32, #tpu.memory_space<vmem>>, %arg4: memref<1x4x128xbf16, #tpu.memory_space<vmem>>) attributes {dimension_semantics = [#tpu.dimension_semantics<parallel>], iteration_bounds = array<i64: 4>, scalar_prefetch = 0 : i64, scratch_operands = 0 : i64, tpu.core_type = #tpu.core_type<tc>, window_params = [{transform_indices = @transform_0, window_bounds = array<i64: 1, 2, 6, 384>}, {pipeline_mode = #tpu.pipeline_mode<synchronous>, transform_indices = @transform_1, window_bounds = array<i64: 3, 384, 128>}, {pipeline_mode = #tpu.pipeline_mode<synchronous>, transform_indices = @transform_2, window_bounds = array<i64: 8, 128>}, {transform_indices = @transform_3, window_bounds = array<i64: 1, 4, 128>}]} {
    %cst = arith.constant 0.000000e+00 : f32
    %0 = vector.broadcast %cst : f32 to vector<4x128xf32>
    %c0 = arith.constant 0 : index
    %c0_0 = arith.constant 0 : index
    %c0_1 = arith.constant 0 : index
    %c0_2 = arith.constant 0 : index
    %1 = vector.load %arg1[%c0, %c0_0, %c0_1, %c0_2] : memref<1x2x6x384xbf16, #tpu.memory_space<vmem>>, vector<1x1x4x384xbf16>
    %2 = vector.shape_cast %1 : vector<1x1x4x384xbf16> to vector<4x384xbf16>
    %c0_3 = arith.constant 0 : index
    %c0_4 = arith.constant 0 : index
    %c0_5 = arith.constant 0 : index
    %3 = vector.load %arg2[%c0_3, %c0_4, %c0_5] : memref<3x384x128xbf16, #tpu.memory_space<vmem>>, vector<1x384x128xbf16>
    %4 = vector.shape_cast %3 : vector<1x384x128xbf16> to vector<384x128xbf16>
    %cst_6 = arith.constant dense<0.000000e+00> : vector<4x128xf32>
    %5 = tpu.matmul %2, %4, %cst_6 {dimension_numbers = #tpu.dot_dimension_numbers<[1], [0], [0], [1], [0, 0, 1, 1], [], []>} : vector<4x384xbf16>, vector<384x128xbf16>, vector<4x128xf32> -> vector<4x128xf32>
    %6 = arith.addf %0, %5 : vector<4x128xf32>
    %c0_7 = arith.constant 0 : index
    %c1 = arith.constant 1 : index
    %c0_8 = arith.constant 0 : index
    %c0_9 = arith.constant 0 : index
    %7 = vector.load %arg1[%c0_7, %c1, %c0_8, %c0_9] : memref<1x2x6x384xbf16, #tpu.memory_space<vmem>>, vector<1x1x4x384xbf16>
    %8 = vector.shape_cast %7 : vector<1x1x4x384xbf16> to vector<4x384xbf16>
    %c1_10 = arith.constant 1 : index
    %c0_11 = arith.constant 0 : index
    %c0_12 = arith.constant 0 : index
    %9 = vector.load %arg2[%c1_10, %c0_11, %c0_12] : memref<3x384x128xbf16, #tpu.memory_space<vmem>>, vector<1x384x128xbf16>
    %10 = vector.shape_cast %9 : vector<1x384x128xbf16> to vector<384x128xbf16>
    %cst_13 = arith.constant dense<0.000000e+00> : vector<4x128xf32>
    %11 = tpu.matmul %8, %10, %cst_13 {dimension_numbers = #tpu.dot_dimension_numbers<[1], [0], [0], [1], [0, 0, 1, 1], [], []>} : vector<4x384xbf16>, vector<384x128xbf16>, vector<4x128xf32> -> vector<4x128xf32>
    %12 = arith.addf %6, %11 : vector<4x128xf32>
    %c0_14 = arith.constant 0 : index
    %c0_15 = arith.constant 0 : index
    %c2 = arith.constant 2 : index
    %c0_16 = arith.constant 0 : index
    %13 = vector.load %arg1[%c0_14, %c0_15, %c2, %c0_16] : memref<1x2x6x384xbf16, #tpu.memory_space<vmem>>, vector<1x1x4x384xbf16>
    %14 = vector.shape_cast %13 : vector<1x1x4x384xbf16> to vector<4x384xbf16>
    %c2_17 = arith.constant 2 : index
    %c0_18 = arith.constant 0 : index
    %c0_19 = arith.constant 0 : index
    %15 = vector.load %arg2[%c2_17, %c0_18, %c0_19] : memref<3x384x128xbf16, #tpu.memory_space<vmem>>, vector<1x384x128xbf16>
    %16 = vector.shape_cast %15 : vector<1x384x128xbf16> to vector<384x128xbf16>
    %cst_20 = arith.constant dense<0.000000e+00> : vector<4x128xf32>
    %17 = tpu.matmul %14, %16, %cst_20 {dimension_numbers = #tpu.dot_dimension_numbers<[1], [0], [0], [1], [0, 0, 1, 1], [], []>} : vector<4x384xbf16>, vector<384x128xbf16>, vector<4x128xf32> -> vector<4x128xf32>
    %18 = arith.addf %12, %17 : vector<4x128xf32>
    %c0_21 = arith.constant 0 : index
    %c0_22 = arith.constant 0 : index
    %19 = vector.load %arg3[%c0_21, %c0_22] : memref<8x128xf32, #tpu.memory_space<vmem>>, vector<1x128xf32>
    %20 = vector.broadcast %19 : vector<1x128xf32> to vector<4x128xf32>
    %21 = arith.addf %18, %20 : vector<4x128xf32>
    %cst_23 = arith.constant 0.000000e+00 : f32
    %22 = vector.broadcast %cst_23 : f32 to vector<4x128xf32>
    %23 = arith.cmpf oge, %21, %22 : vector<4x128xf32>
    %cst_24 = arith.constant 2.000000e-01 : f32
    %24 = vector.broadcast %cst_24 : f32 to vector<4x128xf32>
    %25 = arith.mulf %24, %21 : vector<4x128xf32>
    %26 = arith.select %23, %21, %25 : vector<4x128xi1>, vector<4x128xf32>
    %cst_25 = arith.constant dense<0.000000e+00> : vector<128xf32>
    %27 = vector.multi_reduction <add>, %26, %cst_25 [0] : vector<4x128xf32> to vector<128xf32>
    %28 = vector.shape_cast %27 : vector<128xf32> to vector<1x128xf32>
    %cst_26 = arith.constant 2.500000e-01 : f32
    %29 = vector.broadcast %cst_26 : f32 to vector<1x128xf32>
    %30 = arith.mulf %28, %29 : vector<1x128xf32>
    %31 = arith.mulf %26, %26 : vector<4x128xf32>
    %cst_27 = arith.constant dense<0.000000e+00> : vector<128xf32>
    %32 = vector.multi_reduction <add>, %31, %cst_27 [0] : vector<4x128xf32> to vector<128xf32>
    %33 = vector.shape_cast %32 : vector<128xf32> to vector<1x128xf32>
    %cst_28 = arith.constant 2.500000e-01 : f32
    %34 = vector.broadcast %cst_28 : f32 to vector<1x128xf32>
    %35 = arith.mulf %33, %34 : vector<1x128xf32>
    %36 = arith.mulf %30, %30 : vector<1x128xf32>
    %37 = arith.subf %35, %36 : vector<1x128xf32>
    %cst_29 = arith.constant 9.99999974E-6 : f32
    %38 = vector.broadcast %cst_29 : f32 to vector<1x128xf32>
    %39 = arith.addf %37, %38 : vector<1x128xf32>
    %40 = math.rsqrt %39 : vector<1x128xf32>
    %c1_30 = arith.constant 1 : index
    %c0_31 = arith.constant 0 : index
    %41 = vector.load %arg3[%c1_30, %c0_31] : memref<8x128xf32, #tpu.memory_space<vmem>>, vector<1x128xf32>
    %42 = arith.mulf %40, %41 : vector<1x128xf32>
    %c2_32 = arith.constant 2 : index
    %c0_33 = arith.constant 0 : index
    %43 = vector.load %arg3[%c2_32, %c0_33] : memref<8x128xf32, #tpu.memory_space<vmem>>, vector<1x128xf32>
    %44 = arith.mulf %30, %42 : vector<1x128xf32>
    %45 = arith.subf %43, %44 : vector<1x128xf32>
    %46 = vector.broadcast %42 : vector<1x128xf32> to vector<4x128xf32>
    %47 = arith.mulf %26, %46 : vector<4x128xf32>
    %48 = vector.broadcast %45 : vector<1x128xf32> to vector<4x128xf32>
    %49 = arith.addf %47, %48 : vector<4x128xf32>
    %50 = arith.truncf %49 : vector<4x128xf32> to vector<4x128xbf16>
    %c0_34 = arith.constant 0 : index
    %c0_35 = arith.constant 0 : index
    %c0_36 = arith.constant 0 : index
    %51 = vector.load %arg4[%c0_34, %c0_35, %c0_36] : memref<1x4x128xbf16, #tpu.memory_space<vmem>>, vector<1x4x128xbf16>
    %52 = vector.shape_cast %51 : vector<1x4x128xbf16> to vector<4x128xbf16>
    %53 = vector.shape_cast %50 : vector<4x128xbf16> to vector<1x4x128xbf16>
    tpu.vector_store %arg4[%c0_34, %c0_35, %c0_36], %53 {strides = array<i32>} : memref<1x4x128xbf16, #tpu.memory_space<vmem>>, vector<1x4x128xbf16>,
    return
  }
  func.func @transform_0(%arg0: i32) -> (i32, i32, i32, i32) {
    %c0_i32 = arith.constant 0 : i32
    %c0_i32_0 = arith.constant 0 : i32
    %c0_i32_1 = arith.constant 0 : i32
    %c0_i32_2 = arith.constant 0 : i32
    return %arg0, %c0_i32, %c0_i32_0, %c0_i32_1 : i32, i32, i32, i32
  }
  func.func @transform_1(%arg0: i32) -> (i32, i32, i32) {
    %c0_i32 = arith.constant 0 : i32
    %c0_i32_0 = arith.constant 0 : i32
    %c0_i32_1 = arith.constant 0 : i32
    %c0_i32_2 = arith.constant 0 : i32
    return %c0_i32, %c0_i32_0, %c0_i32_1 : i32, i32, i32
  }
  func.func @transform_2(%arg0: i32) -> (i32, i32) {
    %c0_i32 = arith.constant 0 : i32
    %c0_i32_0 = arith.constant 0 : i32
    %c0_i32_1 = arith.constant 0 : i32
    return %c0_i32, %c0_i32_0 : i32, i32
  }
  func.func @transform_3(%arg0: i32) -> (i32, i32, i32) {
    %c0_i32 = arith.constant 0 : i32
    %c0_i32_0 = arith.constant 0 : i32
    %c0_i32_1 = arith.constant 0 : i32
    return %arg0, %c0_i32, %c0_i32_0 : i32, i32, i32
  }
}

module attributes {stable_mosaic.version = 11 : i64} {
  func.func @_disc_conv_kernel(%arg0: i32, %arg1: memref<1x2x2x384xbf16, #tpu.memory_space<vmem>>, %arg2: memref<3x384x128xbf16, #tpu.memory_space<vmem>>, %arg3: memref<8x128xf32, #tpu.memory_space<vmem>>, %arg4: memref<1x1x1xf32, #tpu.memory_space<vmem>>, %arg5: memref<1x1x1xf32, #tpu.memory_space<vmem>>) attributes {dimension_semantics = [#tpu.dimension_semantics<parallel>], iteration_bounds = array<i64: 4>, scalar_prefetch = 0 : i64, scratch_operands = 0 : i64, tpu.core_type = #tpu.core_type<tc>, window_params = [{transform_indices = @transform_0, window_bounds = array<i64: 1, 2, 2, 384>}, {pipeline_mode = #tpu.pipeline_mode<synchronous>, transform_indices = @transform_1, window_bounds = array<i64: 3, 384, 128>}, {pipeline_mode = #tpu.pipeline_mode<synchronous>, transform_indices = @transform_2, window_bounds = array<i64: 8, 128>}, {transform_indices = @transform_3, window_bounds = array<i64: 1, 1, 1>}, {transform_indices = @transform_4, window_bounds = array<i64: 1, 1, 1>}]} {
    %cst = arith.constant 0.000000e+00 : f32
    %0 = vector.broadcast %cst : f32 to vector<1x128xf32>
    %c0 = arith.constant 0 : index
    %c0_0 = arith.constant 0 : index
    %c0_1 = arith.constant 0 : index
    %c0_2 = arith.constant 0 : index
    %1 = vector.load %arg1[%c0, %c0_0, %c0_1, %c0_2] : memref<1x2x2x384xbf16, #tpu.memory_space<vmem>>, vector<1x1x1x384xbf16>
    %2 = vector.shape_cast %1 : vector<1x1x1x384xbf16> to vector<1x384xbf16>
    %c0_3 = arith.constant 0 : index
    %c0_4 = arith.constant 0 : index
    %c0_5 = arith.constant 0 : index
    %3 = vector.load %arg2[%c0_3, %c0_4, %c0_5] : memref<3x384x128xbf16, #tpu.memory_space<vmem>>, vector<1x384x128xbf16>
    %4 = vector.shape_cast %3 : vector<1x384x128xbf16> to vector<384x128xbf16>
    %cst_6 = arith.constant dense<0.000000e+00> : vector<1x128xf32>
    %5 = tpu.matmul %2, %4, %cst_6 {dimension_numbers = #tpu.dot_dimension_numbers<[1], [0], [0], [1], [0, 0, 1, 1], [], []>} : vector<1x384xbf16>, vector<384x128xbf16>, vector<1x128xf32> -> vector<1x128xf32>
    %6 = arith.addf %0, %5 : vector<1x128xf32>
    %c0_7 = arith.constant 0 : index
    %c1 = arith.constant 1 : index
    %c0_8 = arith.constant 0 : index
    %c0_9 = arith.constant 0 : index
    %7 = vector.load %arg1[%c0_7, %c1, %c0_8, %c0_9] : memref<1x2x2x384xbf16, #tpu.memory_space<vmem>>, vector<1x1x1x384xbf16>
    %8 = vector.shape_cast %7 : vector<1x1x1x384xbf16> to vector<1x384xbf16>
    %c1_10 = arith.constant 1 : index
    %c0_11 = arith.constant 0 : index
    %c0_12 = arith.constant 0 : index
    %9 = vector.load %arg2[%c1_10, %c0_11, %c0_12] : memref<3x384x128xbf16, #tpu.memory_space<vmem>>, vector<1x384x128xbf16>
    %10 = vector.shape_cast %9 : vector<1x384x128xbf16> to vector<384x128xbf16>
    %cst_13 = arith.constant dense<0.000000e+00> : vector<1x128xf32>
    %11 = tpu.matmul %8, %10, %cst_13 {dimension_numbers = #tpu.dot_dimension_numbers<[1], [0], [0], [1], [0, 0, 1, 1], [], []>} : vector<1x384xbf16>, vector<384x128xbf16>, vector<1x128xf32> -> vector<1x128xf32>
    %12 = arith.addf %6, %11 : vector<1x128xf32>
    %c0_14 = arith.constant 0 : index
    %c0_15 = arith.constant 0 : index
    %c1_16 = arith.constant 1 : index
    %c0_17 = arith.constant 0 : index
    %13 = vector.load %arg1[%c0_14, %c0_15, %c1_16, %c0_17] : memref<1x2x2x384xbf16, #tpu.memory_space<vmem>>, vector<1x1x1x384xbf16>
    %14 = vector.shape_cast %13 : vector<1x1x1x384xbf16> to vector<1x384xbf16>
    %c2 = arith.constant 2 : index
    %c0_18 = arith.constant 0 : index
    %c0_19 = arith.constant 0 : index
    %15 = vector.load %arg2[%c2, %c0_18, %c0_19] : memref<3x384x128xbf16, #tpu.memory_space<vmem>>, vector<1x384x128xbf16>
    %16 = vector.shape_cast %15 : vector<1x384x128xbf16> to vector<384x128xbf16>
    %cst_20 = arith.constant dense<0.000000e+00> : vector<1x128xf32>
    %17 = tpu.matmul %14, %16, %cst_20 {dimension_numbers = #tpu.dot_dimension_numbers<[1], [0], [0], [1], [0, 0, 1, 1], [], []>} : vector<1x384xbf16>, vector<384x128xbf16>, vector<1x128xf32> -> vector<1x128xf32>
    %18 = arith.addf %12, %17 : vector<1x128xf32>
    %c0_21 = arith.constant 0 : index
    %c0_22 = arith.constant 0 : index
    %19 = vector.load %arg3[%c0_21, %c0_22] : memref<8x128xf32, #tpu.memory_space<vmem>>, vector<1x128xf32>
    %20 = arith.addf %18, %19 : vector<1x128xf32>
    %cst_23 = arith.constant 0.000000e+00 : f32
    %21 = vector.broadcast %cst_23 : f32 to vector<1x128xf32>
    %22 = arith.cmpf oge, %20, %21 : vector<1x128xf32>
    %cst_24 = arith.constant 2.000000e-01 : f32
    %23 = vector.broadcast %cst_24 : f32 to vector<1x128xf32>
    %24 = arith.mulf %23, %20 : vector<1x128xf32>
    %25 = arith.select %22, %20, %24 : vector<1x128xi1>, vector<1x128xf32>
    %c3 = arith.constant 3 : index
    %c0_25 = arith.constant 0 : index
    %26 = vector.load %arg3[%c3, %c0_25] : memref<8x128xf32, #tpu.memory_space<vmem>>, vector<1x128xf32>
    %27 = arith.mulf %25, %26 : vector<1x128xf32>
    %cst_26 = arith.constant dense<0.000000e+00> : vector<1xf32>
    %28 = vector.multi_reduction <add>, %27, %cst_26 [1] : vector<1x128xf32> to vector<1xf32>
    %29 = vector.shape_cast %28 : vector<1xf32> to vector<1x1xf32>
    %c4 = arith.constant 4 : index
    %c0_27 = arith.constant 0 : index
    %30 = vector.load %arg3[%c4, %c0_27] : memref<8x128xf32, #tpu.memory_space<vmem>>, vector<1x1xf32>
    %31 = arith.addf %29, %30 : vector<1x1xf32>
    %cst_28 = arith.constant 1.000000e+00 : f32
    %32 = vector.broadcast %cst_28 : f32 to vector<1x1xf32>
    %33 = arith.subf %31, %32 : vector<1x1xf32>
    %34 = arith.mulf %33, %33 : vector<1x1xf32>
    %35 = vector.shape_cast %34 : vector<1x1xf32> to vector<1x1x1xf32>
    %cst_29 = arith.constant dense<0.000000e+00> : vector<1xf32>
    %36 = vector.multi_reduction <add>, %35, %cst_29 [1, 2] : vector<1x1x1xf32> to vector<1xf32>
    %37 = vector.shape_cast %36 : vector<1xf32> to vector<1x1x1xf32>
    %38 = vector.extract %37[0, 0, 0] : f32 from vector<1x1x1xf32>
    %39 = vector.broadcast %38 : f32 to vector<1x1xf32>
    %c0_30 = arith.constant 0 : index
    %c0_31 = arith.constant 0 : index
    %c0_32 = arith.constant 0 : index
    %40 = vector.load %arg4[%c0_30, %c0_31, %c0_32] : memref<1x1x1xf32, #tpu.memory_space<vmem>>, vector<1x1x1xf32>
    %41 = vector.shape_cast %40 : vector<1x1x1xf32> to vector<1x1xf32>
    %42 = vector.shape_cast %39 : vector<1x1xf32> to vector<1x1x1xf32>
    tpu.vector_store %arg4[%c0_30, %c0_31, %c0_32], %42 {strides = array<i32>} : memref<1x1x1xf32, #tpu.memory_space<vmem>>, vector<1x1x1xf32>,
    %43 = arith.mulf %31, %31 : vector<1x1xf32>
    %44 = vector.shape_cast %43 : vector<1x1xf32> to vector<1x1x1xf32>
    %cst_33 = arith.constant dense<0.000000e+00> : vector<1xf32>
    %45 = vector.multi_reduction <add>, %44, %cst_33 [1, 2] : vector<1x1x1xf32> to vector<1xf32>
    %46 = vector.shape_cast %45 : vector<1xf32> to vector<1x1x1xf32>
    %47 = vector.extract %46[0, 0, 0] : f32 from vector<1x1x1xf32>
    %48 = vector.broadcast %47 : f32 to vector<1x1xf32>
    %c0_34 = arith.constant 0 : index
    %c0_35 = arith.constant 0 : index
    %c0_36 = arith.constant 0 : index
    %49 = vector.load %arg5[%c0_34, %c0_35, %c0_36] : memref<1x1x1xf32, #tpu.memory_space<vmem>>, vector<1x1x1xf32>
    %50 = vector.shape_cast %49 : vector<1x1x1xf32> to vector<1x1xf32>
    %51 = vector.shape_cast %48 : vector<1x1xf32> to vector<1x1x1xf32>
    tpu.vector_store %arg5[%c0_34, %c0_35, %c0_36], %51 {strides = array<i32>} : memref<1x1x1xf32, #tpu.memory_space<vmem>>, vector<1x1x1xf32>,
    return
  }
  func.func @transform_0(%arg0: i32) -> (i32, i32, i32, i32) {
    %c0_i32 = arith.constant 0 : i32
    %c0_i32_0 = arith.constant 0 : i32
    %c0_i32_1 = arith.constant 0 : i32
    %c0_i32_2 = arith.constant 0 : i32
    return %arg0, %c0_i32, %c0_i32_0, %c0_i32_1 : i32, i32, i32, i32
  }
  func.func @transform_1(%arg0: i32) -> (i32, i32, i32) {
    %c0_i32 = arith.constant 0 : i32
    %c0_i32_0 = arith.constant 0 : i32
    %c0_i32_1 = arith.constant 0 : i32
    %c0_i32_2 = arith.constant 0 : i32
    return %c0_i32, %c0_i32_0, %c0_i32_1 : i32, i32, i32
  }
  func.func @transform_2(%arg0: i32) -> (i32, i32) {
    %c0_i32 = arith.constant 0 : i32
    %c0_i32_0 = arith.constant 0 : i32
    %c0_i32_1 = arith.constant 0 : i32
    return %c0_i32, %c0_i32_0 : i32, i32
  }
  func.func @transform_3(%arg0: i32) -> (i32, i32, i32) {
    %c0_i32 = arith.constant 0 : i32
    %c0_i32_0 = arith.constant 0 : i32
    %c0_i32_1 = arith.constant 0 : i32
    return %arg0, %c0_i32, %c0_i32_0 : i32, i32, i32
  }
  func.func @transform_4(%arg0: i32) -> (i32, i32, i32) {
    %c0_i32 = arith.constant 0 : i32
    %c0_i32_0 = arith.constant 0 : i32
    %c0_i32_1 = arith.constant 0 : i32
    return %arg0, %c0_i32, %c0_i32_0 : i32, i32, i32
  }
}

module attributes {stable_mosaic.version = 11 : i64} {
  func.func @_l1_sum_kernel(%arg0: i32, %arg1: memref<48x128xf32, #tpu.memory_space<vmem>>, %arg2: memref<48x128xf32, #tpu.memory_space<vmem>>, %arg3: memref<1x1xf32, #tpu.memory_space<vmem>>) attributes {dimension_semantics = [#tpu.dimension_semantics<arbitrary>], iteration_bounds = array<i64: 1>, scalar_prefetch = 0 : i64, scratch_operands = 0 : i64, tpu.core_type = #tpu.core_type<tc>, window_params = [{transform_indices = @transform_0, window_bounds = array<i64: 48, 128>}, {transform_indices = @transform_1, window_bounds = array<i64: 48, 128>}, {pipeline_mode = #tpu.pipeline_mode<synchronous>, transform_indices = @transform_2, window_bounds = array<i64: 1, 1>}]} {
    %c0_i32 = arith.constant 0 : i32
    %0 = arith.cmpi eq, %arg0, %c0_i32 : i32
    %1 = arith.extui %0 : i1 to i32
    %c0_i32_0 = arith.constant 0 : i32
    %2 = arith.cmpi ne, %1, %c0_i32_0 : i32
    scf.if %2 {
      %cst_8 = arith.constant 0.000000e+00 : f32
      %15 = vector.broadcast %cst_8 : f32 to vector<1x1xf32>
      %c0_9 = arith.constant 0 : index
      %c0_10 = arith.constant 0 : index
      %16 = vector.load %arg3[%c0_9, %c0_10] : memref<1x1xf32, #tpu.memory_space<vmem>>, vector<1x1xf32>
      tpu.vector_store %arg3[%c0_9, %c0_10], %15 {strides = array<i32>} : memref<1x1xf32, #tpu.memory_space<vmem>>, vector<1x1xf32>,
    } else {
    }
    %c0 = arith.constant 0 : index
    %c0_1 = arith.constant 0 : index
    %3 = vector.load %arg1[%c0, %c0_1] : memref<48x128xf32, #tpu.memory_space<vmem>>, vector<48x128xf32>
    %c0_2 = arith.constant 0 : index
    %c0_3 = arith.constant 0 : index
    %4 = vector.load %arg2[%c0_2, %c0_3] : memref<48x128xf32, #tpu.memory_space<vmem>>, vector<48x128xf32>
    %5 = arith.subf %3, %4 : vector<48x128xf32>
    %6 = math.absf %5 : vector<48x128xf32>
    %c0_4 = arith.constant 0 : index
    %c0_5 = arith.constant 0 : index
    %7 = vector.load %arg3[%c0_4, %c0_5] : memref<1x1xf32, #tpu.memory_space<vmem>>, vector<1x1xf32>
    %8 = vector.shape_cast %6 : vector<48x128xf32> to vector<1x48x128xf32>
    %cst = arith.constant dense<0.000000e+00> : vector<1xf32>
    %9 = vector.multi_reduction <add>, %8, %cst [1, 2] : vector<1x48x128xf32> to vector<1xf32>
    %10 = vector.shape_cast %9 : vector<1xf32> to vector<1x1x1xf32>
    %11 = vector.extract %10[0, 0, 0] : f32 from vector<1x1x1xf32>
    %12 = vector.broadcast %11 : f32 to vector<1x1xf32>
    %13 = arith.addf %7, %12 : vector<1x1xf32>
    %c0_6 = arith.constant 0 : index
    %c0_7 = arith.constant 0 : index
    %14 = vector.load %arg3[%c0_6, %c0_7] : memref<1x1xf32, #tpu.memory_space<vmem>>, vector<1x1xf32>
    tpu.vector_store %arg3[%c0_6, %c0_7], %13 {strides = array<i32>} : memref<1x1xf32, #tpu.memory_space<vmem>>, vector<1x1xf32>,
    return
  }
  func.func @transform_0(%arg0: i32) -> (i32, i32) {
    %c0_i32 = arith.constant 0 : i32
    %c0_i32_0 = arith.constant 0 : i32
    return %arg0, %c0_i32 : i32, i32
  }
  func.func @transform_1(%arg0: i32) -> (i32, i32) {
    %c0_i32 = arith.constant 0 : i32
    %c0_i32_0 = arith.constant 0 : i32
    return %arg0, %c0_i32 : i32, i32
  }
  func.func @transform_2(%arg0: i32) -> (i32, i32) {
    %c0_i32 = arith.constant 0 : i32
    %c0_i32_0 = arith.constant 0 : i32
    %c0_i32_1 = arith.constant 0 : i32
    return %c0_i32, %c0_i32_0 : i32, i32
  }
}

</mosaic_0001>

<bundles_post_ra>
// kernel: gan_model_losses.31
= control target key start
LH: loop header
LB: loop body
LE: loop exit
PB: predicated region body
PF: predicated region fallthrough
CT: control target
= control target key end

     0   :  { %s405_s12 = smov 0   ;;  %s444_s0 = inlined_call_operand.vmem [shape: bf16[4,1,4,27], index: 0, kind: input, shape index: {}]   ;;  %s445_s1 = inlined_call_operand.vmem [shape: bf16[1,27,64], index: 1, kind: input, shape index: {}]   ;;  %s446_s2 = inlined_call_operand.vmem [shape: f32[8,64], index: 2, kind: input, shape index: {}]   ;;  %s447_s3 = inlined_call_operand.vmem [shape: bf16[4,4,64], index: 3, kind: output, shape index: {}]  }
   0x1 LB: > { %s335_s13 = sadd.s32 4294967295, %s380_s12   ;;  %p339_p0 = scmp.ge.s32.totalorder %s380_s12, 1  ;;  %s380_s12 = sphi %s405_s12, %s13_s12  }
   0x2   : > { %p136_p1 = scmp.lt.s32.totalorder %s380_s12, 5 }
   0x4   : > { %p137_p2 = pnand %p339_p0, %p136_p1 }
   0x5   : > { %v370_v0 = vld [vmem:[%s445_s1] sm:$0xff] (!%p137_p2)   ;;  %v382_v1 = vmov (!%p137_p2), 0.0   ;;  %v371_v2 = vld [vmem:[%s445_s1 + $0x8] sm:$0x3f] (!%p137_p2)   ;;  %vm192_vm0 = vcmask (!%p137_p2), 1044480   ;;  %vm193_vm1 = vcmask (!%p137_p2), 1045504   ;;  %v269_v36 = vlaneseq (!%p137_p2) }
   0x6   : > { %140 = sbr.rel (%p137_p2) target bundleno = 279 (0x117), region = 32  ;;  %351 = vmatprep.subr.bf16.mxu0 (!%p137_p2), %v382_v1  ;;  %p158_p3 = scmp.lt.s32.totalorder (!%p137_p2), %s335_s13, 3  ;;  %v383_v3 = vmov (!%p137_p2), 65535   ;;  %vm384_vm2 = vmmov (!%p137_p2), 0   ;;  %vm188_vm3 = vcmask (!%p137_p2), 220160   ;;  %vm242_vm5 = vcmask (!%p137_p2), 519168  }
   0x7   : > { %352 = vmatpush3.bf16.msra.mxu0 (!%p137_p2), %v370_v0  ;;  %v194_v4 = vsel (!%p137_p2), %vm192_vm0, 4294967295, %v383_v3  ;;  %355 = vmatprep.mubr.msk.bf16.mxu0 (!%p137_p2), %vm384_vm2, %v382_v1  ;;  %v342_v8 = vld [vmem:[%s446_s2] ss:$0 sm:$0xff] (!%p137_p2)  ;;  %v270_v37 = vshrl.u32 (!%p137_p2), %v269_v36, 7  ;;  %v264_v38 = vld [vmem:[%s446_s2 + $0x1] sm:$0x1] (!%p137_p2) }
   0x8   : > { %353 = vmatprep.subr.bf16.mxu0 (!%p137_p2), %v382_v1  ;;  %v195_v5 = vsel (!%p137_p2), %vm193_vm1, %v194_v4, 0  ;;  %v266_v42 = vld [vmem:[%s446_s2 + $0x2] sm:$0x1] (!%p137_p2)  ;;  %vm280_vm6 = vcmask (!%p137_p2), 517120  }
   0x9   : > { %v197_v6 = vand.u32 (!%p137_p2), %v371_v2, %v195_v5  ;;  %v271_v39 = vsub.s32 (!%p137_p2), 0, %v270_v37 }
   0xb   : > { %354 = vmatpush3.bf16.msra.mxu0 (!%p137_p2), %v197_v6 }
   0xd   : > { %s449_s13 = smov (!%p158_p3, %s335_s13), 3 }
   0xe   : > { %s340_s18 = sshll.u32 %s449_s13, 1 }
   0xf   : > { %s161_s21 = scalar_lea.vmem %s444_s0, %s340_s18  ;;  %s165_s30 = scalar_lea.vmem %s447_s3, %s340_s18 }
  0x10   : > { %v167_v7 = vld [vmem:[%s161_s21] sm:$0x3] }
  0x11   : > { %356 = vmatmul.mubr.msk.bf16.vlgmr.msra.gmra.mrb[0].mxu0 %vm188_vm3, %v167_v7 }
  0xe4   : > { %v233_v9 = vpop.f32.mrb[0].mxu0 }
  0xe5   : > { %v234_v10 = vadd.f32 %v342_v8, %v233_v9  ;;  %v357_v11 = vpop.f32.mrb[1].mxu0 }
  0xe6   : > { %v236_v12 = vpop.f32.mrb[2].mxu0 }
  0xe7   : > { %vm239_vm4 = vcmp.ge.f32.partialorder %v234_v10, 0.0  ;;  %v240_v13 = vmul.f32 0.2, %v234_v10  ;;  %v358_v14 = vpop.f32.mrb[3].mxu0 }
  0xe9   : > { %v241_v15 = vsel %vm239_vm4, %v234_v10, %v240_v13 }
  0xea   : > { %v243_v16 = vsel %vm242_vm5, %v241_v15, 0.0  ;;  %v251_v17 = vmul.f32 %v241_v15, %v241_v15 }
  0xeb   : > { %v244_v18 = vrot.slane %v243_v16, 4 }
  0xec   : > { %v252_v19 = vsel %vm242_vm5, %v251_v17, 0.0 }
  0xed   : > { %v245_v20 = vadd.f32 %v244_v18, %v243_v16  ;;  %v253_v21 = vrot.slane %v252_v19, 4 }
  0xef   : > { %v246_v22 = vrot.slane %v245_v20, 2  ;;  %v254_v23 = vadd.f32 %v253_v21, %v252_v19 }
  0xf1   : > { %v247_v24 = vadd.f32 %v246_v22, %v245_v20  ;;  %v255_v25 = vrot.slane %v254_v23, 2 }
  0xf3   : > { %v248_v26 = vrot.slane %v247_v24, 1  ;;  %v256_v27 = vadd.f32 %v255_v25, %v254_v23 }
  0xf5   : > { %v249_v28 = vadd.f32 %v248_v26, %v247_v24  ;;  %v257_v29 = vrot.slane %v256_v27, 1 }
  0xf7   : > { %v250_v30 = vmul.f32 0.25, %v249_v28  ;;  %v258_v31 = vadd.f32 %v257_v29, %v256_v27 }
  0xf9   : > { %v259_v32 = vmul.f32 0.25, %v258_v31  ;;  %v260_v33 = vmul.f32 %v250_v30, %v250_v30 }
  0xfb   : > { %v261_v34 = vsub.f32 %v259_v32, %v260_v33 }
  0xfd   : > { %v262_v35 = vadd.f32 1e-05, %v261_v34 }
  0xff   : > { %372 = vrsqrt.f32 %v262_v35 }
 0x109   : > { %v373_v40 = vpop.eup %372 }
 0x10a   : > { %v265_v41 = vmul.f32 %v373_v40, %v264_v38 }
 0x10c   : > { %v267_v43 = vmul.f32 %v265_v41, %v250_v30  ;;  %v272_v44 = vrot.slane %v265_v41, %v271_v39 }
 0x10e   : > { %v268_v45 = vsub.f32 %v266_v42, %v267_v43  ;;  %v273_v46 = vmul.f32 %v272_v44, %v241_v15 }
 0x110   : > { %v277_v47 = vrot.slane %v268_v45, %v271_v39 }
 0x112   : > { %v278_v48 = vadd.f32 %v277_v47, %v273_v46 }
 0x114   : > { %v279_v49 = vpack.c.bf16 %v278_v48, %v278_v48 }
 0x116   : > { %281 = vst.msk [vmem:[%s165_s30] sm:$0x3] %vm280_vm6, %v279_v49 }
 0x117 PF: > { %s13_s12 = sadd.s32 1, %s380_s12  }
 0x118   : > { %p10_p4 = scmp.ge.s32.totalorder %s13_s12, 6  }
 0x11a   :  { %12 = sbr.rel (!%p10_p4) target bundleno = 1 (0x1), region = 62 }

// kernel: gan_model_losses.32
= control target key start
LH: loop header
LB: loop body
LE: loop exit
PB: predicated region body
PF: predicated region fallthrough
CT: control target
= control target key end

     0   :  { %s918_s12 = smov 0   ;;  %s1099_s0 = inlined_call_operand.vmem [shape: bf16[4,2,2,192], index: 0, kind: input, shape index: {}]   ;;  %s1100_s1 = inlined_call_operand.vmem [shape: bf16[3,192,128], index: 1, kind: input, shape index: {}]   ;;  %s1101_s2 = inlined_call_operand.vmem [shape: f32[8,128], index: 2, kind: input, shape index: {}]   ;;  %s1102_s3 = inlined_call_operand.vmem [shape: bf16[4,1,128], index: 3, kind: output, shape index: {}]  }
   0x1 LB: > { %s741_s13 = sadd.s32 4294967295, %s894_s12   ;;  %p745_p0 = scmp.ge.s32.totalorder %s894_s12, 1  ;;  %s894_s12 = sphi %s918_s12, %s13_s12  }
   0x2   : > { %p136_p1 = scmp.lt.s32.totalorder %s894_s12, 5 }
   0x4   : > { %p137_p2 = pnand %p745_p0, %p136_p1 }
   0x5   : > { %v850_v0 = vld [vmem:[%s1100_s1 + $0x60] sm:$0xff] (!%p137_p2)   ;;  %v896_v1 = vmov (!%p137_p2), 0   ;;  %v852_v3 = vld [vmem:[%s1100_s1 + $0x68] sm:$0xff] (!%p137_p2)   ;;  %v854_v5 = vld [vmem:[%s1100_s1 + $0x70] sm:$0xff] (!%p137_p2)   ;;  %p157_p3 = scmp.lt.s32.totalorder (!%p137_p2), %s741_s13, 3  ;;  %v229_v13 = vlaneseq (!%p137_p2)  ;;  %vm313_vm0 = vcmask (!%p137_p2), 523264  }
   0x6   : > { %140 = sbr.rel (%p137_p2) target bundleno = 350 (0x15e), region = 32  ;;  %317 = vmatprep.subr.bf16.mxu0 (!%p137_p2), %v896_v1  ;;  %456 = vmatprep.subr.bf16.mxu1 (!%p137_p2), %v896_v1  ;;  %v851_v2 = vld [vmem:[%s1100_s1] sm:$0xff] (!%p137_p2)   ;;  %v853_v4 = vld [vmem:[%s1100_s1 + $0x8] sm:$0xff] (!%p137_p2)   ;;  %v855_v6 = vld [vmem:[%s1100_s1 + $0x10] sm:$0xff] (!%p137_p2)   ;;  %v897_v17 = vmov (!%p137_p2), 1966171168  }
   0x7   : > { %318 = vmatpush1.bf16.msra.mxu0 (!%p137_p2), %v850_v0  ;;  %457 = vmatpush1.bf16.msra.mxu1 (!%p137_p2), %v851_v2  ;;  %v856_v7 = vld [vmem:[%s1100_s1 + $0x78] sm:$0xff] (!%p137_p2)   ;;  %v858_v9 = vld [vmem:[%s1100_s1 + $0x80] sm:$0xff] (!%p137_p2)   ;;  %v860_v11 = vld [vmem:[%s1100_s1 + $0x88] sm:$0xff] (!%p137_p2)   ;;  %v227_v18 = vunpack.c.l.s4 (!%p137_p2), %v897_v17  ;;  %v230_v19 = vshrl.u32 (!%p137_p2), %v229_v13, 7  ;;  %vm688_vm2 = vcmask (!%p137_p2), 1040384  }
   0x8   : > { %319 = vmatprep.subr.bf16.mxu0 (!%p137_p2), %v896_v1  ;;  %458 = vmatprep.subr.bf16.mxu1 (!%p137_p2), %v896_v1  ;;  %v857_v8 = vld [vmem:[%s1100_s1 + $0x18] sm:$0xff] (!%p137_p2)   ;;  %v859_v10 = vld [vmem:[%s1100_s1 + $0x20] sm:$0xff] (!%p137_p2)   ;;  %v861_v12 = vld [vmem:[%s1100_s1 + $0x28] sm:$0xff] (!%p137_p2)   ;;  %vm689_vm3 = vsmask.f32 (!%p137_p2), 256 }
   0x9   : > { %v862_v14 = vld [vmem:[%s1100_s1 + $0x90] sm:$0xff] (!%p137_p2)   ;;  %v864_v21 = vld [vmem:[%s1100_s1 + $0x98] sm:$0xff] (!%p137_p2)   ;;  %v228_v24 = vunpack.c.0.s8 (!%p137_p2), %v227_v18  ;;  %v866_v27 = vld [vmem:[%s1100_s1 + $0xa0] sm:$0xff] (!%p137_p2)  }
   0xa   : > { %v863_v15 = vld [vmem:[%s1100_s1 + $0x30] sm:$0xff] (!%p137_p2)   ;;  %v865_v22 = vld [vmem:[%s1100_s1 + $0x38] sm:$0xff] (!%p137_p2)   ;;  %v867_v28 = vld [vmem:[%s1100_s1 + $0x40] sm:$0xff] (!%p137_p2)  }
   0xb   : > { %320 = vmatpush1.bf16.msra.mxu0 (!%p137_p2), %v852_v3  ;;  %459 = vmatpush1.bf16.msra.mxu1 (!%p137_p2), %v853_v4  ;;  %v231_v26 = vsub.s32 (!%p137_p2), %v228_v24, %v230_v19  ;;  %v868_v31 = vld [vmem:[%s1100_s1 + $0xa8] sm:$0xff] (!%p137_p2)   ;;  %v870_v33 = vld [vmem:[%s1100_s1 + $0xb0] sm:$0xff] (!%p137_p2)   ;;  %v872_v35 = vld [vmem:[%s1100_s1 + $0xb8] sm:$0xff] (!%p137_p2)  }
   0xc   : > { %321 = vmatprep.subr.bf16.mxu0 (!%p137_p2), %v896_v1  ;;  %460 = vmatprep.subr.bf16.mxu1 (!%p137_p2), %v896_v1  ;;  %v869_v32 = vld [vmem:[%s1100_s1 + $0x48] sm:$0xff] (!%p137_p2)   ;;  %v871_v34 = vld [vmem:[%s1100_s1 + $0x50] sm:$0xff] (!%p137_p2)   ;;  %v873_v36 = vld [vmem:[%s1100_s1 + $0x58] sm:$0xff] (!%p137_p2)  }
   0xd   : > { %s1104_s13 = smov (!%p157_p3, %s741_s13), 3  ;;  %v874_v39 = vld [vmem:[%s1100_s1 + $0xc0] sm:$0xff]   ;;  %v875_v41 = vld [vmem:[%s1100_s1 + $0xc8] sm:$0xff]   ;;  %v876_v42 = vld [vmem:[%s1100_s1 + $0xd0] sm:$0xff]  }
   0xe   : > { %s746_s9 = sshll.u32 %s1104_s13, 2  ;;  %v877_v43 = vld [vmem:[%s1100_s1 + $0xd8] sm:$0xff]   ;;  %v878_v44 = vld [vmem:[%s1100_s1 + $0xe0] sm:$0xff]   ;;  %v879_v45 = vld [vmem:[%s1100_s1 + $0xe8] sm:$0xff]   ;;  %s163_s23 = scalar_lea.vmem %s1102_s3, %s1104_s13 }
   0xf   : > { %322 = vmatpush1.bf16.msra.mxu0 %v854_v5  ;;  %461 = vmatpush1.bf16.msra.mxu1 %v855_v6  ;;  %s160_s16 = scalar_lea.vmem %s1099_s0, %s746_s9  ;;  %v880_v46 = vld [vmem:[%s1100_s1 + $0xf0] sm:$0xff]   ;;  %v881_v47 = vld [vmem:[%s1100_s1 + $0xf8] sm:$0xff]   ;;  %v882_v48 = vld [vmem:[%s1100_s1 + $0x100] sm:$0xff]  }
  0x10   : > { %323 = vmatprep.subr.bf16.mxu0 %v896_v1  ;;  %462 = vmatprep.subr.bf16.mxu1 %v896_v1  ;;  %v772_v16 = vld.sshfl [vmem:[%s160_s16 + $0x2] sm:$0x11 pattern:$0x75316420]  ;;  %v883_v49 = vld [vmem:[%s1100_s1 + $0x108] sm:$0xff]   ;;  %v884_v50 = vld [vmem:[%s1100_s1 + $0x110] sm:$0xff]  }
  0x11   : > { %v824_v20 = vld.sshfl [vmem:[%s160_s16] sm:$0x11 pattern:$0x75316420]  ;;  %v225_v23 = vcombine.high %v772_v16, %v772_v16  ;;  %v232_v37 = vrot.slane %v772_v16, %v231_v26  ;;  %v885_v51 = vld [vmem:[%s1100_s1 + $0x118] sm:$0xff]   ;;  %vm690_vm4 = vmand %vm688_vm2, %vm689_vm3 }
  0x12   : > { %v365_v25 = vcombine.high %v824_v20, %v824_v20  ;;  %v372_v38 = vrot.slane %v824_v20, %v231_v26  ;;  %v668_v63 = vld [vmem:[%s1101_s2] sm:$0x1]  ;;  %v682_v13 = vld [vmem:[%s1101_s2 + $0x2] sm:$0x1] }
  0x13   : > { %324 = vmatpush1.bf16.msra.mxu0 %v856_v7  ;;  %463 = vmatpush1.bf16.msra.mxu1 %v857_v8  ;;  %v239_v29 = vrot.slane %v225_v23, %v231_v26  ;;  %v691_v17 = vld [vmem:[%s163_s23] sm:$0x1] }
  0x14   : > { %325 = vmatprep.subr.bf16.mxu0 %v896_v1  ;;  %464 = vmatprep.subr.bf16.mxu1 %v896_v1  ;;  %v379_v30 = vrot.slane %v365_v25, %v231_v26  ;;  %v546_v52 = vshrl.u32 %v372_v38, 16 }
  0x15   : > { %785 = vmatprep.mubr.msk.bf16.mxu0 %vm313_vm0, %v239_v29 }
  0x16   : > { %799 = vmatprep.mubr.msk.bf16.mxu1 %vm313_vm0, %v379_v30  ;;  %v549_v40 = vshrl.u32 %v379_v30, 16 }
  0x17   : > { %326 = vmatpush1.bf16.msra.mxu0 %v858_v9  ;;  %465 = vmatpush1.bf16.msra.mxu1 %v859_v10  ;;  %v680_v10 = vld [vmem:[%s1101_s2 + $0x1] sm:$0x1] }
  0x18   : > { %327 = vmatprep.subr.bf16.mxu0 %v896_v1  ;;  %466 = vmatprep.subr.bf16.mxu1 %v896_v1 }
  0x1b   : > { %328 = vmatpush1.bf16.msra.mxu0 %v860_v11  ;;  %467 = vmatpush1.bf16.msra.mxu1 %v861_v12 }
  0x1c   : > { %329 = vmatprep.subr.bf16.mxu0 %v896_v1  ;;  %468 = vmatprep.subr.bf16.mxu1 %v896_v1 }
  0x1f   : > { %330 = vmatpush1.bf16.msra.mxu0 %v862_v14  ;;  %469 = vmatpush1.bf16.msra.mxu1 %v863_v15 }
  0x20   : > { %331 = vmatprep.subr.bf16.mxu0 %v896_v1  ;;  %470 = vmatprep.subr.bf16.mxu1 %v896_v1 }
  0x23   : > { %332 = vmatpush1.bf16.msra.mxu0 %v864_v21  ;;  %471 = vmatpush1.bf16.msra.mxu1 %v865_v22 }
  0x24   : > { %333 = vmatprep.subr.bf16.mxu0 %v896_v1  ;;  %472 = vmatprep.subr.bf16.mxu1 %v896_v1 }
  0x27   : > { %334 = vmatpush1.bf16.msra.mxu0 %v866_v27  ;;  %473 = vmatpush1.bf16.msra.mxu1 %v867_v28 }
  0x28   : > { %335 = vmatprep.subr.bf16.mxu0 %v896_v1  ;;  %474 = vmatprep.subr.bf16.mxu1 %v896_v1 }
  0x2b   : > { %336 = vmatpush1.bf16.msra.mxu0 %v868_v31  ;;  %475 = vmatpush1.bf16.msra.mxu1 %v869_v32 }
  0x2c   : > { %337 = vmatprep.subr.bf16.mxu0 %v896_v1  ;;  %476 = vmatprep.subr.bf16.mxu1 %v896_v1 }
  0x2f   : > { %338 = vmatpush1.bf16.msra.mxu0 %v870_v33  ;;  %477 = vmatpush1.bf16.msra.mxu1 %v871_v34 }
  0x30   : > { %339 = vmatprep.subr.bf16.mxu0 %v896_v1  ;;  %478 = vmatprep.subr.bf16.mxu1 %v896_v1 }
  0x33   : > { %340 = vmatpush1.bf16.msra.mxu0 %v872_v35  ;;  %479 = vmatpush1.bf16.msra.mxu1 %v873_v36 }
  0x34   : > { %627 = vmatprep.subr.bf16.mxu0 %v896_v1 }
  0x36   : > { %350 = vmatmul.mubr.bf16.vlgmr.msra.gmra.mrb[0].mxu0 %v232_v37  ;;  %489 = vmatmul.mubr.bf16.vlgmr.msra.gmra.mrb[0].mxu1 %v372_v38 }
  0x37   : > { %628 = vmatpush1.bf16.msra.mxu0 %v874_v39  ;;  %837 = vmatprep.mubr.msk.bf16.mxu0 %vm313_vm0, %v549_v40 }
  0x38   : > { %629 = vmatprep.subr.bf16.mxu0 %v896_v1 }
  0x3b   : > { %630 = vmatpush1.bf16.msra.mxu0 %v875_v41 }
  0x3c   : > { %631 = vmatprep.subr.bf16.mxu0 %v896_v1 }
  0x3f   : > { %632 = vmatpush1.bf16.msra.mxu0 %v876_v42 }
  0x40   : > { %633 = vmatprep.subr.bf16.mxu0 %v896_v1 }
  0x43   : > { %634 = vmatpush1.bf16.msra.mxu0 %v877_v43 }
  0x44   : > { %635 = vmatprep.subr.bf16.mxu0 %v896_v1 }
  0x47   : > { %636 = vmatpush1.bf16.msra.mxu0 %v878_v44 }
  0x48   : > { %637 = vmatprep.subr.bf16.mxu0 %v896_v1 }
  0x4b   : > { %638 = vmatpush1.bf16.msra.mxu0 %v879_v45 }
  0x4c   : > { %639 = vmatprep.subr.bf16.mxu0 %v896_v1 }
  0x4f   : > { %640 = vmatpush1.bf16.msra.mxu0 %v880_v46 }
  0x50   : > { %641 = vmatprep.subr.bf16.mxu0 %v896_v1 }
  0x53   : > { %642 = vmatpush1.bf16.msra.mxu0 %v881_v47 }
  0x54   : > { %643 = vmatprep.subr.bf16.mxu0 %v896_v1 }
  0x57   : > { %644 = vmatpush1.bf16.msra.mxu0 %v882_v48 }
  0x58   : > { %645 = vmatprep.subr.bf16.mxu0 %v896_v1 }
  0x5b   : > { %646 = vmatpush1.bf16.msra.mxu0 %v883_v49 }
  0x5c   : > { %647 = vmatprep.subr.bf16.mxu0 %v896_v1 }
  0x5f   : > { %648 = vmatpush1.bf16.msra.mxu0 %v884_v50 }
  0x60   : > { %649 = vmatprep.subr.bf16.mxu0 %v896_v1 }
  0x63   : > { %650 = vmatpush1.bf16.msra.mxu0 %v885_v51 }
  0x66   : > { %660 = vmatmul.mubr.bf16.vlgmr.msra.gmra.mrb[4].mxu0 %v546_v52 }
 0x109   : > { %v351_v53 = vpop.f32.mrb[0].mxu0  ;;  %v490_v55 = vpop.f32.mrb[0].mxu1 }
 0x10a   : > { %v353_v54 = vpop.f32.mrb[1].mxu0  ;;  %v491_v56 = vadd.f32 %v490_v55, %v351_v53  ;;  %v492_v58 = vpop.f32.mrb[1].mxu1 }
 0x10b   : > { %v354_v57 = vpop.f32.mrb[2].mxu0  ;;  %v493_v60 = vpop.f32.mrb[2].mxu1 }
 0x10c   : > { %v355_v59 = vpop.f32.mrb[3].mxu0  ;;  %v494_v61 = vpop.f32.mrb[3].mxu1 }
 0x139   : > { %v661_v62 = vpop.f32.mrb[4].mxu0 }
 0x13a   : > { %v667_v0 = vadd.f32 %v661_v62, %v491_v56  ;;  %v663_v2 = vpop.f32.mrb[5].mxu0 }
 0x13b   : > { %v664_v1 = vpop.f32.mrb[6].mxu0 }
 0x13c   : > { %v669_v3 = vadd.f32 %v668_v63, %v667_v0  ;;  %v665_v4 = vpop.f32.mrb[7].mxu0 }
 0x13e   : > { %vm670_vm1 = vcmp.ge.f32.partialorder %v669_v3, 0.0  ;;  %v671_v5 = vmul.f32 0.2, %v669_v3 }
 0x140   : > { %v672_v6 = vsel %vm670_vm1, %v669_v3, %v671_v5 }
 0x141   : > { %v674_v7 = vmul.f32 %v672_v6, %v672_v6 }
 0x143   : > { %v677_v8 = vsub.f32 %v674_v7, %v674_v7 }
 0x145   : > { %v678_v9 = vadd.f32 1e-05, %v677_v8 }
 0x147   : > { %886 = vrsqrt.f32 %v678_v9 }
 0x151   : > { %v887_v11 = vpop.eup %886 }
 0x152   : > { %v681_v12 = vmul.f32 %v887_v11, %v680_v10 }
 0x154   : > { %v683_v14 = vmul.f32 %v681_v12, %v672_v6 }
 0x156   : > { %v684_v15 = vsub.f32 %v682_v13, %v683_v14 }
 0x158   : > { %v686_v16 = vadd.f32 %v684_v15, %v683_v14 }
 0x15a   : > { %v687_v18 = vpack.c.bf16 %v686_v16, %v686_v16 }
 0x15c   : > { %v692_v19 = vsel %vm690_vm4, %v687_v18, %v691_v17 }
 0x15d   : > { %693 = vst [vmem:[%s163_s23] sm:$0x1] %v692_v19 }
 0x15e PF: > { %s13_s12 = sadd.s32 1, %s894_s12  }
 0x15f   : > { %p10_p4 = scmp.ge.s32.totalorder %s13_s12, 6  }
 0x161   :  { %12 = sbr.rel (!%p10_p4) target bundleno = 1 (0x1), region = 65 }

// kernel: gan_model_losses.33
= control target key start
LH: loop header
LB: loop body
LE: loop exit
PB: predicated region body
PF: predicated region fallthrough
CT: control target
= control target key end

     0   :  { %s1600_s12 = smov 0   ;;  %s1900_s0 = inlined_call_operand.vmem [shape: bf16[4,2,2,384], index: 0, kind: input, shape index: {}]   ;;  %s1901_s1 = inlined_call_operand.vmem [shape: bf16[3,384,128], index: 1, kind: input, shape index: {}]   ;;  %s1902_s2 = inlined_call_operand.vmem [shape: f32[8,128], index: 2, kind: input, shape index: {}]   ;;  %s1903_s3 = inlined_call_operand.vmem [shape: bf16[4,1,128], index: 3, kind: output, shape index: {}]  }
   0x1 LB: > { %s1151_s13 = sadd.s32 4294967295, %s1575_s12   ;;  %p1155_p0 = scmp.ge.s32.totalorder %s1575_s12, 1  ;;  %s1575_s12 = sphi %s1600_s12, %s13_s12  }
   0x2   : > { %p136_p1 = scmp.lt.s32.totalorder %s1575_s12, 5 }
   0x4   : > { %p137_p2 = pnand %p1155_p0, %p136_p1 }
   0x5   : > { %v1495_v0 = vld [vmem:[%s1901_s1 + $0x100] sm:$0xff] (!%p137_p2)   ;;  %v1577_v1 = vmov (!%p137_p2), 0.0   ;;  %v1498_v4 = vld [vmem:[%s1901_s1 + $0x108] sm:$0xff] (!%p137_p2)   ;;  %v1501_v7 = vld [vmem:[%s1901_s1 + $0x110] sm:$0xff] (!%p137_p2)   ;;  %vm1578_vm0 = vmmov (!%p137_p2), 0   ;;  %p157_p3 = scmp.lt.s32.totalorder (!%p137_p2), %s1151_s13, 3  ;;  %v277_v21 = vlaneseq (!%p137_p2) }
   0x6   : > { %140 = sbr.rel (%p137_p2) target bundleno = 355 (0x163), region = 32  ;;  %1423 = vmatprep.subr.bf16.mxu1 (!%p137_p2), %v1577_v1  ;;  %v1496_v2 = vld [vmem:[%s1901_s1 + $0xc0] sm:$0xff] (!%p137_p2)   ;;  %1330 = vmatprep.subr.bf16.mxu0 (!%p137_p2), %v1495_v0  ;;  %v1499_v5 = vld [vmem:[%s1901_s1 + $0xc8] sm:$0xff] (!%p137_p2)   ;;  %v1502_v8 = vld [vmem:[%s1901_s1 + $0xd0] sm:$0xff] (!%p137_p2)   ;;  %v1579_v25 = vmov (!%p137_p2), 1966171168  }
   0x7   : > { %v1497_v3 = vld [vmem:[%s1901_s1 + $0x140] sm:$0xff] (!%p137_p2)   ;;  %1331 = vmatpush3.bf16.msra.mxu0 (!%p137_p2), %v1496_v2  ;;  %v1500_v6 = vld [vmem:[%s1901_s1 + $0x148] sm:$0xff] (!%p137_p2)   ;;  %1439 = vmatprep.mubr.msk.bf16.mxu1 (!%p137_p2), %vm1578_vm0, %v1577_v1  ;;  %v1503_v9 = vld [vmem:[%s1901_s1 + $0x150] sm:$0xff] (!%p137_p2)   ;;  %v275_v26 = vunpack.c.l.s4 (!%p137_p2), %v1579_v25  ;;  %v278_v27 = vshrl.u32 (!%p137_p2), %v277_v21, 7  ;;  %vm1098_vm2 = vcmask (!%p137_p2), 1040384  }
   0x8   : > { %1424 = vmatpush3.bf16.msra.mxu1 (!%p137_p2), %v1497_v3  ;;  %1332 = vmatprep.subr.bf16.mxu0 (!%p137_p2), %v1498_v4  ;;  %v1504_v10 = vld [vmem:[%s1901_s1 + $0x118] sm:$0xff] (!%p137_p2)   ;;  %v1507_v13 = vld [vmem:[%s1901_s1 + $0x120] sm:$0xff] (!%p137_p2)   ;;  %v1510_v16 = vld [vmem:[%s1901_s1 + $0x128] sm:$0xff] (!%p137_p2)   ;;  %vm1099_vm3 = vsmask.f32 (!%p137_p2), 256 }
   0x9   : > { %1425 = vmatprep.subr.bf16.mxu1 (!%p137_p2), %v1577_v1  ;;  %v1505_v11 = vld [vmem:[%s1901_s1 + $0xd8] sm:$0xff] (!%p137_p2)   ;;  %v1508_v14 = vld [vmem:[%s1901_s1 + $0xe0] sm:$0xff] (!%p137_p2)   ;;  %v1511_v17 = vld [vmem:[%s1901_s1 + $0xe8] sm:$0xff] (!%p137_p2)   ;;  %v276_v31 = vunpack.c.0.s8 (!%p137_p2), %v275_v26 }
   0xa   : > { %v1506_v12 = vld [vmem:[%s1901_s1 + $0x158] sm:$0xff] (!%p137_p2)   ;;  %v1509_v15 = vld [vmem:[%s1901_s1 + $0x160] sm:$0xff] (!%p137_p2)   ;;  %v1512_v18 = vld [vmem:[%s1901_s1 + $0x168] sm:$0xff] (!%p137_p2)  }
   0xb   : > { %1333 = vmatpush3.bf16.msra.mxu0 (!%p137_p2), %v1499_v5  ;;  %v1513_v19 = vld [vmem:[%s1901_s1 + $0x130] sm:$0xff] (!%p137_p2)   ;;  %v1516_v23 = vld [vmem:[%s1901_s1 + $0x138] sm:$0xff] (!%p137_p2)   ;;  %v1519_v32 = vld [vmem:[%s1901_s1 + $0x40] sm:$0xff] (!%p137_p2)   ;;  %v1706_v33 = vsub.s32 (!%p137_p2), %v276_v31, %v278_v27 }
   0xc   : > { %1426 = vmatpush3.bf16.msra.mxu1 (!%p137_p2), %v1500_v6  ;;  %1334 = vmatprep.subr.bf16.mxu0 (!%p137_p2), %v1501_v7  ;;  %v1514_v20 = vld [vmem:[%s1901_s1 + $0xf0] sm:$0xff] (!%p137_p2)   ;;  %v1517_v28 = vld [vmem:[%s1901_s1 + $0xf8] sm:$0xff] (!%p137_p2)   ;;  %v1520_v34 = vld [vmem:[%s1901_s1] sm:$0xff] (!%p137_p2)  }
   0xd   : > { %1427 = vmatprep.subr.bf16.mxu1 %v1577_v1  ;;  %s1905_s13 = smov (!%p157_p3, %s1151_s13), 3  ;;  %v1515_v22 = vld [vmem:[%s1901_s1 + $0x170] sm:$0xff]   ;;  %v1518_v29 = vld [vmem:[%s1901_s1 + $0x178] sm:$0xff]   ;;  %v1521_v37 = vld [vmem:[%s1901_s1 + $0x80] sm:$0xff]  }
   0xe   : > { %s1483_s21 = smul.u32 6, %s1905_s13  ;;  %v1522_v38 = vld [vmem:[%s1901_s1 + $0x48] sm:$0xff]   ;;  %v1525_v42 = vld [vmem:[%s1901_s1 + $0x50] sm:$0xff]   ;;  %v1528_v45 = vld [vmem:[%s1901_s1 + $0x58] sm:$0xff]  }
   0xf   : > { %1335 = vmatpush3.bf16.msra.mxu0 %v1502_v8  ;;  %v1523_v40 = vld [vmem:[%s1901_s1 + $0x8] sm:$0xff]   ;;  %v1526_v43 = vld [vmem:[%s1901_s1 + $0x10] sm:$0xff]   ;;  %v1529_v46 = vld [vmem:[%s1901_s1 + $0x18] sm:$0xff]  }
  0x10   : > { %1428 = vmatpush3.bf16.msra.mxu1 %v1503_v9  ;;  %1336 = vmatprep.subr.bf16.mxu0 %v1504_v10  ;;  %s1686_s5 = scalar_lea.vmem %s1900_s0, %s1483_s21  ;;  %v1524_v41 = vld [vmem:[%s1901_s1 + $0x88] sm:$0xff]   ;;  %v1527_v44 = vld [vmem:[%s1901_s1 + $0x90] sm:$0xff]   ;;  %v1530_v47 = vld [vmem:[%s1901_s1 + $0x98] sm:$0xff]   ;;  %s163_s21 = scalar_lea.vmem %s1903_s3, %s1905_s13 }
  0x11   : > { %1429 = vmatprep.subr.bf16.mxu1 %v1577_v1  ;;  %v1205_v24 = vld.sshfl [vmem:[%s1686_s5 + $0x3] sm:$0x13 pattern:$0x75316420]  ;;  %v1534_v51 = vld [vmem:[%s1901_s1 + $0x68] sm:$0xff]   ;;  %v1537_v56 = vld [vmem:[%s1901_s1 + $0x70] sm:$0xff]  }
  0x12   : > { %v273_v30 = vcombine.high %v1205_v24, %v1205_v24  ;;  %v280_v36 = vrot.slane %v1205_v24, %v1706_v33  ;;  %v1531_v48 = vld [vmem:[%s1901_s1 + $0x60] sm:$0xff]   ;;  %v1535_v52 = vld [vmem:[%s1901_s1 + $0x28] sm:$0xff]   ;;  %v1538_v58 = vld [vmem:[%s1901_s1 + $0x30] sm:$0xff]  }
  0x13   : > { %1337 = vmatpush3.bf16.msra.mxu0 %v1505_v11  ;;  %v1532_v49 = vld [vmem:[%s1901_s1 + $0x20] sm:$0xff]   ;;  %v1536_v55 = vld [vmem:[%s1901_s1 + $0xa8] sm:$0xff]   ;;  %v1539_v59 = vld [vmem:[%s1901_s1 + $0xb0] sm:$0xff]  }
  0x14   : > { %1430 = vmatpush3.bf16.msra.mxu1 %v1506_v12  ;;  %1338 = vmatprep.subr.bf16.mxu0 %v1507_v13  ;;  %v287_v35 = vrot.slane %v273_v30, %v1706_v33  ;;  %v288_v39 = vcombine.high %v280_v36, %v280_v36  ;;  %v1533_v50 = vld [vmem:[%s1901_s1 + $0xa0] sm:$0xff]   ;;  %v1540_v60 = vld [vmem:[%s1901_s1 + $0x78] sm:$0xff]   ;;  %v1546_v5 = vld [vmem:[%s1901_s1 + $0x1c8] sm:$0xff]  }
  0x15   : > { %1431 = vmatprep.subr.bf16.mxu1 %v1577_v1  ;;  %v1230_v53 = vld.sshfl [vmem:[%s1686_s5] sm:$0x13 pattern:$0x75316420]  ;;  %v1541_v61 = vld [vmem:[%s1901_s1 + $0x38] sm:$0xff]   ;;  %v1547_v7 = vld [vmem:[%s1901_s1 + $0x188] sm:$0xff]  }
  0x16   : > { %468 = vmatprep.mubr.bf16.mxu0 %v287_v35  ;;  %v524_v54 = vcombine.high %v1230_v53, %v1230_v53  ;;  %v1542_v62 = vld [vmem:[%s1901_s1 + $0xb8] sm:$0xff]   ;;  %v1791_v63 = vrot.slane %v1230_v53, %v1706_v33  ;;  %v1543_v0 = vld [vmem:[%s1901_s1 + $0x1c0] sm:$0xff]   ;;  %v1548_v8 = vld [vmem:[%s1901_s1 + $0x208] sm:$0xff]  }
  0x17   : > { %1339 = vmatpush3.bf16.msra.mxu0 %v1508_v14  ;;  %v1544_v2 = vld [vmem:[%s1901_s1 + $0x180] sm:$0xff]   ;;  %v1549_v9 = vld [vmem:[%s1901_s1 + $0x1d0] sm:$0xff]   ;;  %v1552_v12 = vld [vmem:[%s1901_s1 + $0x1d8] sm:$0xff]  }
  0x18   : > { %1432 = vmatpush3.bf16.msra.mxu1 %v1509_v15  ;;  %1340 = vmatprep.subr.bf16.mxu0 %v1510_v16  ;;  %v538_v57 = vrot.slane %v524_v54, %v1706_v33  ;;  %v1802_v3 = vcombine.high %v1791_v63, %v1791_v63  ;;  %v1545_v4 = vld [vmem:[%s1901_s1 + $0x200] sm:$0xff]   ;;  %v1550_v10 = vld [vmem:[%s1901_s1 + $0x190] sm:$0xff]   ;;  %v1553_v13 = vld [vmem:[%s1901_s1 + $0x198] sm:$0xff]   ;;  %v842_v27 = vshrl.u32 %v1791_v63, 16 }
  0x19   : > { %1433 = vmatprep.subr.bf16.mxu1 %v1577_v1  ;;  %v1551_v11 = vld [vmem:[%s1901_s1 + $0x210] sm:$0xff]   ;;  %v1554_v14 = vld [vmem:[%s1901_s1 + $0x218] sm:$0xff]   ;;  %v1555_v15 = vld [vmem:[%s1901_s1 + $0x1e0] sm:$0xff]  }
  0x1a   : > { %v845_v6 = vshrl.u32 %v538_v57, 16  ;;  %v1556_v16 = vld [vmem:[%s1901_s1 + $0x1a0] sm:$0xff]   ;;  %v1561_v21 = vld [vmem:[%s1901_s1 + $0x1f0] sm:$0xff]   ;;  %v1564_v24 = vld [vmem:[%s1901_s1 + $0x1f8] sm:$0xff]  }
  0x1b   : > { %1341 = vmatpush3.bf16.msra.mxu0 %v1511_v17  ;;  %v1557_v17 = vld [vmem:[%s1901_s1 + $0x220] sm:$0xff]   ;;  %v1565_v25 = vld [vmem:[%s1901_s1 + $0x1b8] sm:$0xff]   ;;  %vm1100_vm4 = vmand %vm1098_vm2, %vm1099_vm3 }
  0x1c   : > { %1434 = vmatpush3.bf16.msra.mxu1 %v1512_v18  ;;  %1342 = vmatprep.subr.bf16.mxu0 %v1513_v19  ;;  %v1558_v18 = vld [vmem:[%s1901_s1 + $0x1e8] sm:$0xff]   ;;  %v1566_v26 = vld [vmem:[%s1901_s1 + $0x238] sm:$0xff]  }
  0x1d   : > { %1435 = vmatprep.subr.bf16.mxu1 %v1577_v1  ;;  %v1559_v19 = vld [vmem:[%s1901_s1 + $0x1a8] sm:$0xff]  }
  0x1f   : > { %1343 = vmatpush3.bf16.msra.mxu0 %v1514_v20  ;;  %v1560_v20 = vld [vmem:[%s1901_s1 + $0x228] sm:$0xff]  }
  0x20   : > { %1436 = vmatpush3.bf16.msra.mxu1 %v1515_v22  ;;  %1344 = vmatprep.subr.bf16.mxu0 %v1516_v23  ;;  %v1562_v22 = vld [vmem:[%s1901_s1 + $0x1b0] sm:$0xff]  }
  0x21   : > { %1437 = vmatprep.subr.bf16.mxu1 %v1577_v1  ;;  %v1563_v23 = vld [vmem:[%s1901_s1 + $0x230] sm:$0xff]  }
  0x23   : > { %1345 = vmatpush3.bf16.msra.mxu0 %v1517_v28  ;;  %v848_v28 = vshrl.u32 %v1802_v3, 16 }
  0x24   : > { %1438 = vmatpush3.bf16.msra.mxu1 %v1518_v29  ;;  %1361 = vmatprep.subr.bf16.mxu0 %v1519_v32 }
  0x25   : > { %1443 = vmatprep.subr.bf16.mxu1 %v1577_v1 }
  0x26   : > { %469 = vmatmul.mubr.bf16.vlgmr.msra.gmra.mrb[0].mxu0 %v280_v36 }
  0x27   : > { %1440 = vmatmul.mubr.bf16.vlgmr.msra.gmra.mrb[0].mxu1 %v288_v39  ;;  %1362 = vmatpush3.bf16.msra.mxu0 %v1520_v34 }
  0x28   : > { %1444 = vmatpush3.bf16.msra.mxu1 %v1521_v37  ;;  %1363 = vmatprep.subr.bf16.mxu0 %v1522_v38 }
  0x29   : > { %1445 = vmatprep.subr.bf16.mxu1 %v1577_v1  ;;  %1459 = vmatprep.mubr.msk.bf16.mxu1 %vm1578_vm0, %v1577_v1 }
  0x2a   : > { %719 = vmatprep.mubr.bf16.mxu0 %v538_v57 }
  0x2b   : > { %1364 = vmatpush3.bf16.msra.mxu0 %v1523_v40 }
  0x2c   : > { %1446 = vmatpush3.bf16.msra.mxu1 %v1524_v41  ;;  %1365 = vmatprep.subr.bf16.mxu0 %v1525_v42 }
  0x2d   : > { %1447 = vmatprep.subr.bf16.mxu1 %v1577_v1 }
  0x2f   : > { %1366 = vmatpush3.bf16.msra.mxu0 %v1526_v43 }
  0x30   : > { %1448 = vmatpush3.bf16.msra.mxu1 %v1527_v44  ;;  %1367 = vmatprep.subr.bf16.mxu0 %v1528_v45 }
  0x31   : > { %1449 = vmatprep.subr.bf16.mxu1 %v1577_v1 }
  0x33   : > { %1368 = vmatpush3.bf16.msra.mxu0 %v1529_v46 }
  0x34   : > { %1450 = vmatpush3.bf16.msra.mxu1 %v1530_v47  ;;  %1369 = vmatprep.subr.bf16.mxu0 %v1531_v48 }
  0x35   : > { %1451 = vmatprep.subr.bf16.mxu1 %v1577_v1 }
  0x37   : > { %1370 = vmatpush3.bf16.msra.mxu0 %v1532_v49 }
  0x38   : > { %1452 = vmatpush3.bf16.msra.mxu1 %v1533_v50  ;;  %1371 = vmatprep.subr.bf16.mxu0 %v1534_v51 }
  0x39   : > { %1453 = vmatprep.subr.bf16.mxu1 %v1577_v1 }
  0x3b   : > { %1372 = vmatpush3.bf16.msra.mxu0 %v1535_v52 }
  0x3c   : > { %1454 = vmatpush3.bf16.msra.mxu1 %v1536_v55  ;;  %1373 = vmatprep.subr.bf16.mxu0 %v1537_v56 }
  0x3d   : > { %1455 = vmatprep.subr.bf16.mxu1 %v1577_v1 }
  0x3f   : > { %1374 = vmatpush3.bf16.msra.mxu0 %v1538_v58 }
  0x40   : > { %1456 = vmatpush3.bf16.msra.mxu1 %v1539_v59  ;;  %1375 = vmatprep.subr.bf16.mxu0 %v1540_v60  ;;  %v1078_v59 = vld [vmem:[%s1902_s2] sm:$0x1] }
  0x41   : > { %1457 = vmatprep.subr.bf16.mxu1 %v1577_v1 }
  0x43   : > { %1376 = vmatpush3.bf16.msra.mxu0 %v1541_v61 }
  0x44   : > { %1458 = vmatpush3.bf16.msra.mxu1 %v1542_v62  ;;  %1392 = vmatprep.subr.bf16.mxu0 %v1543_v0 }
  0x45   : > { %1463 = vmatprep.subr.bf16.mxu1 %v1577_v1 }
  0x46   : > { %720 = vmatmul.mubr.bf16.vlgmr.msra.gmra.mrb[4].mxu0 %v1791_v63 }
  0x47   : > { %1460 = vmatmul.mubr.bf16.vlgmr.msra.gmra.mrb[4].mxu1 %v1802_v3  ;;  %1393 = vmatpush3.bf16.msra.mxu0 %v1544_v2 }
  0x48   : > { %1464 = vmatpush3.bf16.msra.mxu1 %v1545_v4  ;;  %1394 = vmatprep.subr.bf16.mxu0 %v1546_v5  ;;  %v1090_v4 = vld [vmem:[%s1902_s2 + $0x1] sm:$0x1] }
  0x49   : > { %1465 = vmatprep.subr.bf16.mxu1 %v1577_v1  ;;  %1029 = vmatprep.mubr.bf16.mxu0 %v845_v6 }
  0x4a   : > { %1479 = vmatprep.mubr.msk.bf16.mxu1 %vm1578_vm0, %v1577_v1 }
  0x4b   : > { %1395 = vmatpush3.bf16.msra.mxu0 %v1547_v7  ;;  %v1092_v7 = vld [vmem:[%s1902_s2 + $0x2] sm:$0x1] }
  0x4c   : > { %1466 = vmatpush3.bf16.msra.mxu1 %v1548_v8  ;;  %1396 = vmatprep.subr.bf16.mxu0 %v1549_v9 }
  0x4d   : > { %1467 = vmatprep.subr.bf16.mxu1 %v1577_v1 }
  0x4f   : > { %1397 = vmatpush3.bf16.msra.mxu0 %v1550_v10 }
  0x50   : > { %1468 = vmatpush3.bf16.msra.mxu1 %v1551_v11  ;;  %1398 = vmatprep.subr.bf16.mxu0 %v1552_v12  ;;  %v1101_v11 = vld [vmem:[%s163_s21] sm:$0x1] }
  0x51   : > { %1469 = vmatprep.subr.bf16.mxu1 %v1577_v1 }
  0x53   : > { %1399 = vmatpush3.bf16.msra.mxu0 %v1553_v13 }
  0x54   : > { %1470 = vmatpush3.bf16.msra.mxu1 %v1554_v14  ;;  %1400 = vmatprep.subr.bf16.mxu0 %v1555_v15 }
  0x55   : > { %1471 = vmatprep.subr.bf16.mxu1 %v1577_v1 }
  0x57   : > { %1401 = vmatpush3.bf16.msra.mxu0 %v1556_v16 }
  0x58   : > { %1472 = vmatpush3.bf16.msra.mxu1 %v1557_v17  ;;  %1402 = vmatprep.subr.bf16.mxu0 %v1558_v18 }
  0x59   : > { %1473 = vmatprep.subr.bf16.mxu1 %v1577_v1 }
  0x5b   : > { %1403 = vmatpush3.bf16.msra.mxu0 %v1559_v19 }
  0x5c   : > { %1474 = vmatpush3.bf16.msra.mxu1 %v1560_v20  ;;  %1404 = vmatprep.subr.bf16.mxu0 %v1561_v21 }
  0x5d   : > { %1475 = vmatprep.subr.bf16.mxu1 %v1577_v1 }
  0x5f   : > { %1405 = vmatpush3.bf16.msra.mxu0 %v1562_v22 }
  0x60   : > { %1476 = vmatpush3.bf16.msra.mxu1 %v1563_v23  ;;  %1406 = vmatprep.subr.bf16.mxu0 %v1564_v24 }
  0x61   : > { %1477 = vmatprep.subr.bf16.mxu1 %v1577_v1 }
  0x63   : > { %1407 = vmatpush3.bf16.msra.mxu0 %v1565_v25 }
  0x64   : > { %1478 = vmatpush3.bf16.msra.mxu1 %v1566_v26 }
  0x66   : > { %1030 = vmatmul.mubr.bf16.vlgmr.msra.gmra.mrb[8].mxu0 %v842_v27 }
  0x67   : > { %1480 = vmatmul.mubr.bf16.vlgmr.msra.gmra.mrb[8].mxu1 %v848_v28 }
  0xf9   : > { %v1346_v29 = vpop.f32.mrb[0].mxu0 }
  0xfa   : > { %v1347_v30 = vpop.f32.mrb[1].mxu0  ;;  %v510_v31 = vpop.f32.mrb[0].mxu1 }
  0xfb   : > { %v1348_v32 = vadd.f32 %v1347_v30, %v1346_v29  ;;  %v1349_v33 = vpop.f32.mrb[2].mxu0  ;;  %v1441_v34 = vpop.f32.mrb[1].mxu1 }
  0xfc   : > { %v1350_v35 = vpop.f32.mrb[3].mxu0  ;;  %v513_v36 = vpop.f32.mrb[2].mxu1 }
  0xfd   : > { %v511_v37 = vadd.f32 %v1348_v32, %v510_v31  ;;  %v1442_v38 = vpop.f32.mrb[3].mxu1 }
 0x119   : > { %v1377_v39 = vpop.f32.mrb[4].mxu0 }
 0x11a   : > { %v1378_v1 = vpop.f32.mrb[5].mxu0  ;;  %v761_v40 = vpop.f32.mrb[4].mxu1 }
 0x11b   : > { %v1379_v41 = vadd.f32 %v1378_v1, %v1377_v39  ;;  %v1380_v42 = vpop.f32.mrb[6].mxu0  ;;  %v1461_v43 = vpop.f32.mrb[5].mxu1 }
 0x11c   : > { %v1381_v44 = vpop.f32.mrb[7].mxu0  ;;  %v764_v45 = vpop.f32.mrb[6].mxu1 }
 0x11d   : > { %v722_v46 = vadd.f32 %v1379_v41, %v511_v37  ;;  %v1462_v47 = vpop.f32.mrb[7].mxu1 }
 0x11f   : > { %v762_v48 = vadd.f32 %v761_v40, %v722_v46 }
 0x139   : > { %v1408_v49 = vpop.f32.mrb[8].mxu0 }
 0x13a   : > { %v1071_v50 = vpop.f32.mrb[8].mxu1  ;;  %v1409_v51 = vpop.f32.mrb[9].mxu0 }
 0x13b   : > { %v1410_v52 = vadd.f32 %v1409_v51, %v1408_v49  ;;  %v1481_v53 = vpop.f32.mrb[9].mxu1  ;;  %v1411_v54 = vpop.f32.mrb[10].mxu0 }
 0x13c   : > { %v1074_v55 = vpop.f32.mrb[10].mxu1  ;;  %v1412_v56 = vpop.f32.mrb[11].mxu0 }
 0x13d   : > { %v1072_v57 = vadd.f32 %v1410_v52, %v1071_v50  ;;  %v1482_v58 = vpop.f32.mrb[11].mxu1 }
 0x13f   : > { %v1077_v60 = vadd.f32 %v1072_v57, %v762_v48 }
 0x141   : > { %v1079_v61 = vadd.f32 %v1078_v59, %v1077_v60 }
 0x143   : > { %vm1080_vm1 = vcmp.ge.f32.partialorder %v1079_v61, 0.0  ;;  %v1081_v62 = vmul.f32 0.2, %v1079_v61 }
 0x145   : > { %v1082_v63 = vsel %vm1080_vm1, %v1079_v61, %v1081_v62 }
 0x146   : > { %v1084_v0 = vmul.f32 %v1082_v63, %v1082_v63 }
 0x148   : > { %v1087_v2 = vsub.f32 %v1084_v0, %v1084_v0 }
 0x14a   : > { %v1088_v3 = vadd.f32 1e-05, %v1087_v2 }
 0x14c   : > { %1567 = vrsqrt.f32 %v1088_v3 }
 0x156   : > { %v1568_v5 = vpop.eup %1567 }
 0x157   : > { %v1091_v6 = vmul.f32 %v1568_v5, %v1090_v4 }
 0x159   : > { %v1093_v8 = vmul.f32 %v1091_v6, %v1082_v63 }
 0x15b   : > { %v1094_v9 = vsub.f32 %v1092_v7, %v1093_v8 }
 0x15d   : > { %v1096_v10 = vadd.f32 %v1094_v9, %v1093_v8 }
 0x15f   : > { %v1097_v12 = vpack.c.bf16 %v1096_v10, %v1096_v10 }
 0x161   : > { %v1102_v13 = vsel %vm1100_vm4, %v1097_v12, %v1101_v11 }
 0x162   : > { %1103 = vst [vmem:[%s163_s21] sm:$0x1] %v1102_v13 }
 0x163 PF: > { %s13_s12 = sadd.s32 1, %s1575_s12  }
 0x164   : > { %p10_p4 = scmp.ge.s32.totalorder %s13_s12, 6  }
 0x166   :  { %12 = sbr.rel (!%p10_p4) target bundleno = 1 (0x1), region = 65 }

// kernel: gan_model_losses.25
= control target key start
LH: loop header
LB: loop body
LE: loop exit
PB: predicated region body
PF: predicated region fallthrough
CT: control target
= control target key end

     0   :  { %s447_s12 = smov 0   ;;  %s486_s0 = inlined_call_operand.vmem [shape: bf16[4,1,16,27], index: 0, kind: input, shape index: {}]   ;;  %s487_s1 = inlined_call_operand.vmem [shape: bf16[1,27,64], index: 1, kind: input, shape index: {}]   ;;  %s488_s2 = inlined_call_operand.vmem [shape: f32[8,64], index: 2, kind: input, shape index: {}]   ;;  %s489_s3 = inlined_call_operand.vmem [shape: bf16[4,16,64], index: 3, kind: output, shape index: {}]  }
   0x1 LB: > { %s367_s13 = sadd.s32 4294967295, %s422_s12   ;;  %p371_p0 = scmp.ge.s32.totalorder %s422_s12, 1  ;;  %s422_s12 = sphi %s447_s12, %s13_s12  }
   0x2   : > { %p137_p1 = scmp.lt.s32.totalorder %s422_s12, 5 }
   0x4   : > { %p138_p2 = pnand %p371_p0, %p137_p1 }
   0x5   : > { %v411_v0 = vld [vmem:[%s487_s1] sm:$0xff] (!%p138_p2)   ;;  %v424_v1 = vmov (!%p138_p2), 0.0   ;;  %v412_v2 = vld [vmem:[%s487_s1 + $0x8] sm:$0x3f] (!%p138_p2)   ;;  %vm203_vm0 = vcmask (!%p138_p2), 1044480   ;;  %vm204_vm1 = vcmask (!%p138_p2), 1045504   ;;  %v289_v44 = vlaneseq (!%p138_p2) }
   0x6   : > { %141 = sbr.rel (%p138_p2) target bundleno = 283 (0x11b), region = 32  ;;  %392 = vmatprep.subr.bf16.mxu0 (!%p138_p2), %v424_v1  ;;  %p161_p3 = scmp.lt.s32.totalorder (!%p138_p2), %s367_s13, 3  ;;  %v425_v3 = vmov (!%p138_p2), 65535   ;;  %vm426_vm2 = vmmov (!%p138_p2), 0   ;;  %vm199_vm3 = vcmask (!%p138_p2), 220160   ;;  %vm257_vm5 = vcmask (!%p138_p2), 523264  }
   0x7   : > { %393 = vmatpush3.bf16.msra.mxu0 (!%p138_p2), %v411_v0  ;;  %v205_v4 = vsel (!%p138_p2), %vm203_vm0, 4294967295, %v425_v3  ;;  %396 = vmatprep.mubr.msk.bf16.mxu0 (!%p138_p2), %vm426_vm2, %v424_v1  ;;  %v376_v8 = vld [vmem:[%s488_s2] ss:$0 sm:$0xff] (!%p138_p2)  ;;  %v290_v45 = vshrl.u32 (!%p138_p2), %v289_v44, 7  ;;  %v284_v46 = vld [vmem:[%s488_s2 + $0x1] sm:$0x1] (!%p138_p2) }
   0x8   : > { %394 = vmatprep.subr.bf16.mxu0 (!%p138_p2), %v424_v1  ;;  %v206_v5 = vsel (!%p138_p2), %vm204_vm1, %v205_v4, 0  ;;  %v286_v50 = vld [vmem:[%s488_s2 + $0x2] sm:$0x1] (!%p138_p2)  ;;  %vm309_vm7 = vcmask (!%p138_p2), 519168  }
   0x9   : > { %v208_v6 = vand.u32 (!%p138_p2), %v412_v2, %v206_v5  ;;  %v291_v47 = vsub.s32 (!%p138_p2), 0, %v290_v45 }
   0xb   : > { %395 = vmatpush3.bf16.msra.mxu0 (!%p138_p2), %v208_v6 }
   0xd   : > { %s491_s13 = smov (!%p161_p3, %s367_s13), 3 }
   0xe   : > { %s385_s18 = sshll.u32 %s491_s13, 3 }
   0xf   : > { %s165_s21 = scalar_lea.vmem %s486_s0, %s385_s18  ;;  %s170_s30 = scalar_lea.vmem %s489_s3, %s385_s18 }
  0x10   : > { %v413_v7 = vld [vmem:[%s165_s21] sm:$0xff]  }
  0x11   : > { %397 = vmatmul.mubr.msk.bf16.vlgmr.msra.gmra.mrb[0].mxu0 %vm199_vm3, %v413_v7 }
  0xe4   : > { %v244_v9 = vpop.f32.mrb[0].mxu0 }
  0xe5   : > { %v245_v10 = vadd.f32 %v376_v8, %v244_v9  ;;  %v398_v11 = vpop.f32.mrb[1].mxu0 }
  0xe6   : > { %v247_v12 = vpop.f32.mrb[2].mxu0 }
  0xe7   : > { %vm251_vm4 = vcmp.ge.f32.partialorder %v245_v10, 0.0  ;;  %v253_v13 = vmul.f32 0.2, %v245_v10  ;;  %v248_v14 = vadd.f32 %v376_v8, %v247_v12  ;;  %v399_v15 = vpop.f32.mrb[3].mxu0 }
  0xe9   : > { %v255_v16 = vsel %vm251_vm4, %v245_v10, %v253_v13  ;;  %vm252_vm6 = vcmp.ge.f32.partialorder %v248_v14, 0.0  ;;  %v254_v17 = vmul.f32 0.2, %v248_v14 }
  0xea   : > { %v268_v18 = vmul.f32 %v255_v16, %v255_v16  ;;  %v258_v20 = vsel %vm257_vm5, %v255_v16, 0.0 }
  0xeb   : > { %v256_v19 = vsel %vm252_vm6, %v248_v14, %v254_v17 }
  0xec   : > { %v259_v21 = vsel %vm257_vm5, %v256_v19, 0.0  ;;  %v269_v22 = vmul.f32 %v256_v19, %v256_v19  ;;  %v270_v24 = vsel %vm257_vm5, %v268_v18, 0.0 }
  0xed   : > { %v260_v23 = vadd.f32 %v259_v21, %v258_v20 }
  0xee   : > { %v271_v25 = vsel %vm257_vm5, %v269_v22, 0.0 }
  0xef   : > { %v261_v26 = vrot.slane %v260_v23, 4  ;;  %v272_v27 = vadd.f32 %v271_v25, %v270_v24 }
  0xf1   : > { %v262_v28 = vadd.f32 %v261_v26, %v260_v23  ;;  %v273_v29 = vrot.slane %v272_v27, 4 }
  0xf3   : > { %v263_v30 = vrot.slane %v262_v28, 2  ;;  %v274_v31 = vadd.f32 %v273_v29, %v272_v27 }
  0xf5   : > { %v264_v32 = vadd.f32 %v263_v30, %v262_v28  ;;  %v275_v33 = vrot.slane %v274_v31, 2 }
  0xf7   : > { %v265_v34 = vrot.slane %v264_v32, 1  ;;  %v276_v35 = vadd.f32 %v275_v33, %v274_v31 }
  0xf9   : > { %v266_v36 = vadd.f32 %v265_v34, %v264_v32  ;;  %v277_v37 = vrot.slane %v276_v35, 1 }
  0xfb   : > { %v267_v38 = vmul.f32 0.0625, %v266_v36  ;;  %v278_v39 = vadd.f32 %v277_v37, %v276_v35 }
  0xfd   : > { %v279_v40 = vmul.f32 0.0625, %v278_v39  ;;  %v280_v41 = vmul.f32 %v267_v38, %v267_v38 }
  0xff   : > { %v281_v42 = vsub.f32 %v279_v40, %v280_v41 }
 0x101   : > { %v282_v43 = vadd.f32 1e-05, %v281_v42 }
 0x103   : > { %414 = vrsqrt.f32 %v282_v43 }
 0x10d   : > { %v415_v48 = vpop.eup %414 }
 0x10e   : > { %v285_v49 = vmul.f32 %v415_v48, %v284_v46 }
 0x110   : > { %v287_v51 = vmul.f32 %v285_v49, %v267_v38  ;;  %v292_v52 = vrot.slane %v285_v49, %v291_v47 }
 0x112   : > { %v288_v53 = vsub.f32 %v286_v50, %v287_v51  ;;  %v293_v54 = vmul.f32 %v292_v52, %v255_v16  ;;  %v294_v55 = vmul.f32 %v292_v52, %v256_v19 }
 0x114   : > { %v298_v56 = vrot.slane %v288_v53, %v291_v47 }
 0x116   : > { %v299_v57 = vadd.f32 %v298_v56, %v293_v54  ;;  %v300_v58 = vadd.f32 %v298_v56, %v294_v55 }
 0x118   : > { %v387_v59 = vpack.c.bf16 %v299_v57, %v299_v57  ;;  %v388_v60 = vpack.c.bf16 %v300_v58, %v300_v58 }
 0x11a   : > { %310 = vst.msk [vmem:[%s170_s30] sm:$0xf] %vm309_vm7, %v387_v59  ;;  %311 = vst.msk [vmem:[%s170_s30 + $0x4] sm:$0xf] %vm309_vm7, %v388_v60 }
 0x11b PF: > { %s13_s12 = sadd.s32 1, %s422_s12  }
 0x11c   : > { %p10_p4 = scmp.ge.s32.totalorder %s13_s12, 6  }
 0x11e   :  { %12 = sbr.rel (!%p10_p4) target bundleno = 1 (0x1), region = 62 }

// kernel: gan_model_losses.26
= control target key start
LH: loop header
LB: loop body
LE: loop exit
PB: predicated region body
PF: predicated region fallthrough
CT: control target
= control target key end

     0   :  { %s904_s12 = smov 0   ;;  %s1090_s0 = inlined_call_operand.vmem [shape: bf16[4,2,6,192], index: 0, kind: input, shape index: {}]   ;;  %s1091_s1 = inlined_call_operand.vmem [shape: bf16[3,192,128], index: 1, kind: input, shape index: {}]   ;;  %s1092_s2 = inlined_call_operand.vmem [shape: f32[8,128], index: 2, kind: input, shape index: {}]   ;;  %s1093_s3 = inlined_call_operand.vmem [shape: bf16[4,4,128], index: 3, kind: output, shape index: {}]  }
   0x1 LB: > { %s716_s13 = sadd.s32 4294967295, %s881_s12   ;;  %p720_p0 = scmp.ge.s32.totalorder %s881_s12, 1  ;;  %s881_s12 = sphi %s904_s12, %s13_s12  }
   0x2   : > { %p137_p1 = scmp.lt.s32.totalorder %s881_s12, 5 }
   0x4   : > { %p138_p2 = pnand %p720_p0, %p137_p1 }
   0x5   : > { %v831_v0 = vld [vmem:[%s1091_s1 + $0x60] sm:$0xff] (!%p138_p2)   ;;  %v883_v1 = vmov (!%p138_p2), 0   ;;  %v833_v3 = vld [vmem:[%s1091_s1 + $0x68] sm:$0xff] (!%p138_p2)   ;;  %v835_v5 = vld [vmem:[%s1091_s1 + $0x70] sm:$0xff] (!%p138_p2)   ;;  %p160_p3 = scmp.lt.s32.totalorder (!%p138_p2), %s716_s13, 3  ;;  %vm300_vm0 = vcmask (!%p138_p2), 523264  }
   0x6   : > { %141 = sbr.rel (%p138_p2) target bundleno = 366 (0x16e), region = 32  ;;  %304 = vmatprep.subr.bf16.mxu0 (!%p138_p2), %v883_v1  ;;  %425 = vmatprep.subr.bf16.mxu1 (!%p138_p2), %v883_v1  ;;  %v832_v2 = vld [vmem:[%s1091_s1] sm:$0xff] (!%p138_p2)   ;;  %v834_v4 = vld [vmem:[%s1091_s1 + $0x8] sm:$0xff] (!%p138_p2)   ;;  %v836_v6 = vld [vmem:[%s1091_s1 + $0x10] sm:$0xff] (!%p138_p2)   ;;  %vm624_vm2 = vcmask (!%p138_p2), 1043456  }
   0x7   : > { %305 = vmatpush1.bf16.msra.mxu0 (!%p138_p2), %v831_v0  ;;  %426 = vmatpush1.bf16.msra.mxu1 (!%p138_p2), %v832_v2  ;;  %v837_v7 = vld [vmem:[%s1091_s1 + $0x78] sm:$0xff] (!%p138_p2)   ;;  %v839_v9 = vld [vmem:[%s1091_s1 + $0x80] sm:$0xff] (!%p138_p2)   ;;  %v841_v11 = vld [vmem:[%s1091_s1 + $0x88] sm:$0xff] (!%p138_p2)  }
   0x8   : > { %306 = vmatprep.subr.bf16.mxu0 (!%p138_p2), %v883_v1  ;;  %427 = vmatprep.subr.bf16.mxu1 (!%p138_p2), %v883_v1  ;;  %v838_v8 = vld [vmem:[%s1091_s1 + $0x18] sm:$0xff] (!%p138_p2)   ;;  %v840_v10 = vld [vmem:[%s1091_s1 + $0x20] sm:$0xff] (!%p138_p2)   ;;  %v842_v12 = vld [vmem:[%s1091_s1 + $0x28] sm:$0xff] (!%p138_p2)  }
   0x9   : > { %v843_v13 = vld [vmem:[%s1091_s1 + $0x90] sm:$0xff] (!%p138_p2)   ;;  %v845_v19 = vld [vmem:[%s1091_s1 + $0x98] sm:$0xff] (!%p138_p2)   ;;  %v847_v21 = vld [vmem:[%s1091_s1 + $0xa0] sm:$0xff] (!%p138_p2)  }
   0xa   : > { %v844_v14 = vld [vmem:[%s1091_s1 + $0x30] sm:$0xff] (!%p138_p2)   ;;  %v846_v20 = vld [vmem:[%s1091_s1 + $0x38] sm:$0xff] (!%p138_p2)   ;;  %v848_v22 = vld [vmem:[%s1091_s1 + $0x40] sm:$0xff] (!%p138_p2)  }
   0xb   : > { %307 = vmatpush1.bf16.msra.mxu0 (!%p138_p2), %v833_v3  ;;  %428 = vmatpush1.bf16.msra.mxu1 (!%p138_p2), %v834_v4  ;;  %v849_v23 = vld [vmem:[%s1091_s1 + $0xa8] sm:$0xff] (!%p138_p2)   ;;  %v851_v25 = vld [vmem:[%s1091_s1 + $0xb0] sm:$0xff] (!%p138_p2)   ;;  %v853_v28 = vld [vmem:[%s1091_s1 + $0xb8] sm:$0xff] (!%p138_p2)  }
   0xc   : > { %308 = vmatprep.subr.bf16.mxu0 (!%p138_p2), %v883_v1  ;;  %429 = vmatprep.subr.bf16.mxu1 (!%p138_p2), %v883_v1  ;;  %v850_v24 = vld [vmem:[%s1091_s1 + $0x48] sm:$0xff] (!%p138_p2)   ;;  %v852_v26 = vld [vmem:[%s1091_s1 + $0x50] sm:$0xff] (!%p138_p2)   ;;  %v854_v29 = vld [vmem:[%s1091_s1 + $0x58] sm:$0xff] (!%p138_p2)  }
   0xd   : > { %s1095_s13 = smov (!%p160_p3, %s716_s13), 3  ;;  %v859_v33 = vld [vmem:[%s1091_s1 + $0xc0] sm:$0xff]   ;;  %v860_v35 = vld [vmem:[%s1091_s1 + $0xc8] sm:$0xff]   ;;  %v861_v36 = vld [vmem:[%s1091_s1 + $0xd0] sm:$0xff]  }
   0xe   : > { %s821_s9 = sshll.u32 %s1095_s13, 4  ;;  %v862_v37 = vld [vmem:[%s1091_s1 + $0xd8] sm:$0xff]   ;;  %v863_v38 = vld [vmem:[%s1091_s1 + $0xe0] sm:$0xff]   ;;  %v864_v39 = vld [vmem:[%s1091_s1 + $0xe8] sm:$0xff]   ;;  %s723_s21 = sshll.u32 %s1095_s13, 1 }
   0xf   : > { %309 = vmatpush1.bf16.msra.mxu0 %v835_v5  ;;  %430 = vmatpush1.bf16.msra.mxu1 %v836_v6  ;;  %s970_s16 = scalar_lea.vmem %s1090_s0, %s821_s9  ;;  %v865_v40 = vld [vmem:[%s1091_s1 + $0xf0] sm:$0xff]   ;;  %v866_v41 = vld [vmem:[%s1091_s1 + $0xf8] sm:$0xff]   ;;  %v867_v42 = vld [vmem:[%s1091_s1 + $0x100] sm:$0xff]   ;;  %s168_s24 = scalar_lea.vmem %s1093_s3, %s723_s21 }
  0x10   : > { %310 = vmatprep.subr.bf16.mxu0 %v883_v1  ;;  %431 = vmatprep.subr.bf16.mxu1 %v883_v1  ;;  %v724_v15 = vld [vmem:[%s970_s16 + $0x8] sm:$0x33]  ;;  %v170_v16 = vld [vmem:[%s970_s16] sm:$0x33]  ;;  %v869_v44 = vld [vmem:[%s1091_s1 + $0x110] sm:$0xff]  }
  0x11   : > { %v750_v17 = vcombine.high %v724_v15, %v724_v15  ;;  %v765_v18 = vcombine.high %v170_v16, %v170_v16  ;;  %v465_v27 = vld [vmem:[%s970_s16] sm:$0x66]  ;;  %v749_v31 = vcombine.low %v724_v15, %v724_v15  ;;  %v764_v32 = vcombine.low %v170_v16, %v170_v16  ;;  %v868_v43 = vld [vmem:[%s1091_s1 + $0x108] sm:$0xff]   ;;  %v870_v46 = vld [vmem:[%s1091_s1 + $0x118] sm:$0xff]  }
  0x12   : > { %v804_v30 = vcombine.high %v465_v27, %v465_v27  ;;  %v803_v45 = vcombine.low %v465_v27, %v465_v27  ;;  %v818_v58 = vld [vmem:[%s1092_s2] ss:$0 sm:$0xff] }
  0x13   : > { %311 = vmatpush1.bf16.msra.mxu0 %v837_v7  ;;  %432 = vmatpush1.bf16.msra.mxu1 %v838_v8 }
  0x14   : > { %312 = vmatprep.subr.bf16.mxu0 %v883_v1  ;;  %433 = vmatprep.subr.bf16.mxu1 %v883_v1  ;;  %v497_v34 = vrot.slane %v804_v30, 1  ;;  %v496_v47 = vrot.slane %v803_v45, 1 }
  0x15   : > { %763 = vmatprep.mubr.msk.bf16.mxu0 %vm300_vm0, %v750_v17  ;;  %778 = vmatprep.mubr.msk.bf16.mxu1 %vm300_vm0, %v765_v18 }
  0x17   : > { %313 = vmatpush1.bf16.msra.mxu0 %v839_v9  ;;  %434 = vmatpush1.bf16.msra.mxu1 %v840_v10 }
  0x18   : > { %314 = vmatprep.subr.bf16.mxu0 %v883_v1  ;;  %435 = vmatprep.subr.bf16.mxu1 %v883_v1 }
  0x1b   : > { %315 = vmatpush1.bf16.msra.mxu0 %v841_v11  ;;  %436 = vmatpush1.bf16.msra.mxu1 %v842_v12 }
  0x1c   : > { %316 = vmatprep.subr.bf16.mxu0 %v883_v1  ;;  %437 = vmatprep.subr.bf16.mxu1 %v883_v1 }
  0x1f   : > { %317 = vmatpush1.bf16.msra.mxu0 %v843_v13  ;;  %438 = vmatpush1.bf16.msra.mxu1 %v844_v14 }
  0x20   : > { %318 = vmatprep.subr.bf16.mxu0 %v883_v1  ;;  %439 = vmatprep.subr.bf16.mxu1 %v883_v1 }
  0x23   : > { %319 = vmatpush1.bf16.msra.mxu0 %v845_v19  ;;  %440 = vmatpush1.bf16.msra.mxu1 %v846_v20 }
  0x24   : > { %320 = vmatprep.subr.bf16.mxu0 %v883_v1  ;;  %441 = vmatprep.subr.bf16.mxu1 %v883_v1 }
  0x27   : > { %321 = vmatpush1.bf16.msra.mxu0 %v847_v21  ;;  %442 = vmatpush1.bf16.msra.mxu1 %v848_v22  ;;  %v651_v22 = vlaneseq }
  0x28   : > { %322 = vmatprep.subr.bf16.mxu0 %v883_v1  ;;  %443 = vmatprep.subr.bf16.mxu1 %v883_v1 }
  0x2b   : > { %323 = vmatpush1.bf16.msra.mxu0 %v849_v23  ;;  %444 = vmatpush1.bf16.msra.mxu1 %v850_v24  ;;  %v652_v23 = vshrl.u32 %v651_v22, 7  ;;  %v646_v24 = vld [vmem:[%s1092_s2 + $0x1] sm:$0x1] }
  0x2c   : > { %324 = vmatprep.subr.bf16.mxu0 %v883_v1  ;;  %445 = vmatprep.subr.bf16.mxu1 %v883_v1 }
  0x2f   : > { %325 = vmatpush1.bf16.msra.mxu0 %v851_v25  ;;  %446 = vmatpush1.bf16.msra.mxu1 %v852_v26  ;;  %v653_v25 = vsub.s32 0, %v652_v23 }
  0x30   : > { %326 = vmatprep.subr.bf16.mxu0 %v883_v1  ;;  %447 = vmatprep.subr.bf16.mxu1 %v883_v1 }
  0x33   : > { %327 = vmatpush1.bf16.msra.mxu0 %v853_v28  ;;  %448 = vmatpush1.bf16.msra.mxu1 %v854_v29  ;;  %v648_v28 = vld [vmem:[%s1092_s2 + $0x2] sm:$0x1] }
  0x34   : > { %574 = vmatprep.subr.bf16.mxu0 %v883_v1 }
  0x36   : > { %337 = vmatmul.mubr.bf16.vlgmr.msra.gmra.mrb[0].mxu0 %v749_v31  ;;  %458 = vmatmul.mubr.bf16.vlgmr.msra.gmra.mrb[0].mxu1 %v764_v32 }
  0x37   : > { %575 = vmatpush1.bf16.msra.mxu0 %v859_v33  ;;  %817 = vmatprep.mubr.msk.bf16.mxu0 %vm300_vm0, %v497_v34 }
  0x38   : > { %576 = vmatprep.subr.bf16.mxu0 %v883_v1 }
  0x3b   : > { %577 = vmatpush1.bf16.msra.mxu0 %v860_v35 }
  0x3c   : > { %578 = vmatprep.subr.bf16.mxu0 %v883_v1 }
  0x3f   : > { %579 = vmatpush1.bf16.msra.mxu0 %v861_v36 }
  0x40   : > { %580 = vmatprep.subr.bf16.mxu0 %v883_v1 }
  0x43   : > { %581 = vmatpush1.bf16.msra.mxu0 %v862_v37 }
  0x44   : > { %582 = vmatprep.subr.bf16.mxu0 %v883_v1 }
  0x47   : > { %583 = vmatpush1.bf16.msra.mxu0 %v863_v38 }
  0x48   : > { %584 = vmatprep.subr.bf16.mxu0 %v883_v1 }
  0x4b   : > { %585 = vmatpush1.bf16.msra.mxu0 %v864_v39 }
  0x4c   : > { %586 = vmatprep.subr.bf16.mxu0 %v883_v1 }
  0x4f   : > { %587 = vmatpush1.bf16.msra.mxu0 %v865_v40 }
  0x50   : > { %588 = vmatprep.subr.bf16.mxu0 %v883_v1 }
  0x53   : > { %589 = vmatpush1.bf16.msra.mxu0 %v866_v41 }
  0x54   : > { %590 = vmatprep.subr.bf16.mxu0 %v883_v1 }
  0x57   : > { %591 = vmatpush1.bf16.msra.mxu0 %v867_v42 }
  0x58   : > { %592 = vmatprep.subr.bf16.mxu0 %v883_v1 }
  0x5b   : > { %593 = vmatpush1.bf16.msra.mxu0 %v868_v43 }
  0x5c   : > { %594 = vmatprep.subr.bf16.mxu0 %v883_v1 }
  0x5f   : > { %595 = vmatpush1.bf16.msra.mxu0 %v869_v44 }
  0x60   : > { %596 = vmatprep.subr.bf16.mxu0 %v883_v1 }
  0x63   : > { %597 = vmatpush1.bf16.msra.mxu0 %v870_v46 }
  0x66   : > { %607 = vmatmul.mubr.bf16.vlgmr.msra.gmra.mrb[4].mxu0 %v496_v47 }
 0x109   : > { %v338_v48 = vpop.f32.mrb[0].mxu0  ;;  %v459_v50 = vpop.f32.mrb[0].mxu1 }
 0x10a   : > { %v340_v49 = vpop.f32.mrb[1].mxu0  ;;  %v460_v51 = vadd.f32 %v459_v50, %v338_v48  ;;  %v461_v53 = vpop.f32.mrb[1].mxu1 }
 0x10b   : > { %v341_v52 = vpop.f32.mrb[2].mxu0  ;;  %v462_v55 = vpop.f32.mrb[2].mxu1 }
 0x10c   : > { %v342_v54 = vpop.f32.mrb[3].mxu0  ;;  %v463_v56 = vpop.f32.mrb[3].mxu1 }
 0x139   : > { %v608_v57 = vpop.f32.mrb[4].mxu0 }
 0x13a   : > { %v614_v59 = vadd.f32 %v608_v57, %v460_v51  ;;  %v610_v60 = vpop.f32.mrb[5].mxu0 }
 0x13b   : > { %v611_v61 = vpop.f32.mrb[6].mxu0 }
 0x13c   : > { %v620_v62 = vadd.f32 %v818_v58, %v614_v59  ;;  %v612_v63 = vpop.f32.mrb[7].mxu0 }
 0x13e   : > { %vm621_vm1 = vcmp.ge.f32.partialorder %v620_v62, 0.0  ;;  %v622_v0 = vmul.f32 0.2, %v620_v62 }
 0x140   : > { %v623_v1 = vsel %vm621_vm1, %v620_v62, %v622_v0 }
 0x141   : > { %v625_v2 = vsel %vm624_vm2, %v623_v1, 0.0  ;;  %v633_v3 = vmul.f32 %v623_v1, %v623_v1 }
 0x142   : > { %v626_v4 = vrot.slane %v625_v2, 4 }
 0x143   : > { %v634_v5 = vsel %vm624_vm2, %v633_v3, 0.0 }
 0x144   : > { %v627_v6 = vadd.f32 %v626_v4, %v625_v2  ;;  %v635_v7 = vrot.slane %v634_v5, 4 }
 0x146   : > { %v628_v8 = vrot.slane %v627_v6, 2  ;;  %v636_v9 = vadd.f32 %v635_v7, %v634_v5 }
 0x148   : > { %v629_v10 = vadd.f32 %v628_v8, %v627_v6  ;;  %v637_v11 = vrot.slane %v636_v9, 2 }
 0x14a   : > { %v630_v12 = vrot.slane %v629_v10, 1  ;;  %v638_v13 = vadd.f32 %v637_v11, %v636_v9 }
 0x14c   : > { %v631_v14 = vadd.f32 %v630_v12, %v629_v10  ;;  %v639_v15 = vrot.slane %v638_v13, 1 }
 0x14e   : > { %v632_v16 = vmul.f32 0.25, %v631_v14  ;;  %v640_v17 = vadd.f32 %v639_v15, %v638_v13 }
 0x150   : > { %v641_v18 = vmul.f32 0.25, %v640_v17  ;;  %v642_v19 = vmul.f32 %v632_v16, %v632_v16 }
 0x152   : > { %v643_v20 = vsub.f32 %v641_v18, %v642_v19 }
 0x154   : > { %v644_v21 = vadd.f32 1e-05, %v643_v20 }
 0x156   : > { %873 = vrsqrt.f32 %v644_v21 }
 0x160   : > { %v874_v26 = vpop.eup %873 }
 0x161   : > { %v647_v27 = vmul.f32 %v874_v26, %v646_v24 }
 0x163   : > { %v649_v29 = vmul.f32 %v647_v27, %v632_v16  ;;  %v654_v30 = vrot.slane %v647_v27, %v653_v25 }
 0x165   : > { %v650_v31 = vsub.f32 %v648_v28, %v649_v29  ;;  %v655_v32 = vmul.f32 %v654_v30, %v623_v1 }
 0x167   : > { %v659_v33 = vrot.slane %v650_v31, %v653_v25 }
 0x169   : > { %v660_v34 = vadd.f32 %v659_v33, %v655_v32 }
 0x16b   : > { %v661_v35 = vpack.c.bf16 %v660_v34, %v660_v34 }
 0x16d   : > { %662 = vst [vmem:[%s168_s24] sm:$0x3] %v661_v35 }
 0x16e PF: > { %s13_s12 = sadd.s32 1, %s881_s12  }
 0x16f   : > { %p10_p4 = scmp.ge.s32.totalorder %s13_s12, 6  }
 0x171   :  { %12 = sbr.rel (!%p10_p4) target bundleno = 1 (0x1), region = 65 }

// kernel: gan_model_losses.19
= control target key start
LH: loop header
LB: loop body
LE: loop exit
PB: predicated region body
PF: predicated region fallthrough
CT: control target
= control target key end

     0   :  { %s619_s12 = smov 0   ;;  %s713_s0 = inlined_call_operand.vmem [shape: bf16[4,1,64,27], index: 0, kind: input, shape index: {}]   ;;  %s714_s1 = inlined_call_operand.vmem [shape: bf16[1,27,64], index: 1, kind: input, shape index: {}]   ;;  %s715_s2 = inlined_call_operand.vmem [shape: f32[8,64], index: 2, kind: input, shape index: {}]   ;;  %s716_s3 = inlined_call_operand.vmem [shape: bf16[4,64,64], index: 3, kind: output, shape index: {}]  }
   0x1 LB: > { %s511_s13 = sadd.s32 4294967295, %s596_s12   ;;  %p515_p0 = scmp.ge.s32.totalorder %s596_s12, 1  ;;  %s596_s12 = sphi %s619_s12, %s13_s12  }
   0x2   : > { %p137_p1 = scmp.lt.s32.totalorder %s596_s12, 5 }
   0x4   : > { %p138_p2 = pnand %p515_p0, %p137_p1 }
   0x5   : > { %v582_v0 = vld [vmem:[%s714_s1] sm:$0xff] (!%p138_p2)   ;;  %vm233_vm0 = vcmask (!%p138_p2), 1044480   ;;  %v583_v1 = vld [vmem:[%s714_s1 + $0x8] sm:$0x3f] (!%p138_p2)   ;;  %vm234_vm1 = vcmask (!%p138_p2), 1045504   ;;  %p161_p3 = scmp.lt.s32.totalorder (!%p138_p2), %s511_s13, 3 }
   0x6   : > { %141 = sbr.rel (%p138_p2) target bundleno = 300 (0x12c), region = 32  ;;  %557 = vmatprep.subr.bf16.mxu0 (!%p138_p2), %v582_v0  ;;  %569 = vmatprep.subr.bf16.mxu1 (!%p138_p2), %v582_v0  ;;  %v598_v2 = vmov (!%p138_p2), 65535   ;;  %vm220_vm2 = vcmask (!%p138_p2), 220160   ;;  %v520_v10 = vld [vmem:[%s715_s2] ss:$0 sm:$0xff] (!%p138_p2)  ;;  %vm329_vm7 = vcmask (!%p138_p2), 523264  }
   0x7   : > { %558 = vmatpush3.bf16.msra.mxu0 (!%p138_p2), %v582_v0  ;;  %571 = vmatpush3.bf16.msra.mxu1 (!%p138_p2), %v582_v0  ;;  %v235_v3 = vsel (!%p138_p2), %vm233_vm0, 4294967295, %v598_v2  ;;  %vm447_vm12 = vcmask (!%p138_p2), 519168  }
   0x8   : > { %v236_v4 = vsel (!%p138_p2), %vm234_vm1, %v235_v3, 0 }
   0x9   : > { %v238_v5 = vand.u32 (!%p138_p2), %v583_v1, %v236_v4 }
   0xb   : > { %559 = vmatprep.subr.bf16.mxu0 (!%p138_p2), %v238_v5  ;;  %570 = vmatprep.subr.bf16.mxu1 (!%p138_p2), %v238_v5 }
   0xc   : > { %560 = vmatpush3.bf16.msra.mxu0 (!%p138_p2), %v238_v5  ;;  %572 = vmatpush3.bf16.msra.mxu1 (!%p138_p2), %v238_v5 }
   0xd   : > { %s718_s13 = smov (!%p161_p3, %s511_s13), 3 }
   0xe   : > { %s541_s18 = sshll.u32 %s718_s13, 5 }
   0xf   : > { %s165_s21 = scalar_lea.vmem %s713_s0, %s541_s18  ;;  %s170_s30 = scalar_lea.vmem %s716_s3, %s541_s18 }
  0x10   : > { %v584_v6 = vld [vmem:[%s165_s21] sm:$0xff]   ;;  %v585_v7 = vld [vmem:[%s165_s21 + $0x8] sm:$0xff]   ;;  %v586_v8 = vld [vmem:[%s165_s21 + $0x10] sm:$0xff]  }
  0x11   : > { %561 = vmatprep.mubr.msk.bf16.mxu0 %vm220_vm2, %v584_v6  ;;  %v587_v9 = vld [vmem:[%s165_s21 + $0x18] sm:$0xff]   ;;  %565 = vmatprep.mubr.msk.bf16.mxu1 %vm220_vm2, %v586_v8 }
  0x12   : > { %562 = vmatmul.mubr.msk.bf16.vlgmr.msra.gmra.mrb[0].mxu0 %vm220_vm2, %v585_v7  ;;  %566 = vmatmul.mubr.msk.bf16.vlgmr.msra.gmra.mrb[0].mxu1 %vm220_vm2, %v587_v9 }
  0xe5   : > { %v563_v11 = vpop.f32.mrb[0].mxu0  ;;  %v567_v16 = vpop.f32.mrb[0].mxu1 }
  0xe6   : > { %v283_v12 = vadd.f32 %v563_v11, %v520_v10  ;;  %v274_v13 = vpop.f32.mrb[1].mxu0  ;;  %v290_v20 = vpop.f32.mrb[1].mxu1  ;;  %v299_v29 = vadd.f32 %v567_v16, %v520_v10 }
  0xe7   : > { %v275_v14 = vadd.f32 %v520_v10, %v274_v13  ;;  %v564_v15 = vpop.f32.mrb[2].mxu0  ;;  %v568_v23 = vpop.f32.mrb[2].mxu1  ;;  %v291_v25 = vadd.f32 %v520_v10, %v290_v20 }
  0xe8   : > { %vm307_vm3 = vcmp.ge.f32.partialorder %v283_v12, 0.0  ;;  %v315_v17 = vmul.f32 0.2, %v283_v12  ;;  %v286_v18 = vadd.f32 %v564_v15, %v520_v10  ;;  %v277_v19 = vpop.f32.mrb[3].mxu0  ;;  %v293_v26 = vpop.f32.mrb[3].mxu1  ;;  %vm311_vm9 = vcmp.ge.f32.partialorder %v299_v29, 0.0 }
  0xe9   : > { %vm305_vm4 = vcmp.ge.f32.partialorder %v275_v14, 0.0  ;;  %v313_v21 = vmul.f32 0.2, %v275_v14  ;;  %v278_v22 = vadd.f32 %v520_v10, %v277_v19  ;;  %vm309_vm8 = vcmp.ge.f32.partialorder %v291_v25, 0.0 }
  0xea   : > { %vm308_vm5 = vcmp.ge.f32.partialorder %v286_v18, 0.0  ;;  %v316_v24 = vmul.f32 0.2, %v286_v18  ;;  %v644_v27 = vsel %vm307_vm3, %v283_v12, %v315_v17  ;;  %v317_v35 = vmul.f32 0.2, %v291_v25 }
  0xeb   : > { %v646_v28 = vsel %vm305_vm4, %v275_v14, %v313_v21  ;;  %vm306_vm6 = vcmp.ge.f32.partialorder %v278_v22, 0.0  ;;  %v314_v30 = vmul.f32 0.2, %v278_v22  ;;  %v354_v33 = vmul.f32 %v644_v27, %v644_v27 }
  0xec   : > { %v352_v31 = vmul.f32 %v646_v28, %v646_v28  ;;  %v650_v32 = vsel %vm308_vm5, %v286_v18, %v316_v24  ;;  %v330_v36 = vsel %vm329_vm7, %v646_v28, 0.0  ;;  %v333_v39 = vsel %vm329_vm7, %v644_v27, 0.0 }
  0xed   : > { %v654_v34 = vsel %vm306_vm6, %v278_v22, %v314_v30  ;;  %v355_v40 = vmul.f32 %v650_v32, %v650_v32  ;;  %v666_v42 = vsel %vm309_vm8, %v291_v25, %v317_v35  ;;  %v319_v45 = vmul.f32 0.2, %v299_v29 }
  0xee   : > { %v331_v37 = vsel %vm329_vm7, %v654_v34, 0.0  ;;  %v353_v38 = vmul.f32 %v654_v34, %v654_v34  ;;  %v360_v43 = vsel %vm329_vm7, %v352_v31, 0.0  ;;  %v302_v46 = vadd.f32 %v568_v23, %v520_v10 }
  0xef   : > { %v332_v41 = vadd.f32 %v331_v37, %v330_v36  ;;  %v363_v47 = vsel %vm329_vm7, %v354_v33, 0.0  ;;  %v294_v50 = vadd.f32 %v520_v10, %v293_v26  ;;  %v335_v51 = vsel %vm329_vm7, %v650_v32, 0.0 }
  0xf0   : > { %v361_v44 = vsel %vm329_vm7, %v353_v38, 0.0  ;;  %v356_v52 = vmul.f32 %v666_v42, %v666_v42  ;;  %vm312_vm10 = vcmp.ge.f32.partialorder %v302_v46, 0.0  ;;  %v320_v53 = vmul.f32 0.2, %v302_v46 }
  0xf1   : > { %v334_v48 = vadd.f32 %v333_v39, %v332_v41  ;;  %v362_v49 = vadd.f32 %v361_v44, %v360_v43  ;;  %vm310_vm11 = vcmp.ge.f32.partialorder %v294_v50, 0.0  ;;  %v318_v56 = vmul.f32 0.2, %v294_v50 }
  0xf2   : > { %v365_v57 = vsel %vm329_vm7, %v355_v40, 0.0  ;;  %v327_v58 = vsel %vm311_vm9, %v299_v29, %v319_v45  ;;  %v337_v59 = vsel %vm329_vm7, %v666_v42, 0.0  ;;  %v367_v62 = vsel %vm329_vm7, %v356_v52, 0.0  ;;  %v386_v40 = vld [vmem:[%s715_s2 + $0x1] sm:$0x1] }
  0xf3   : > { %v364_v54 = vadd.f32 %v363_v47, %v362_v49  ;;  %v336_v55 = vadd.f32 %v335_v51, %v334_v48  ;;  %v328_v63 = vsel %vm312_vm10, %v302_v46, %v320_v53  ;;  %v326_v0 = vsel %vm310_vm11, %v294_v50, %v318_v56  ;;  %v388_v45 = vld [vmem:[%s715_s2 + $0x2] sm:$0x1] }
  0xf4   : > { %v358_v1 = vmul.f32 %v327_v58, %v327_v58  ;;  %v339_v3 = vsel %vm329_vm7, %v326_v0, 0.0  ;;  %v357_v4 = vmul.f32 %v326_v0, %v326_v0  ;;  %v341_v6 = vsel %vm329_vm7, %v327_v58, 0.0 }
  0xf5   : > { %v338_v60 = vadd.f32 %v337_v59, %v336_v55  ;;  %v366_v61 = vadd.f32 %v365_v57, %v364_v54  ;;  %v359_v7 = vmul.f32 %v328_v63, %v328_v63  ;;  %v343_v12 = vsel %vm329_vm7, %v328_v63, 0.0 }
  0xf6   : > { %v369_v8 = vsel %vm329_vm7, %v357_v4, 0.0  ;;  %v371_v11 = vsel %vm329_vm7, %v358_v1, 0.0  ;;  %v391_v38 = vlaneseq }
  0xf7   : > { %v368_v2 = vadd.f32 %v367_v62, %v366_v61  ;;  %v340_v5 = vadd.f32 %v339_v3, %v338_v60  ;;  %v373_v15 = vsel %vm329_vm7, %v359_v7, 0.0 }
  0xf8   : > { %v392_v39 = vshrl.u32 %v391_v38, 7 }
  0xf9   : > { %v342_v9 = vadd.f32 %v341_v6, %v340_v5  ;;  %v370_v10 = vadd.f32 %v369_v8, %v368_v2 }
  0xfa   : > { %v393_v41 = vsub.s32 0, %v392_v39 }
  0xfb   : > { %v344_v13 = vadd.f32 %v343_v12, %v342_v9  ;;  %v372_v14 = vadd.f32 %v371_v11, %v370_v10 }
  0xfd   : > { %v345_v16 = vrot.slane %v344_v13, 4  ;;  %v374_v17 = vadd.f32 %v373_v15, %v372_v14 }
  0xff   : > { %v346_v18 = vadd.f32 %v345_v16, %v344_v13  ;;  %v375_v19 = vrot.slane %v374_v17, 4 }
 0x101   : > { %v347_v20 = vrot.slane %v346_v18, 2  ;;  %v376_v21 = vadd.f32 %v375_v19, %v374_v17 }
 0x103   : > { %v348_v22 = vadd.f32 %v347_v20, %v346_v18  ;;  %v377_v23 = vrot.slane %v376_v21, 2 }
 0x105   : > { %v349_v24 = vrot.slane %v348_v22, 1  ;;  %v378_v25 = vadd.f32 %v377_v23, %v376_v21 }
 0x107   : > { %v350_v26 = vadd.f32 %v349_v24, %v348_v22  ;;  %v379_v29 = vrot.slane %v378_v25, 1 }
 0x109   : > { %v351_v30 = vmul.f32 0.015625, %v350_v26  ;;  %v380_v31 = vadd.f32 %v379_v29, %v378_v25 }
 0x10b   : > { %v381_v33 = vmul.f32 0.015625, %v380_v31  ;;  %v382_v35 = vmul.f32 %v351_v30, %v351_v30 }
 0x10d   : > { %v383_v36 = vsub.f32 %v381_v33, %v382_v35 }
 0x10f   : > { %v384_v37 = vadd.f32 1e-05, %v383_v36 }
 0x111   : > { %588 = vrsqrt.f32 %v384_v37 }
 0x11b   : > { %v589_v43 = vpop.eup %588 }
 0x11c   : > { %v387_v44 = vmul.f32 %v589_v43, %v386_v40 }
 0x11e   : > { %v389_v46 = vmul.f32 %v387_v44, %v351_v30  ;;  %v394_v47 = vrot.slane %v387_v44, %v393_v41 }
 0x120   : > { %v390_v48 = vsub.f32 %v388_v45, %v389_v46  ;;  %v395_v49 = vmul.f32 %v394_v47, %v646_v28  ;;  %v396_v50 = vmul.f32 %v394_v47, %v654_v34  ;;  %v397_v51 = vmul.f32 %v394_v47, %v644_v27 }
 0x121   : > { %v398_v52 = vmul.f32 %v394_v47, %v650_v32  ;;  %v399_v53 = vmul.f32 %v394_v47, %v666_v42  ;;  %v400_v54 = vmul.f32 %v394_v47, %v326_v0  ;;  %v401_v55 = vmul.f32 %v394_v47, %v327_v58 }
 0x122   : > { %v402_v56 = vmul.f32 %v394_v47, %v328_v63  ;;  %v406_v57 = vrot.slane %v390_v48, %v393_v41 }
 0x124   : > { %v407_v59 = vadd.f32 %v406_v57, %v395_v49  ;;  %v408_v60 = vadd.f32 %v406_v57, %v396_v50  ;;  %v409_v61 = vadd.f32 %v406_v57, %v397_v51  ;;  %v410_v62 = vadd.f32 %v406_v57, %v398_v52 }
 0x125   : > { %v411_v28 = vadd.f32 %v406_v57, %v399_v53  ;;  %v412_v27 = vadd.f32 %v406_v57, %v400_v54  ;;  %v413_v34 = vadd.f32 %v406_v57, %v401_v55  ;;  %v414_v32 = vadd.f32 %v406_v57, %v402_v56 }
 0x126   : > { %v543_v1 = vpack.c.bf16 %v407_v59, %v407_v59  ;;  %v544_v42 = vpack.c.bf16 %v408_v60, %v408_v60  ;;  %v545_v0 = vpack.c.bf16 %v409_v61, %v409_v61  ;;  %v546_v58 = vpack.c.bf16 %v410_v62, %v410_v62 }
 0x127   : > { %v547_v63 = vpack.c.bf16 %v411_v28, %v411_v28  ;;  %v548_v2 = vpack.c.bf16 %v412_v27, %v412_v27  ;;  %v549_v3 = vpack.c.bf16 %v413_v34, %v413_v34  ;;  %v550_v4 = vpack.c.bf16 %v414_v32, %v414_v32 }
 0x128   : > { %448 = vst.msk [vmem:[%s170_s30] sm:$0xf] %vm447_vm12, %v543_v1  ;;  %449 = vst.msk [vmem:[%s170_s30 + $0x4] sm:$0xf] %vm447_vm12, %v544_v42 }
 0x129   : > { %450 = vst.msk [vmem:[%s170_s30 + $0x8] sm:$0xf] %vm447_vm12, %v545_v0  ;;  %451 = vst.msk [vmem:[%s170_s30 + $0xc] sm:$0xf] %vm447_vm12, %v546_v58 }
 0x12a   : > { %452 = vst.msk [vmem:[%s170_s30 + $0x10] sm:$0xf] %vm447_vm12, %v547_v63  ;;  %453 = vst.msk [vmem:[%s170_s30 + $0x14] sm:$0xf] %vm447_vm12, %v548_v2 }
 0x12b   : > { %454 = vst.msk [vmem:[%s170_s30 + $0x18] sm:$0xf] %vm447_vm12, %v549_v3  ;;  %455 = vst.msk [vmem:[%s170_s30 + $0x1c] sm:$0xf] %vm447_vm12, %v550_v4 }
 0x12c PF: > { %s13_s12 = sadd.s32 1, %s596_s12  }
 0x12d   : > { %p10_p4 = scmp.ge.s32.totalorder %s13_s12, 6  }
 0x12f   :  { %12 = sbr.rel (!%p10_p4) target bundleno = 1 (0x1), region = 62 }

// kernel: gan_model_losses.20
= control target key start
LH: loop header
LB: loop body
LE: loop exit
PB: predicated region body
PF: predicated region fallthrough
CT: control target
= control target key end

     0   :  { %s965_s12 = smov 0   ;;  %s1162_s0 = inlined_call_operand.vmem [shape: bf16[4,2,20,192], index: 0, kind: input, shape index: {}]   ;;  %s1163_s1 = inlined_call_operand.vmem [shape: bf16[3,192,128], index: 1, kind: input, shape index: {}]   ;;  %s1164_s2 = inlined_call_operand.vmem [shape: f32[8,128], index: 2, kind: input, shape index: {}]   ;;  %s1165_s3 = inlined_call_operand.vmem [shape: bf16[4,16,128], index: 3, kind: output, shape index: {}]  }
   0x1 LB: > { %s761_s13 = sadd.s32 4294967295, %s942_s12   ;;  %p765_p0 = scmp.ge.s32.totalorder %s942_s12, 1  ;;  %s942_s12 = sphi %s965_s12, %s13_s12  }
   0x2   : > { %p137_p1 = scmp.lt.s32.totalorder %s942_s12, 5 }
   0x4   : > { %p138_p2 = pnand %p765_p0, %p137_p1 }
   0x5   : > { %v889_v0 = vld [vmem:[%s1163_s1 + $0x60] sm:$0xff] (!%p138_p2)   ;;  %v944_v1 = vmov (!%p138_p2), 0   ;;  %v891_v3 = vld [vmem:[%s1163_s1 + $0x68] sm:$0xff] (!%p138_p2)   ;;  %v893_v5 = vld [vmem:[%s1163_s1 + $0x70] sm:$0xff] (!%p138_p2)   ;;  %p161_p3 = scmp.lt.s32.totalorder (!%p138_p2), %s761_s13, 3  ;;  %vm307_vm0 = vcmask (!%p138_p2), 523264  }
   0x6   : > { %141 = sbr.rel (%p138_p2) target bundleno = 369 (0x171), region = 32  ;;  %311 = vmatprep.subr.bf16.mxu0 (!%p138_p2), %v944_v1  ;;  %436 = vmatprep.subr.bf16.mxu1 (!%p138_p2), %v944_v1  ;;  %v890_v2 = vld [vmem:[%s1163_s1] sm:$0xff] (!%p138_p2)   ;;  %v892_v4 = vld [vmem:[%s1163_s1 + $0x8] sm:$0xff] (!%p138_p2)   ;;  %v894_v6 = vld [vmem:[%s1163_s1 + $0x10] sm:$0xff] (!%p138_p2)   ;;  %vm518_vm1 = vcmask (!%p138_p2), 1045504  }
   0x7   : > { %312 = vmatpush1.bf16.msra.mxu0 (!%p138_p2), %v889_v0  ;;  %437 = vmatpush1.bf16.msra.mxu1 (!%p138_p2), %v890_v2  ;;  %v895_v7 = vld [vmem:[%s1163_s1 + $0x78] sm:$0xff] (!%p138_p2)   ;;  %v897_v9 = vld [vmem:[%s1163_s1 + $0x80] sm:$0xff] (!%p138_p2)   ;;  %v899_v11 = vld [vmem:[%s1163_s1 + $0x88] sm:$0xff] (!%p138_p2)  }
   0x8   : > { %313 = vmatprep.subr.bf16.mxu0 (!%p138_p2), %v944_v1  ;;  %438 = vmatprep.subr.bf16.mxu1 (!%p138_p2), %v944_v1  ;;  %v896_v8 = vld [vmem:[%s1163_s1 + $0x18] sm:$0xff] (!%p138_p2)   ;;  %v898_v10 = vld [vmem:[%s1163_s1 + $0x20] sm:$0xff] (!%p138_p2)   ;;  %v900_v12 = vld [vmem:[%s1163_s1 + $0x28] sm:$0xff] (!%p138_p2)  }
   0x9   : > { %v901_v13 = vld [vmem:[%s1163_s1 + $0x90] sm:$0xff] (!%p138_p2)   ;;  %v903_v18 = vld [vmem:[%s1163_s1 + $0x98] sm:$0xff] (!%p138_p2)   ;;  %v905_v21 = vld [vmem:[%s1163_s1 + $0xa0] sm:$0xff] (!%p138_p2)  }
   0xa   : > { %v902_v14 = vld [vmem:[%s1163_s1 + $0x30] sm:$0xff] (!%p138_p2)   ;;  %v904_v20 = vld [vmem:[%s1163_s1 + $0x38] sm:$0xff] (!%p138_p2)   ;;  %v906_v22 = vld [vmem:[%s1163_s1 + $0x40] sm:$0xff] (!%p138_p2)  }
   0xb   : > { %314 = vmatpush1.bf16.msra.mxu0 (!%p138_p2), %v891_v3  ;;  %439 = vmatpush1.bf16.msra.mxu1 (!%p138_p2), %v892_v4  ;;  %v907_v23 = vld [vmem:[%s1163_s1 + $0xa8] sm:$0xff] (!%p138_p2)   ;;  %v909_v25 = vld [vmem:[%s1163_s1 + $0xb0] sm:$0xff] (!%p138_p2)   ;;  %v911_v31 = vld [vmem:[%s1163_s1 + $0xb8] sm:$0xff] (!%p138_p2)  }
   0xc   : > { %315 = vmatprep.subr.bf16.mxu0 (!%p138_p2), %v944_v1  ;;  %440 = vmatprep.subr.bf16.mxu1 (!%p138_p2), %v944_v1  ;;  %v908_v24 = vld [vmem:[%s1163_s1 + $0x48] sm:$0xff] (!%p138_p2)   ;;  %v910_v28 = vld [vmem:[%s1163_s1 + $0x50] sm:$0xff] (!%p138_p2)   ;;  %v912_v32 = vld [vmem:[%s1163_s1 + $0x58] sm:$0xff] (!%p138_p2)  }
   0xd   : > { %s1167_s13 = smov (!%p161_p3, %s761_s13), 3  ;;  %v918_v37 = vld [vmem:[%s1163_s1 + $0xc0] sm:$0xff]   ;;  %v919_v39 = vld [vmem:[%s1163_s1 + $0xc8] sm:$0xff]   ;;  %v920_v40 = vld [vmem:[%s1163_s1 + $0xd0] sm:$0xff]  }
   0xe   : > { %s879_s9 = smul.u32 48, %s1167_s13  ;;  %v921_v41 = vld [vmem:[%s1163_s1 + $0xd8] sm:$0xff]   ;;  %v922_v42 = vld [vmem:[%s1163_s1 + $0xe0] sm:$0xff]   ;;  %v923_v43 = vld [vmem:[%s1163_s1 + $0xe8] sm:$0xff]   ;;  %s871_s21 = sshll.u32 %s1167_s13, 3 }
   0xf   : > { %316 = vmatpush1.bf16.msra.mxu0 %v893_v5  ;;  %441 = vmatpush1.bf16.msra.mxu1 %v894_v6  ;;  %v924_v44 = vld [vmem:[%s1163_s1 + $0xf0] sm:$0xff]   ;;  %v925_v45 = vld [vmem:[%s1163_s1 + $0xf8] sm:$0xff]   ;;  %v926_v46 = vld [vmem:[%s1163_s1 + $0x100] sm:$0xff]   ;;  %s170_s24 = scalar_lea.vmem %s1165_s3, %s871_s21 }
  0x10   : > { %317 = vmatprep.subr.bf16.mxu0 %v944_v1  ;;  %442 = vmatprep.subr.bf16.mxu1 %v944_v1  ;;  %s1034_s18 = scalar_lea.vmem %s1162_s0, %s879_s9  ;;  %v927_v47 = vld [vmem:[%s1163_s1 + $0x108] sm:$0xff]   ;;  %v928_v48 = vld [vmem:[%s1163_s1 + $0x110] sm:$0xff]   ;;  %v929_v51 = vld [vmem:[%s1163_s1 + $0x118] sm:$0xff]  }
  0x11   : > { %v915_v15 = vld [vmem:[%s1034_s18 + $0x1c] ss:$8 sps:$4 sm:$0xff]   ;;  %v1044_v17 = vld [vmem:[%s1034_s18 + $0x8] sm:$0xff]  ;;  %v479_v27 = vld [vmem:[%s1034_s18 + $0x10] sm:$0x33] }
  0x12   : > { %v172_v16 = vld [vmem:[%s1034_s18] sm:$0xff]  ;;  %809 = vmatprep.mubr.msk.bf16.mxu0 %vm307_vm0, %v915_v15  ;;  %v852_v30 = vcombine.high %v479_v27, %v479_v27  ;;  %v851_v50 = vcombine.low %v479_v27, %v479_v27 }
  0x13   : > { %318 = vmatpush1.bf16.msra.mxu0 %v895_v7  ;;  %443 = vmatpush1.bf16.msra.mxu1 %v896_v8  ;;  %v811_v19 = vcombine.high %v172_v16, %v1044_v17  ;;  %v477_v26 = vld [vmem:[%s1034_s18] sm:$0xcc]  ;;  %v810_v36 = vcombine.low %v172_v16, %v1044_v17  ;;  %v866_v3 = vld [vmem:[%s1164_s2] ss:$0 sm:$0xff] }
  0x14   : > { %319 = vmatprep.subr.bf16.mxu0 %v944_v1  ;;  %444 = vmatprep.subr.bf16.mxu1 %v944_v1  ;;  %v850_v29 = vcombine.high %v477_v26, %v1044_v17  ;;  %v523_v34 = vrot.slane %v852_v30, 2  ;;  %v913_v35 = vld [vmem:[%s1034_s18 + $0x18] ss:$8 sps:$4 sm:$0xff]   ;;  %v849_v49 = vcombine.low %v477_v26, %v1044_v17  ;;  %v520_v53 = vrot.slane %v851_v50, 2 }
  0x15   : > { %824 = vmatprep.mubr.msk.bf16.mxu1 %vm307_vm0, %v811_v19 }
  0x16   : > { %v522_v33 = vrot.slane %v850_v29, 2  ;;  %v519_v52 = vrot.slane %v849_v49, 2 }
  0x17   : > { %320 = vmatpush1.bf16.msra.mxu0 %v897_v9  ;;  %445 = vmatpush1.bf16.msra.mxu1 %v898_v10 }
  0x18   : > { %321 = vmatprep.subr.bf16.mxu0 %v944_v1  ;;  %446 = vmatprep.subr.bf16.mxu1 %v944_v1  ;;  %v524_v38 = vsel %vm518_vm1, %v522_v33, %v523_v34  ;;  %v521_v54 = vsel %vm518_vm1, %v519_v52, %v520_v53 }
  0x1b   : > { %322 = vmatpush1.bf16.msra.mxu0 %v899_v11  ;;  %447 = vmatpush1.bf16.msra.mxu1 %v900_v12 }
  0x1c   : > { %323 = vmatprep.subr.bf16.mxu0 %v944_v1  ;;  %448 = vmatprep.subr.bf16.mxu1 %v944_v1 }
  0x1f   : > { %324 = vmatpush1.bf16.msra.mxu0 %v901_v13  ;;  %449 = vmatpush1.bf16.msra.mxu1 %v902_v14 }
  0x20   : > { %325 = vmatprep.subr.bf16.mxu0 %v944_v1  ;;  %450 = vmatprep.subr.bf16.mxu1 %v944_v1 }
  0x23   : > { %326 = vmatpush1.bf16.msra.mxu0 %v903_v18  ;;  %451 = vmatpush1.bf16.msra.mxu1 %v904_v20 }
  0x24   : > { %327 = vmatprep.subr.bf16.mxu0 %v944_v1  ;;  %452 = vmatprep.subr.bf16.mxu1 %v944_v1 }
  0x27   : > { %328 = vmatpush1.bf16.msra.mxu0 %v905_v21  ;;  %453 = vmatpush1.bf16.msra.mxu1 %v906_v22 }
  0x28   : > { %329 = vmatprep.subr.bf16.mxu0 %v944_v1  ;;  %454 = vmatprep.subr.bf16.mxu1 %v944_v1 }
  0x2b   : > { %330 = vmatpush1.bf16.msra.mxu0 %v907_v23  ;;  %455 = vmatpush1.bf16.msra.mxu1 %v908_v24 }
  0x2c   : > { %331 = vmatprep.subr.bf16.mxu0 %v944_v1  ;;  %456 = vmatprep.subr.bf16.mxu1 %v944_v1 }
  0x2f   : > { %332 = vmatpush1.bf16.msra.mxu0 %v909_v25  ;;  %457 = vmatpush1.bf16.msra.mxu1 %v910_v28 }
  0x30   : > { %333 = vmatprep.subr.bf16.mxu0 %v944_v1  ;;  %458 = vmatprep.subr.bf16.mxu1 %v944_v1 }
  0x33   : > { %334 = vmatpush1.bf16.msra.mxu0 %v911_v31  ;;  %459 = vmatpush1.bf16.msra.mxu1 %v912_v32 }
  0x34   : > { %601 = vmatprep.subr.bf16.mxu0 %v944_v1 }
  0x36   : > { %344 = vmatmul.mubr.bf16.vlgmr.msra.gmra.mrb[0].mxu0 %v913_v35  ;;  %469 = vmatmul.mubr.bf16.vlgmr.msra.gmra.mrb[0].mxu1 %v810_v36  ;;  %v684_v35 = vlaneseq }
  0x37   : > { %602 = vmatpush1.bf16.msra.mxu0 %v918_v37  ;;  %865 = vmatprep.mubr.msk.bf16.mxu0 %vm307_vm0, %v524_v38  ;;  %v679_v37 = vld [vmem:[%s1164_s2 + $0x1] sm:$0x1] }
  0x38   : > { %603 = vmatprep.subr.bf16.mxu0 %v944_v1  ;;  %v685_v36 = vshrl.u32 %v684_v35, 7 }
  0x3a   : > { %v686_v38 = vsub.s32 0, %v685_v36 }
  0x3b   : > { %604 = vmatpush1.bf16.msra.mxu0 %v919_v39 }
  0x3c   : > { %605 = vmatprep.subr.bf16.mxu0 %v944_v1 }
  0x3f   : > { %606 = vmatpush1.bf16.msra.mxu0 %v920_v40 }
  0x40   : > { %607 = vmatprep.subr.bf16.mxu0 %v944_v1 }
  0x43   : > { %608 = vmatpush1.bf16.msra.mxu0 %v921_v41  ;;  %v681_v41 = vld [vmem:[%s1164_s2 + $0x2] sm:$0x1] }
  0x44   : > { %609 = vmatprep.subr.bf16.mxu0 %v944_v1 }
  0x47   : > { %610 = vmatpush1.bf16.msra.mxu0 %v922_v42 }
  0x48   : > { %611 = vmatprep.subr.bf16.mxu0 %v944_v1 }
  0x4b   : > { %612 = vmatpush1.bf16.msra.mxu0 %v923_v43 }
  0x4c   : > { %613 = vmatprep.subr.bf16.mxu0 %v944_v1 }
  0x4f   : > { %614 = vmatpush1.bf16.msra.mxu0 %v924_v44 }
  0x50   : > { %615 = vmatprep.subr.bf16.mxu0 %v944_v1 }
  0x53   : > { %616 = vmatpush1.bf16.msra.mxu0 %v925_v45 }
  0x54   : > { %617 = vmatprep.subr.bf16.mxu0 %v944_v1 }
  0x57   : > { %618 = vmatpush1.bf16.msra.mxu0 %v926_v46 }
  0x58   : > { %619 = vmatprep.subr.bf16.mxu0 %v944_v1 }
  0x5b   : > { %620 = vmatpush1.bf16.msra.mxu0 %v927_v47 }
  0x5c   : > { %621 = vmatprep.subr.bf16.mxu0 %v944_v1 }
  0x5f   : > { %622 = vmatpush1.bf16.msra.mxu0 %v928_v48 }
  0x60   : > { %623 = vmatprep.subr.bf16.mxu0 %v944_v1 }
  0x63   : > { %624 = vmatpush1.bf16.msra.mxu0 %v929_v51 }
  0x66   : > { %634 = vmatmul.mubr.bf16.vlgmr.msra.gmra.mrb[4].mxu0 %v521_v54 }
 0x109   : > { %v345_v55 = vpop.f32.mrb[0].mxu0  ;;  %v470_v56 = vpop.f32.mrb[0].mxu1 }
 0x10a   : > { %v347_v57 = vpop.f32.mrb[1].mxu0  ;;  %v471_v58 = vadd.f32 %v470_v56, %v345_v55  ;;  %v472_v59 = vpop.f32.mrb[1].mxu1 }
 0x10b   : > { %v348_v60 = vpop.f32.mrb[2].mxu0  ;;  %v473_v61 = vpop.f32.mrb[2].mxu1 }
 0x10c   : > { %v350_v62 = vpop.f32.mrb[3].mxu0  ;;  %v474_v63 = vadd.f32 %v473_v61, %v348_v60  ;;  %v475_v0 = vpop.f32.mrb[3].mxu1 }
 0x139   : > { %v635_v2 = vpop.f32.mrb[4].mxu0 }
 0x13a   : > { %v642_v1 = vadd.f32 %v635_v2, %v471_v58  ;;  %v637_v4 = vpop.f32.mrb[5].mxu0 }
 0x13b   : > { %v638_v5 = vpop.f32.mrb[6].mxu0 }
 0x13c   : > { %v649_v6 = vadd.f32 %v866_v3, %v642_v1  ;;  %v643_v7 = vadd.f32 %v638_v5, %v474_v63  ;;  %v640_v8 = vpop.f32.mrb[7].mxu0 }
 0x13e   : > { %vm651_vm2 = vcmp.ge.f32.partialorder %v649_v6, 0.0  ;;  %v653_v9 = vmul.f32 0.2, %v649_v6  ;;  %v650_v10 = vadd.f32 %v866_v3, %v643_v7 }
 0x140   : > { %v655_v11 = vsel %vm651_vm2, %v649_v6, %v653_v9  ;;  %vm652_vm3 = vcmp.ge.f32.partialorder %v650_v10, 0.0  ;;  %v654_v12 = vmul.f32 0.2, %v650_v10 }
 0x141   : > { %v665_v14 = vmul.f32 %v655_v11, %v655_v11 }
 0x142   : > { %v656_v13 = vsel %vm652_vm3, %v650_v10, %v654_v12 }
 0x143   : > { %v657_v15 = vadd.f32 %v656_v13, %v655_v11  ;;  %v666_v16 = vmul.f32 %v656_v13, %v656_v13 }
 0x145   : > { %v658_v17 = vrot.slane %v657_v15, 4  ;;  %v667_v18 = vadd.f32 %v666_v16, %v665_v14 }
 0x147   : > { %v659_v19 = vadd.f32 %v658_v17, %v657_v15  ;;  %v668_v20 = vrot.slane %v667_v18, 4 }
 0x149   : > { %v660_v21 = vrot.slane %v659_v19, 2  ;;  %v669_v22 = vadd.f32 %v668_v20, %v667_v18 }
 0x14b   : > { %v661_v23 = vadd.f32 %v660_v21, %v659_v19  ;;  %v670_v24 = vrot.slane %v669_v22, 2 }
 0x14d   : > { %v662_v25 = vrot.slane %v661_v23, 1  ;;  %v671_v26 = vadd.f32 %v670_v24, %v669_v22 }
 0x14f   : > { %v663_v27 = vadd.f32 %v662_v25, %v661_v23  ;;  %v672_v28 = vrot.slane %v671_v26, 1 }
 0x151   : > { %v664_v29 = vmul.f32 0.0625, %v663_v27  ;;  %v673_v30 = vadd.f32 %v672_v28, %v671_v26 }
 0x153   : > { %v674_v31 = vmul.f32 0.0625, %v673_v30  ;;  %v675_v32 = vmul.f32 %v664_v29, %v664_v29 }
 0x155   : > { %v676_v33 = vsub.f32 %v674_v31, %v675_v32 }
 0x157   : > { %v677_v34 = vadd.f32 1e-05, %v676_v33 }
 0x159   : > { %934 = vrsqrt.f32 %v677_v34 }
 0x163   : > { %v935_v39 = vpop.eup %934 }
 0x164   : > { %v680_v40 = vmul.f32 %v935_v39, %v679_v37 }
 0x166   : > { %v682_v42 = vmul.f32 %v680_v40, %v664_v29  ;;  %v687_v43 = vrot.slane %v680_v40, %v686_v38 }
 0x168   : > { %v683_v44 = vsub.f32 %v681_v41, %v682_v42  ;;  %v688_v45 = vmul.f32 %v687_v43, %v655_v11  ;;  %v689_v46 = vmul.f32 %v687_v43, %v656_v13 }
 0x16a   : > { %v693_v47 = vrot.slane %v683_v44, %v686_v38 }
 0x16c   : > { %v694_v48 = vadd.f32 %v693_v47, %v688_v45  ;;  %v695_v49 = vadd.f32 %v693_v47, %v689_v46 }
 0x16e   : > { %v877_v50 = vpack.c.bf16 %v695_v49, %v694_v48 }
 0x170   : > { %878 = vst [vmem:[%s170_s24] sm:$0xff] %v877_v50  }
 0x171 PF: > { %s13_s12 = sadd.s32 1, %s942_s12  }
 0x172   : > { %p10_p4 = scmp.ge.s32.totalorder %s13_s12, 6  }
 0x174   :  { %12 = sbr.rel (!%p10_p4) target bundleno = 1 (0x1), region = 65 }

// kernel: gan_model_losses.21
= control target key start
LH: loop header
LB: loop body
LE: loop exit
PB: predicated region body
PF: predicated region fallthrough
CT: control target
= control target key end

     0   :  { %s1599_s12 = smov 0   ;;  %s1887_s0 = inlined_call_operand.vmem [shape: bf16[4,2,6,384], index: 0, kind: input, shape index: {}]   ;;  %s1888_s1 = inlined_call_operand.vmem [shape: bf16[3,384,128], index: 1, kind: input, shape index: {}]   ;;  %s1889_s2 = inlined_call_operand.vmem [shape: f32[8,128], index: 2, kind: input, shape index: {}]   ;;  %s1890_s3 = inlined_call_operand.vmem [shape: bf16[4,4,128], index: 3, kind: output, shape index: {}]  }
   0x1 LB: > { %s1133_s13 = sadd.s32 4294967295, %s1575_s12   ;;  %p1137_p0 = scmp.ge.s32.totalorder %s1575_s12, 1  ;;  %s1575_s12 = sphi %s1599_s12, %s13_s12  }
   0x2   : > { %p137_p1 = scmp.lt.s32.totalorder %s1575_s12, 5 }
   0x4   : > { %p138_p2 = pnand %p1137_p0, %p137_p1 }
   0x5   : > { %v1486_v0 = vld [vmem:[%s1888_s1 + $0x100] sm:$0xff] (!%p138_p2)   ;;  %v1577_v1 = vmov (!%p138_p2), 0.0   ;;  %v1489_v4 = vld [vmem:[%s1888_s1 + $0x108] sm:$0xff] (!%p138_p2)   ;;  %vm1578_vm0 = vmmov (!%p138_p2), 0   ;;  %v1492_v7 = vld [vmem:[%s1888_s1 + $0x110] sm:$0xff] (!%p138_p2)   ;;  %p160_p3 = scmp.lt.s32.totalorder (!%p138_p2), %s1133_s13, 3 }
   0x6   : > { %141 = sbr.rel (%p138_p2) target bundleno = 371 (0x173), region = 32  ;;  %1415 = vmatprep.subr.bf16.mxu1 (!%p138_p2), %v1577_v1  ;;  %v1487_v2 = vld [vmem:[%s1888_s1 + $0xc0] sm:$0xff] (!%p138_p2)   ;;  %1322 = vmatprep.subr.bf16.mxu0 (!%p138_p2), %v1486_v0  ;;  %v1490_v5 = vld [vmem:[%s1888_s1 + $0xc8] sm:$0xff] (!%p138_p2)   ;;  %v1493_v8 = vld [vmem:[%s1888_s1 + $0xd0] sm:$0xff] (!%p138_p2)   ;;  %vm1041_vm2 = vcmask (!%p138_p2), 1043456  }
   0x7   : > { %v1488_v3 = vld [vmem:[%s1888_s1 + $0x140] sm:$0xff] (!%p138_p2)   ;;  %1323 = vmatpush3.bf16.msra.mxu0 (!%p138_p2), %v1487_v2  ;;  %1431 = vmatprep.mubr.msk.bf16.mxu1 (!%p138_p2), %vm1578_vm0, %v1577_v1  ;;  %v1491_v6 = vld [vmem:[%s1888_s1 + $0x148] sm:$0xff] (!%p138_p2)   ;;  %v1494_v9 = vld [vmem:[%s1888_s1 + $0x150] sm:$0xff] (!%p138_p2)  }
   0x8   : > { %1416 = vmatpush3.bf16.msra.mxu1 (!%p138_p2), %v1488_v3  ;;  %1324 = vmatprep.subr.bf16.mxu0 (!%p138_p2), %v1489_v4  ;;  %v1495_v10 = vld [vmem:[%s1888_s1 + $0x118] sm:$0xff] (!%p138_p2)   ;;  %v1498_v13 = vld [vmem:[%s1888_s1 + $0x120] sm:$0xff] (!%p138_p2)   ;;  %v1501_v16 = vld [vmem:[%s1888_s1 + $0x128] sm:$0xff] (!%p138_p2)  }
   0x9   : > { %1417 = vmatprep.subr.bf16.mxu1 (!%p138_p2), %v1577_v1  ;;  %v1496_v11 = vld [vmem:[%s1888_s1 + $0xd8] sm:$0xff] (!%p138_p2)   ;;  %v1499_v14 = vld [vmem:[%s1888_s1 + $0xe0] sm:$0xff] (!%p138_p2)   ;;  %v1502_v17 = vld [vmem:[%s1888_s1 + $0xe8] sm:$0xff] (!%p138_p2)  }
   0xa   : > { %v1497_v12 = vld [vmem:[%s1888_s1 + $0x158] sm:$0xff] (!%p138_p2)   ;;  %v1500_v15 = vld [vmem:[%s1888_s1 + $0x160] sm:$0xff] (!%p138_p2)   ;;  %v1503_v18 = vld [vmem:[%s1888_s1 + $0x168] sm:$0xff] (!%p138_p2)  }
   0xb   : > { %1325 = vmatpush3.bf16.msra.mxu0 (!%p138_p2), %v1490_v5  ;;  %v1504_v19 = vld [vmem:[%s1888_s1 + $0x130] sm:$0xff] (!%p138_p2)   ;;  %v1507_v22 = vld [vmem:[%s1888_s1 + $0x138] sm:$0xff] (!%p138_p2)   ;;  %v1512_v27 = vld [vmem:[%s1888_s1 + $0x40] sm:$0xff] (!%p138_p2)  }
   0xc   : > { %1418 = vmatpush3.bf16.msra.mxu1 (!%p138_p2), %v1491_v6  ;;  %1326 = vmatprep.subr.bf16.mxu0 (!%p138_p2), %v1492_v7  ;;  %v1505_v20 = vld [vmem:[%s1888_s1 + $0xf0] sm:$0xff] (!%p138_p2)   ;;  %v1508_v25 = vld [vmem:[%s1888_s1 + $0xf8] sm:$0xff] (!%p138_p2)   ;;  %v1514_v30 = vld [vmem:[%s1888_s1] sm:$0xff] (!%p138_p2)  }
   0xd   : > { %1419 = vmatprep.subr.bf16.mxu1 %v1577_v1  ;;  %s1892_s13 = smov (!%p160_p3, %s1133_s13), 3  ;;  %v1506_v21 = vld [vmem:[%s1888_s1 + $0x170] sm:$0xff]   ;;  %v1509_v26 = vld [vmem:[%s1888_s1 + $0x178] sm:$0xff]   ;;  %v1515_v31 = vld [vmem:[%s1888_s1 + $0x80] sm:$0xff]  }
   0xe   : > { %s1475_s21 = smul.u32 24, %s1892_s13  ;;  %v1516_v32 = vld [vmem:[%s1888_s1 + $0x48] sm:$0xff]   ;;  %v1519_v35 = vld [vmem:[%s1888_s1 + $0x50] sm:$0xff]   ;;  %v1522_v38 = vld [vmem:[%s1888_s1 + $0x58] sm:$0xff]  }
   0xf   : > { %1327 = vmatpush3.bf16.msra.mxu0 %v1493_v8  ;;  %v1517_v33 = vld [vmem:[%s1888_s1 + $0x8] sm:$0xff]   ;;  %v1520_v36 = vld [vmem:[%s1888_s1 + $0x10] sm:$0xff]   ;;  %v1523_v39 = vld [vmem:[%s1888_s1 + $0x18] sm:$0xff]  }
  0x10   : > { %1420 = vmatpush3.bf16.msra.mxu1 %v1494_v9  ;;  %1328 = vmatprep.subr.bf16.mxu0 %v1495_v10  ;;  %s1685_s5 = scalar_lea.vmem %s1887_s0, %s1475_s21  ;;  %v1518_v34 = vld [vmem:[%s1888_s1 + $0x88] sm:$0xff]   ;;  %v1521_v37 = vld [vmem:[%s1888_s1 + $0x90] sm:$0xff]   ;;  %v1524_v40 = vld [vmem:[%s1888_s1 + $0x98] sm:$0xff]   ;;  %s1139_s21 = sshll.u32 %s1892_s13, 1 }
  0x11   : > { %1421 = vmatprep.subr.bf16.mxu1 %v1577_v1  ;;  %v1140_v23 = vld [vmem:[%s1685_s5 + $0xc] sm:$0x33]  ;;  %v1513_v28 = vld [vmem:[%s1685_s5 + $0x14] ss:$0 sps:$4 sm:$0x33]   ;;  %v1525_v41 = vld [vmem:[%s1888_s1 + $0x60] sm:$0xff]   ;;  %s168_s24 = scalar_lea.vmem %s1890_s3, %s1139_s21 }
  0x12   : > { %v1191_v24 = vcombine.high %v1140_v23, %v1140_v23  ;;  %v1190_v29 = vcombine.low %v1140_v23, %v1140_v23  ;;  %v1526_v42 = vld [vmem:[%s1888_s1 + $0x20] sm:$0xff]   ;;  %v1528_v44 = vld [vmem:[%s1888_s1 + $0x68] sm:$0xff]   ;;  %v1531_v49 = vld [vmem:[%s1888_s1 + $0x70] sm:$0xff]  }
  0x13   : > { %1329 = vmatpush3.bf16.msra.mxu0 %v1496_v11  ;;  %v1527_v43 = vld [vmem:[%s1888_s1 + $0xa0] sm:$0xff]   ;;  %v1529_v46 = vld [vmem:[%s1888_s1 + $0x28] sm:$0xff]   ;;  %v1532_v50 = vld [vmem:[%s1888_s1 + $0x30] sm:$0xff]  }
  0x14   : > { %1422 = vmatpush3.bf16.msra.mxu1 %v1497_v12  ;;  %1330 = vmatprep.subr.bf16.mxu0 %v1498_v13  ;;  %v170_v45 = vld [vmem:[%s1685_s5] sm:$0x33]  ;;  %v1530_v48 = vld [vmem:[%s1888_s1 + $0xa8] sm:$0xff]   ;;  %v1533_v51 = vld [vmem:[%s1888_s1 + $0xb0] sm:$0xff]  }
  0x15   : > { %1423 = vmatprep.subr.bf16.mxu1 %v1577_v1  ;;  %459 = vmatprep.mubr.bf16.mxu0 %v1191_v24  ;;  %v1218_v47 = vcombine.high %v170_v45, %v170_v45  ;;  %v1534_v52 = vld [vmem:[%s1888_s1 + $0x78] sm:$0xff]   ;;  %v1539_v55 = vld [vmem:[%s1888_s1 + $0x1c0] sm:$0xff]   ;;  %v1540_v56 = vld [vmem:[%s1685_s5 + $0x8] ss:$0 sps:$4 sm:$0x33]   ;;  %v1217_v57 = vcombine.low %v170_v45, %v170_v45 }
  0x16   : > { %v1535_v53 = vld [vmem:[%s1888_s1 + $0x38] sm:$0xff]   ;;  %v1541_v58 = vld [vmem:[%s1888_s1 + $0x180] sm:$0xff]   ;;  %v1543_v60 = vld [vmem:[%s1888_s1 + $0x1c8] sm:$0xff]  }
  0x17   : > { %1331 = vmatpush3.bf16.msra.mxu0 %v1499_v14  ;;  %v1536_v54 = vld [vmem:[%s1888_s1 + $0xb8] sm:$0xff]   ;;  %v1542_v59 = vld [vmem:[%s1888_s1 + $0x200] sm:$0xff]   ;;  %v1544_v61 = vld [vmem:[%s1888_s1 + $0x188] sm:$0xff]  }
  0x18   : > { %1424 = vmatpush3.bf16.msra.mxu1 %v1500_v15  ;;  %1332 = vmatprep.subr.bf16.mxu0 %v1501_v16  ;;  %v1545_v62 = vld [vmem:[%s1888_s1 + $0x208] sm:$0xff]   ;;  %v1546_v63 = vld [vmem:[%s1888_s1 + $0x1d0] sm:$0xff]   ;;  %v1549_v3 = vld [vmem:[%s1888_s1 + $0x1d8] sm:$0xff]  }
  0x19   : > { %1425 = vmatprep.subr.bf16.mxu1 %v1577_v1  ;;  %v1547_v0 = vld [vmem:[%s1888_s1 + $0x190] sm:$0xff]   ;;  %v742_v4 = vld [vmem:[%s1685_s5] sm:$0x66]  ;;  %v1550_v5 = vld [vmem:[%s1888_s1 + $0x198] sm:$0xff]  }
  0x1a   : > { %v1548_v2 = vld [vmem:[%s1888_s1 + $0x210] sm:$0xff]   ;;  %v1293_v6 = vcombine.high %v742_v4, %v742_v4  ;;  %v1551_v7 = vld [vmem:[%s1888_s1 + $0x218] sm:$0xff]   ;;  %v1552_v8 = vld [vmem:[%s1888_s1 + $0x1e0] sm:$0xff]  }
  0x1b   : > { %1333 = vmatpush3.bf16.msra.mxu0 %v1502_v17  ;;  %v1553_v10 = vld [vmem:[%s1888_s1 + $0x1a0] sm:$0xff]   ;;  %v1555_v12 = vld [vmem:[%s1888_s1 + $0x1e8] sm:$0xff]   ;;  %v1558_v15 = vld [vmem:[%s1888_s1 + $0x1f0] sm:$0xff]  }
  0x1c   : > { %1426 = vmatpush3.bf16.msra.mxu1 %v1503_v18  ;;  %1334 = vmatprep.subr.bf16.mxu0 %v1504_v19  ;;  %v802_v9 = vrot.slane %v1293_v6, 1  ;;  %v1554_v11 = vld [vmem:[%s1888_s1 + $0x220] sm:$0xff]   ;;  %v1556_v13 = vld [vmem:[%s1888_s1 + $0x1a8] sm:$0xff]   ;;  %v1559_v16 = vld [vmem:[%s1888_s1 + $0x1b0] sm:$0xff]   ;;  %v1292_v19 = vcombine.low %v742_v4, %v742_v4 }
  0x1d   : > { %1427 = vmatprep.subr.bf16.mxu1 %v1577_v1  ;;  %v1557_v14 = vld [vmem:[%s1888_s1 + $0x228] sm:$0xff]   ;;  %v1560_v17 = vld [vmem:[%s1888_s1 + $0x230] sm:$0xff]   ;;  %v1561_v18 = vld [vmem:[%s1888_s1 + $0x1f8] sm:$0xff]  }
  0x1e   : > { %v801_v23 = vrot.slane %v1292_v19, 1  ;;  %v1063_v19 = vld [vmem:[%s1889_s2 + $0x1] sm:$0x1] }
  0x1f   : > { %1335 = vmatpush3.bf16.msra.mxu0 %v1505_v20  ;;  %v1562_v20 = vld [vmem:[%s1888_s1 + $0x1b8] sm:$0xff]  }
  0x20   : > { %1428 = vmatpush3.bf16.msra.mxu1 %v1506_v21  ;;  %1336 = vmatprep.subr.bf16.mxu0 %v1507_v22  ;;  %v1566_v21 = vld [vmem:[%s1685_s5 + $0x8] ss:$0 sps:$4 sm:$0x66]   ;;  %v1563_v22 = vld [vmem:[%s1888_s1 + $0x238] sm:$0xff]  }
  0x21   : > { %1429 = vmatprep.subr.bf16.mxu1 %v1577_v1  ;;  %v803_v24 = vrot.slane %v1566_v21, 1 }
  0x23   : > { %1337 = vmatpush3.bf16.msra.mxu0 %v1508_v25 }
  0x24   : > { %1430 = vmatpush3.bf16.msra.mxu1 %v1509_v26  ;;  %1353 = vmatprep.subr.bf16.mxu0 %v1512_v27 }
  0x25   : > { %1435 = vmatprep.subr.bf16.mxu1 %v1577_v1 }
  0x26   : > { %460 = vmatmul.mubr.bf16.vlgmr.msra.gmra.mrb[0].mxu0 %v1190_v29 }
  0x27   : > { %1432 = vmatmul.mubr.bf16.vlgmr.msra.gmra.mrb[0].mxu1 %v1513_v28  ;;  %1354 = vmatpush3.bf16.msra.mxu0 %v1514_v30 }
  0x28   : > { %1436 = vmatpush3.bf16.msra.mxu1 %v1515_v31  ;;  %1355 = vmatprep.subr.bf16.mxu0 %v1516_v32 }
  0x29   : > { %1437 = vmatprep.subr.bf16.mxu1 %v1577_v1  ;;  %1451 = vmatprep.mubr.msk.bf16.mxu1 %vm1578_vm0, %v1577_v1 }
  0x2a   : > { %694 = vmatprep.mubr.bf16.mxu0 %v1218_v47 }
  0x2b   : > { %1356 = vmatpush3.bf16.msra.mxu0 %v1517_v33 }
  0x2c   : > { %1438 = vmatpush3.bf16.msra.mxu1 %v1518_v34  ;;  %1357 = vmatprep.subr.bf16.mxu0 %v1519_v35 }
  0x2d   : > { %1439 = vmatprep.subr.bf16.mxu1 %v1577_v1 }
  0x2f   : > { %1358 = vmatpush3.bf16.msra.mxu0 %v1520_v36 }
  0x30   : > { %1440 = vmatpush3.bf16.msra.mxu1 %v1521_v37  ;;  %1359 = vmatprep.subr.bf16.mxu0 %v1522_v38 }
  0x31   : > { %1441 = vmatprep.subr.bf16.mxu1 %v1577_v1 }
  0x33   : > { %1360 = vmatpush3.bf16.msra.mxu0 %v1523_v39 }
  0x34   : > { %1442 = vmatpush3.bf16.msra.mxu1 %v1524_v40  ;;  %1361 = vmatprep.subr.bf16.mxu0 %v1525_v41 }
  0x35   : > { %1443 = vmatprep.subr.bf16.mxu1 %v1577_v1 }
  0x37   : > { %1362 = vmatpush3.bf16.msra.mxu0 %v1526_v42 }
  0x38   : > { %1444 = vmatpush3.bf16.msra.mxu1 %v1527_v43  ;;  %1363 = vmatprep.subr.bf16.mxu0 %v1528_v44 }
  0x39   : > { %1445 = vmatprep.subr.bf16.mxu1 %v1577_v1 }
  0x3b   : > { %1364 = vmatpush3.bf16.msra.mxu0 %v1529_v46 }
  0x3c   : > { %1446 = vmatpush3.bf16.msra.mxu1 %v1530_v48  ;;  %1365 = vmatprep.subr.bf16.mxu0 %v1531_v49 }
  0x3d   : > { %1447 = vmatprep.subr.bf16.mxu1 %v1577_v1 }
  0x3f   : > { %1366 = vmatpush3.bf16.msra.mxu0 %v1532_v50 }
  0x40   : > { %1448 = vmatpush3.bf16.msra.mxu1 %v1533_v51  ;;  %1367 = vmatprep.subr.bf16.mxu0 %v1534_v52 }
  0x41   : > { %1449 = vmatprep.subr.bf16.mxu1 %v1577_v1 }
  0x43   : > { %1368 = vmatpush3.bf16.msra.mxu0 %v1535_v53 }
  0x44   : > { %1450 = vmatpush3.bf16.msra.mxu1 %v1536_v54  ;;  %1384 = vmatprep.subr.bf16.mxu0 %v1539_v55  ;;  %v1319_v55 = vld [vmem:[%s1889_s2] ss:$0 sm:$0xff] }
  0x45   : > { %1455 = vmatprep.subr.bf16.mxu1 %v1577_v1 }
  0x46   : > { %695 = vmatmul.mubr.bf16.vlgmr.msra.gmra.mrb[4].mxu0 %v1217_v57 }
  0x47   : > { %1452 = vmatmul.mubr.bf16.vlgmr.msra.gmra.mrb[4].mxu1 %v1540_v56  ;;  %1385 = vmatpush3.bf16.msra.mxu0 %v1541_v58 }
  0x48   : > { %1456 = vmatpush3.bf16.msra.mxu1 %v1542_v59  ;;  %1386 = vmatprep.subr.bf16.mxu0 %v1543_v60 }
  0x49   : > { %1457 = vmatprep.subr.bf16.mxu1 %v1577_v1  ;;  %1471 = vmatprep.mubr.msk.bf16.mxu1 %vm1578_vm0, %v1577_v1 }
  0x4a   : > { %983 = vmatprep.mubr.bf16.mxu0 %v802_v9 }
  0x4b   : > { %1387 = vmatpush3.bf16.msra.mxu0 %v1544_v61 }
  0x4c   : > { %1458 = vmatpush3.bf16.msra.mxu1 %v1545_v62  ;;  %1388 = vmatprep.subr.bf16.mxu0 %v1546_v63 }
  0x4d   : > { %1459 = vmatprep.subr.bf16.mxu1 %v1577_v1 }
  0x4f   : > { %1389 = vmatpush3.bf16.msra.mxu0 %v1547_v0 }
  0x50   : > { %1460 = vmatpush3.bf16.msra.mxu1 %v1548_v2  ;;  %1390 = vmatprep.subr.bf16.mxu0 %v1549_v3 }
  0x51   : > { %1461 = vmatprep.subr.bf16.mxu1 %v1577_v1 }
  0x53   : > { %1391 = vmatpush3.bf16.msra.mxu0 %v1550_v5 }
  0x54   : > { %1462 = vmatpush3.bf16.msra.mxu1 %v1551_v7  ;;  %1392 = vmatprep.subr.bf16.mxu0 %v1552_v8 }
  0x55   : > { %1463 = vmatprep.subr.bf16.mxu1 %v1577_v1 }
  0x57   : > { %1393 = vmatpush3.bf16.msra.mxu0 %v1553_v10 }
  0x58   : > { %1464 = vmatpush3.bf16.msra.mxu1 %v1554_v11  ;;  %1394 = vmatprep.subr.bf16.mxu0 %v1555_v12 }
  0x59   : > { %1465 = vmatprep.subr.bf16.mxu1 %v1577_v1 }
  0x5b   : > { %1395 = vmatpush3.bf16.msra.mxu0 %v1556_v13 }
  0x5c   : > { %1466 = vmatpush3.bf16.msra.mxu1 %v1557_v14  ;;  %1396 = vmatprep.subr.bf16.mxu0 %v1558_v15 }
  0x5d   : > { %1467 = vmatprep.subr.bf16.mxu1 %v1577_v1 }
  0x5f   : > { %1397 = vmatpush3.bf16.msra.mxu0 %v1559_v16 }
  0x60   : > { %1468 = vmatpush3.bf16.msra.mxu1 %v1560_v17  ;;  %1398 = vmatprep.subr.bf16.mxu0 %v1561_v18  ;;  %v1068_v17 = vlaneseq }
  0x61   : > { %1469 = vmatprep.subr.bf16.mxu1 %v1577_v1 }
  0x62   : > { %v1069_v18 = vshrl.u32 %v1068_v17, 7 }
  0x63   : > { %1399 = vmatpush3.bf16.msra.mxu0 %v1562_v20 }
  0x64   : > { %1470 = vmatpush3.bf16.msra.mxu1 %v1563_v22  ;;  %v1070_v20 = vsub.s32 0, %v1069_v18 }
  0x66   : > { %984 = vmatmul.mubr.bf16.vlgmr.msra.gmra.mrb[8].mxu0 %v801_v23  ;;  %v1065_v23 = vld [vmem:[%s1889_s2 + $0x2] sm:$0x1] }
  0x67   : > { %1472 = vmatmul.mubr.bf16.vlgmr.msra.gmra.mrb[8].mxu1 %v803_v24 }
  0xf9   : > { %v1338_v25 = vpop.f32.mrb[0].mxu0 }
  0xfa   : > { %v1339_v26 = vpop.f32.mrb[1].mxu0  ;;  %v501_v27 = vpop.f32.mrb[0].mxu1 }
  0xfb   : > { %v1340_v28 = vadd.f32 %v1339_v26, %v1338_v25  ;;  %v1341_v29 = vpop.f32.mrb[2].mxu0  ;;  %v1433_v30 = vpop.f32.mrb[1].mxu1 }
  0xfc   : > { %v1342_v31 = vpop.f32.mrb[3].mxu0  ;;  %v504_v32 = vpop.f32.mrb[2].mxu1 }
  0xfd   : > { %v502_v33 = vadd.f32 %v1340_v28, %v501_v27  ;;  %v1434_v34 = vpop.f32.mrb[3].mxu1 }
 0x119   : > { %v1369_v35 = vpop.f32.mrb[4].mxu0 }
 0x11a   : > { %v1370_v36 = vpop.f32.mrb[5].mxu0  ;;  %v736_v37 = vpop.f32.mrb[4].mxu1 }
 0x11b   : > { %v1371_v1 = vadd.f32 %v1370_v36, %v1369_v35  ;;  %v1372_v38 = vpop.f32.mrb[6].mxu0  ;;  %v1453_v39 = vpop.f32.mrb[5].mxu1 }
 0x11c   : > { %v1373_v40 = vpop.f32.mrb[7].mxu0  ;;  %v739_v41 = vpop.f32.mrb[6].mxu1 }
 0x11d   : > { %v697_v42 = vadd.f32 %v1371_v1, %v502_v33  ;;  %v1454_v43 = vpop.f32.mrb[7].mxu1 }
 0x11f   : > { %v737_v44 = vadd.f32 %v736_v37, %v697_v42 }
 0x139   : > { %v1400_v45 = vpop.f32.mrb[8].mxu0 }
 0x13a   : > { %v1025_v46 = vpop.f32.mrb[8].mxu1  ;;  %v1401_v47 = vpop.f32.mrb[9].mxu0 }
 0x13b   : > { %v1402_v48 = vadd.f32 %v1401_v47, %v1400_v45  ;;  %v1473_v49 = vpop.f32.mrb[9].mxu1  ;;  %v1403_v50 = vpop.f32.mrb[10].mxu0 }
 0x13c   : > { %v1028_v51 = vpop.f32.mrb[10].mxu1  ;;  %v1404_v52 = vpop.f32.mrb[11].mxu0 }
 0x13d   : > { %v1026_v53 = vadd.f32 %v1402_v48, %v1025_v46  ;;  %v1474_v54 = vpop.f32.mrb[11].mxu1 }
 0x13f   : > { %v1031_v56 = vadd.f32 %v1026_v53, %v737_v44 }
 0x141   : > { %v1037_v57 = vadd.f32 %v1319_v55, %v1031_v56 }
 0x143   : > { %vm1038_vm1 = vcmp.ge.f32.partialorder %v1037_v57, 0.0  ;;  %v1039_v58 = vmul.f32 0.2, %v1037_v57 }
 0x145   : > { %v1040_v59 = vsel %vm1038_vm1, %v1037_v57, %v1039_v58 }
 0x146   : > { %v1042_v60 = vsel %vm1041_vm2, %v1040_v59, 0.0  ;;  %v1050_v61 = vmul.f32 %v1040_v59, %v1040_v59 }
 0x147   : > { %v1043_v62 = vrot.slane %v1042_v60, 4 }
 0x148   : > { %v1051_v63 = vsel %vm1041_vm2, %v1050_v61, 0.0 }
 0x149   : > { %v1044_v0 = vadd.f32 %v1043_v62, %v1042_v60  ;;  %v1052_v2 = vrot.slane %v1051_v63, 4 }
 0x14b   : > { %v1045_v3 = vrot.slane %v1044_v0, 2  ;;  %v1053_v4 = vadd.f32 %v1052_v2, %v1051_v63 }
 0x14d   : > { %v1046_v5 = vadd.f32 %v1045_v3, %v1044_v0  ;;  %v1054_v6 = vrot.slane %v1053_v4, 2 }
 0x14f   : > { %v1047_v7 = vrot.slane %v1046_v5, 1  ;;  %v1055_v8 = vadd.f32 %v1054_v6, %v1053_v4 }
 0x151   : > { %v1048_v9 = vadd.f32 %v1047_v7, %v1046_v5  ;;  %v1056_v10 = vrot.slane %v1055_v8, 1 }
 0x153   : > { %v1049_v11 = vmul.f32 0.25, %v1048_v9  ;;  %v1057_v12 = vadd.f32 %v1056_v10, %v1055_v8 }
 0x155   : > { %v1058_v13 = vmul.f32 0.25, %v1057_v12  ;;  %v1059_v14 = vmul.f32 %v1049_v11, %v1049_v11 }
 0x157   : > { %v1060_v15 = vsub.f32 %v1058_v13, %v1059_v14 }
 0x159   : > { %v1061_v16 = vadd.f32 1e-05, %v1060_v15 }
 0x15b   : > { %1567 = vrsqrt.f32 %v1061_v16 }
 0x165   : > { %v1568_v21 = vpop.eup %1567 }
 0x166   : > { %v1064_v22 = vmul.f32 %v1568_v21, %v1063_v19 }
 0x168   : > { %v1066_v24 = vmul.f32 %v1064_v22, %v1049_v11  ;;  %v1071_v25 = vrot.slane %v1064_v22, %v1070_v20 }
 0x16a   : > { %v1067_v26 = vsub.f32 %v1065_v23, %v1066_v24  ;;  %v1072_v27 = vmul.f32 %v1071_v25, %v1040_v59 }
 0x16c   : > { %v1076_v28 = vrot.slane %v1067_v26, %v1070_v20 }
 0x16e   : > { %v1077_v29 = vadd.f32 %v1076_v28, %v1072_v27 }
 0x170   : > { %v1078_v30 = vpack.c.bf16 %v1077_v29, %v1077_v29 }
 0x172   : > { %1079 = vst [vmem:[%s168_s24] sm:$0x3] %v1078_v30 }
 0x173 PF: > { %s13_s12 = sadd.s32 1, %s1575_s12  }
 0x174   : > { %p10_p4 = scmp.ge.s32.totalorder %s13_s12, 6  }
 0x176   :  { %12 = sbr.rel (!%p10_p4) target bundleno = 1 (0x1), region = 65 }

// kernel: gan_model_losses.24
= control target key start
LH: loop header
LB: loop body
LE: loop exit
PB: predicated region body
PF: predicated region fallthrough
CT: control target
= control target key end

     0   :  { %s1668_s15 = smov 0   ;;  %s1972_s0 = inlined_call_operand.vmem [shape: bf16[4,2,2,384], index: 0, kind: input, shape index: {}]   ;;  %s1973_s1 = inlined_call_operand.vmem [shape: bf16[3,384,128], index: 1, kind: input, shape index: {}]   ;;  %s1974_s2 = inlined_call_operand.vmem [shape: f32[8,128], index: 2, kind: input, shape index: {}]   ;;  %s1975_s3 = inlined_call_operand.vmem [shape: f32[4,1,1], index: 3, kind: output, shape index: {0}]   ;;  %s1976_s4 = inlined_call_operand.vmem [shape: f32[4,1,1], index: 4, kind: output, shape index: {1}]  }
   0x1 LB: > { %s1211_s16 = sadd.s32 4294967295, %s1638_s15   ;;  %p1215_p0 = scmp.ge.s32.totalorder %s1638_s15, 1  ;;  %s1638_s15 = sphi %s1668_s15, %s15_s15  }
   0x2   : > { %p164_p1 = scmp.lt.s32.totalorder %s1638_s15, 5 }
   0x4   : > { %p165_p2 = pnand %p1215_p0, %p164_p1 }
   0x5   : > { %v1560_v0 = vld [vmem:[%s1973_s1 + $0x100] sm:$0xff] (!%p165_p2)   ;;  %v1640_v1 = vmov (!%p165_p2), 0.0   ;;  %v1563_v4 = vld [vmem:[%s1973_s1 + $0x108] sm:$0xff] (!%p165_p2)   ;;  %v1566_v7 = vld [vmem:[%s1973_s1 + $0x110] sm:$0xff] (!%p165_p2)   ;;  %vm1641_vm0 = vmmov (!%p165_p2), 0   ;;  %p190_p3 = scmp.lt.s32.totalorder (!%p165_p2), %s1211_s16, 3  ;;  %v313_v21 = vlaneseq (!%p165_p2) }
   0x6   : > { %168 = sbr.rel (%p165_p2) target bundleno = 530 (0x212), region = 32  ;;  %1484 = vmatprep.subr.bf16.mxu1 (!%p165_p2), %v1640_v1  ;;  %v1561_v2 = vld [vmem:[%s1973_s1 + $0xc0] sm:$0xff] (!%p165_p2)   ;;  %1391 = vmatprep.subr.bf16.mxu0 (!%p165_p2), %v1560_v0  ;;  %v1564_v5 = vld [vmem:[%s1973_s1 + $0xc8] sm:$0xff] (!%p165_p2)   ;;  %v1567_v8 = vld [vmem:[%s1973_s1 + $0xd0] sm:$0xff] (!%p165_p2)   ;;  %v1642_v25 = vmov (!%p165_p2), 1966171168  }
   0x7   : > { %v1562_v3 = vld [vmem:[%s1973_s1 + $0x140] sm:$0xff] (!%p165_p2)   ;;  %1392 = vmatpush3.bf16.msra.mxu0 (!%p165_p2), %v1561_v2  ;;  %v1565_v6 = vld [vmem:[%s1973_s1 + $0x148] sm:$0xff] (!%p165_p2)   ;;  %1500 = vmatprep.mubr.msk.bf16.mxu1 (!%p165_p2), %vm1641_vm0, %v1640_v1  ;;  %v1568_v9 = vld [vmem:[%s1973_s1 + $0x150] sm:$0xff] (!%p165_p2)   ;;  %v311_v26 = vunpack.c.l.s4 (!%p165_p2), %v1642_v25  ;;  %v314_v27 = vshrl.u32 (!%p165_p2), %v313_v21, 7  ;;  %vm1121_vm2 = vcmask (!%p165_p2), 1040384   ;;  %vm1132_vm3 = vcmask (!%p165_p2), 0  }
   0x8   : > { %1485 = vmatpush3.bf16.msra.mxu1 (!%p165_p2), %v1562_v3  ;;  %1393 = vmatprep.subr.bf16.mxu0 (!%p165_p2), %v1563_v4  ;;  %v1569_v10 = vld [vmem:[%s1973_s1 + $0x118] sm:$0xff] (!%p165_p2)   ;;  %v1572_v13 = vld [vmem:[%s1973_s1 + $0x120] sm:$0xff] (!%p165_p2)   ;;  %v1575_v16 = vld [vmem:[%s1973_s1 + $0x128] sm:$0xff] (!%p165_p2)  }
   0x9   : > { %1486 = vmatprep.subr.bf16.mxu1 (!%p165_p2), %v1640_v1  ;;  %v1570_v11 = vld [vmem:[%s1973_s1 + $0xd8] sm:$0xff] (!%p165_p2)   ;;  %v1573_v14 = vld [vmem:[%s1973_s1 + $0xe0] sm:$0xff] (!%p165_p2)   ;;  %v1576_v17 = vld [vmem:[%s1973_s1 + $0xe8] sm:$0xff] (!%p165_p2)   ;;  %v312_v31 = vunpack.c.0.s8 (!%p165_p2), %v311_v26 }
   0xa   : > { %v1571_v12 = vld [vmem:[%s1973_s1 + $0x158] sm:$0xff] (!%p165_p2)   ;;  %v1574_v15 = vld [vmem:[%s1973_s1 + $0x160] sm:$0xff] (!%p165_p2)   ;;  %v1577_v18 = vld [vmem:[%s1973_s1 + $0x168] sm:$0xff] (!%p165_p2)  }
   0xb   : > { %1394 = vmatpush3.bf16.msra.mxu0 (!%p165_p2), %v1564_v5  ;;  %v1578_v19 = vld [vmem:[%s1973_s1 + $0x130] sm:$0xff] (!%p165_p2)   ;;  %v1581_v23 = vld [vmem:[%s1973_s1 + $0x138] sm:$0xff] (!%p165_p2)   ;;  %v1584_v32 = vld [vmem:[%s1973_s1 + $0x40] sm:$0xff] (!%p165_p2)   ;;  %v1774_v33 = vsub.s32 (!%p165_p2), %v312_v31, %v314_v27 }
   0xc   : > { %1487 = vmatpush3.bf16.msra.mxu1 (!%p165_p2), %v1565_v6  ;;  %1395 = vmatprep.subr.bf16.mxu0 (!%p165_p2), %v1566_v7  ;;  %v1579_v20 = vld [vmem:[%s1973_s1 + $0xf0] sm:$0xff] (!%p165_p2)   ;;  %v1582_v28 = vld [vmem:[%s1973_s1 + $0xf8] sm:$0xff] (!%p165_p2)   ;;  %v1585_v34 = vld [vmem:[%s1973_s1] sm:$0xff] (!%p165_p2)  }
   0xd   : > { %1488 = vmatprep.subr.bf16.mxu1 %v1640_v1  ;;  %s1978_s16 = smov (!%p190_p3, %s1211_s16), 3  ;;  %v1580_v22 = vld [vmem:[%s1973_s1 + $0x170] sm:$0xff]   ;;  %v1583_v29 = vld [vmem:[%s1973_s1 + $0x178] sm:$0xff]   ;;  %v1586_v37 = vld [vmem:[%s1973_s1 + $0x80] sm:$0xff]  }
   0xe   : > { %s1544_s25 = smul.u32 6, %s1978_s16  ;;  %v1587_v38 = vld [vmem:[%s1973_s1 + $0x48] sm:$0xff]   ;;  %v1590_v42 = vld [vmem:[%s1973_s1 + $0x50] sm:$0xff]   ;;  %v1593_v45 = vld [vmem:[%s1973_s1 + $0x58] sm:$0xff]   ;;  %s196_s30 = scalar_lea.vmem %s1975_s3, %s1978_s16 }
   0xf   : > { %1396 = vmatpush3.bf16.msra.mxu0 %v1567_v8  ;;  %v1588_v40 = vld [vmem:[%s1973_s1 + $0x8] sm:$0xff]   ;;  %v1591_v43 = vld [vmem:[%s1973_s1 + $0x10] sm:$0xff]   ;;  %v1594_v46 = vld [vmem:[%s1973_s1 + $0x18] sm:$0xff]   ;;  %s199_s8 = scalar_lea.vmem %s1976_s4, %s1978_s16 }
  0x10   : > { %1489 = vmatpush3.bf16.msra.mxu1 %v1568_v9  ;;  %1397 = vmatprep.subr.bf16.mxu0 %v1569_v10  ;;  %s1754_s10 = scalar_lea.vmem %s1972_s0, %s1544_s25  ;;  %v1589_v41 = vld [vmem:[%s1973_s1 + $0x88] sm:$0xff]   ;;  %v1592_v44 = vld [vmem:[%s1973_s1 + $0x90] sm:$0xff]   ;;  %v1595_v47 = vld [vmem:[%s1973_s1 + $0x98] sm:$0xff]  }
  0x11   : > { %1490 = vmatprep.subr.bf16.mxu1 %v1640_v1  ;;  %v1265_v24 = vld.sshfl [vmem:[%s1754_s10 + $0x3] sm:$0x13 pattern:$0x75316420]  ;;  %v1599_v51 = vld [vmem:[%s1973_s1 + $0x68] sm:$0xff]   ;;  %v1602_v56 = vld [vmem:[%s1973_s1 + $0x70] sm:$0xff]  }
  0x12   : > { %v309_v30 = vcombine.high %v1265_v24, %v1265_v24  ;;  %v316_v36 = vrot.slane %v1265_v24, %v1774_v33  ;;  %v1596_v48 = vld [vmem:[%s1973_s1 + $0x60] sm:$0xff]   ;;  %v1600_v53 = vld [vmem:[%s1973_s1 + $0x28] sm:$0xff]   ;;  %v1603_v58 = vld [vmem:[%s1973_s1 + $0x30] sm:$0xff]  }
  0x13   : > { %1398 = vmatpush3.bf16.msra.mxu0 %v1570_v11  ;;  %v1597_v49 = vld [vmem:[%s1973_s1 + $0x20] sm:$0xff]   ;;  %v1601_v55 = vld [vmem:[%s1973_s1 + $0xa8] sm:$0xff]   ;;  %v1604_v59 = vld [vmem:[%s1973_s1 + $0xb0] sm:$0xff]  }
  0x14   : > { %1491 = vmatpush3.bf16.msra.mxu1 %v1571_v12  ;;  %1399 = vmatprep.subr.bf16.mxu0 %v1572_v13  ;;  %v323_v35 = vrot.slane %v309_v30, %v1774_v33  ;;  %v324_v39 = vcombine.high %v316_v36, %v316_v36  ;;  %v1598_v50 = vld [vmem:[%s1973_s1 + $0xa0] sm:$0xff]   ;;  %v1605_v60 = vld [vmem:[%s1973_s1 + $0x78] sm:$0xff]   ;;  %v1611_v5 = vld [vmem:[%s1973_s1 + $0x1c8] sm:$0xff]  }
  0x15   : > { %1492 = vmatprep.subr.bf16.mxu1 %v1640_v1  ;;  %v1290_v52 = vld.sshfl [vmem:[%s1754_s10] sm:$0x13 pattern:$0x75316420]  ;;  %v1606_v61 = vld [vmem:[%s1973_s1 + $0x38] sm:$0xff]   ;;  %v1612_v7 = vld [vmem:[%s1973_s1 + $0x188] sm:$0xff]  }
  0x16   : > { %504 = vmatprep.mubr.bf16.mxu0 %v323_v35  ;;  %v560_v54 = vcombine.high %v1290_v52, %v1290_v52  ;;  %v1607_v62 = vld [vmem:[%s1973_s1 + $0xb8] sm:$0xff]   ;;  %v1859_v63 = vrot.slane %v1290_v52, %v1774_v33  ;;  %v1608_v0 = vld [vmem:[%s1973_s1 + $0x1c0] sm:$0xff]   ;;  %v1613_v8 = vld [vmem:[%s1973_s1 + $0x208] sm:$0xff]  }
  0x17   : > { %1400 = vmatpush3.bf16.msra.mxu0 %v1573_v14  ;;  %v1609_v2 = vld [vmem:[%s1973_s1 + $0x180] sm:$0xff]   ;;  %v1614_v9 = vld [vmem:[%s1973_s1 + $0x1d0] sm:$0xff]   ;;  %v1617_v12 = vld [vmem:[%s1973_s1 + $0x1d8] sm:$0xff]  }
  0x18   : > { %1493 = vmatpush3.bf16.msra.mxu1 %v1574_v15  ;;  %1401 = vmatprep.subr.bf16.mxu0 %v1575_v16  ;;  %v574_v57 = vrot.slane %v560_v54, %v1774_v33  ;;  %v1870_v3 = vcombine.high %v1859_v63, %v1859_v63  ;;  %v1610_v4 = vld [vmem:[%s1973_s1 + $0x200] sm:$0xff]   ;;  %v1615_v10 = vld [vmem:[%s1973_s1 + $0x190] sm:$0xff]   ;;  %v1618_v13 = vld [vmem:[%s1973_s1 + $0x198] sm:$0xff]   ;;  %v878_v27 = vshrl.u32 %v1859_v63, 16 }
  0x19   : > { %1494 = vmatprep.subr.bf16.mxu1 %v1640_v1  ;;  %v1616_v11 = vld [vmem:[%s1973_s1 + $0x210] sm:$0xff]   ;;  %v1619_v14 = vld [vmem:[%s1973_s1 + $0x218] sm:$0xff]   ;;  %v1620_v15 = vld [vmem:[%s1973_s1 + $0x1e0] sm:$0xff]  }
  0x1a   : > { %v881_v6 = vshrl.u32 %v574_v57, 16  ;;  %v1621_v16 = vld [vmem:[%s1973_s1 + $0x1a0] sm:$0xff]   ;;  %v1626_v21 = vld [vmem:[%s1973_s1 + $0x1f0] sm:$0xff]   ;;  %v1629_v24 = vld [vmem:[%s1973_s1 + $0x1f8] sm:$0xff]  }
  0x1b   : > { %1402 = vmatpush3.bf16.msra.mxu0 %v1576_v17  ;;  %v1622_v17 = vld [vmem:[%s1973_s1 + $0x220] sm:$0xff]   ;;  %v1630_v25 = vld [vmem:[%s1973_s1 + $0x1b8] sm:$0xff]  }
  0x1c   : > { %1495 = vmatpush3.bf16.msra.mxu1 %v1577_v18  ;;  %1403 = vmatprep.subr.bf16.mxu0 %v1578_v19  ;;  %v1623_v18 = vld [vmem:[%s1973_s1 + $0x1e8] sm:$0xff]   ;;  %v1631_v26 = vld [vmem:[%s1973_s1 + $0x238] sm:$0xff]  }
  0x1d   : > { %1496 = vmatprep.subr.bf16.mxu1 %v1640_v1  ;;  %v1624_v19 = vld [vmem:[%s1973_s1 + $0x1a8] sm:$0xff]  }
  0x1f   : > { %1404 = vmatpush3.bf16.msra.mxu0 %v1579_v20  ;;  %v1625_v20 = vld [vmem:[%s1973_s1 + $0x228] sm:$0xff]  }
  0x20   : > { %1497 = vmatpush3.bf16.msra.mxu1 %v1580_v22  ;;  %1405 = vmatprep.subr.bf16.mxu0 %v1581_v23  ;;  %v1627_v22 = vld [vmem:[%s1973_s1 + $0x1b0] sm:$0xff]  }
  0x21   : > { %1498 = vmatprep.subr.bf16.mxu1 %v1640_v1  ;;  %v1628_v23 = vld [vmem:[%s1973_s1 + $0x230] sm:$0xff]  }
  0x23   : > { %1406 = vmatpush3.bf16.msra.mxu0 %v1582_v28  ;;  %v884_v28 = vshrl.u32 %v1870_v3, 16 }
  0x24   : > { %1499 = vmatpush3.bf16.msra.mxu1 %v1583_v29  ;;  %1422 = vmatprep.subr.bf16.mxu0 %v1584_v32 }
  0x25   : > { %1504 = vmatprep.subr.bf16.mxu1 %v1640_v1 }
  0x26   : > { %505 = vmatmul.mubr.bf16.vlgmr.msra.gmra.mrb[0].mxu0 %v316_v36 }
  0x27   : > { %1501 = vmatmul.mubr.bf16.vlgmr.msra.gmra.mrb[0].mxu1 %v324_v39  ;;  %1423 = vmatpush3.bf16.msra.mxu0 %v1585_v34 }
  0x28   : > { %1505 = vmatpush3.bf16.msra.mxu1 %v1586_v37  ;;  %1424 = vmatprep.subr.bf16.mxu0 %v1587_v38 }
  0x29   : > { %1506 = vmatprep.subr.bf16.mxu1 %v1640_v1  ;;  %1520 = vmatprep.mubr.msk.bf16.mxu1 %vm1641_vm0, %v1640_v1 }
  0x2a   : > { %755 = vmatprep.mubr.bf16.mxu0 %v574_v57 }
  0x2b   : > { %1425 = vmatpush3.bf16.msra.mxu0 %v1588_v40 }
  0x2c   : > { %1507 = vmatpush3.bf16.msra.mxu1 %v1589_v41  ;;  %1426 = vmatprep.subr.bf16.mxu0 %v1590_v42 }
  0x2d   : > { %1508 = vmatprep.subr.bf16.mxu1 %v1640_v1 }
  0x2f   : > { %1427 = vmatpush3.bf16.msra.mxu0 %v1591_v43 }
  0x30   : > { %1509 = vmatpush3.bf16.msra.mxu1 %v1592_v44  ;;  %1428 = vmatprep.subr.bf16.mxu0 %v1593_v45 }
  0x31   : > { %1510 = vmatprep.subr.bf16.mxu1 %v1640_v1 }
  0x33   : > { %1429 = vmatpush3.bf16.msra.mxu0 %v1594_v46 }
  0x34   : > { %1511 = vmatpush3.bf16.msra.mxu1 %v1595_v47  ;;  %1430 = vmatprep.subr.bf16.mxu0 %v1596_v48 }
  0x35   : > { %1512 = vmatprep.subr.bf16.mxu1 %v1640_v1 }
  0x37   : > { %1431 = vmatpush3.bf16.msra.mxu0 %v1597_v49 }
  0x38   : > { %1513 = vmatpush3.bf16.msra.mxu1 %v1598_v50  ;;  %1432 = vmatprep.subr.bf16.mxu0 %v1599_v51 }
  0x39   : > { %1514 = vmatprep.subr.bf16.mxu1 %v1640_v1 }
  0x3b   : > { %1433 = vmatpush3.bf16.msra.mxu0 %v1600_v53 }
  0x3c   : > { %1515 = vmatpush3.bf16.msra.mxu1 %v1601_v55  ;;  %1434 = vmatprep.subr.bf16.mxu0 %v1602_v56 }
  0x3d   : > { %1516 = vmatprep.subr.bf16.mxu1 %v1640_v1 }
  0x3f   : > { %1435 = vmatpush3.bf16.msra.mxu0 %v1603_v58 }
  0x40   : > { %1517 = vmatpush3.bf16.msra.mxu1 %v1604_v59  ;;  %1436 = vmatprep.subr.bf16.mxu0 %v1605_v60  ;;  %v1114_v59 = vld [vmem:[%s1974_s2] sm:$0x1] }
  0x41   : > { %1518 = vmatprep.subr.bf16.mxu1 %v1640_v1 }
  0x43   : > { %1437 = vmatpush3.bf16.msra.mxu0 %v1606_v61 }
  0x44   : > { %1519 = vmatpush3.bf16.msra.mxu1 %v1607_v62  ;;  %1453 = vmatprep.subr.bf16.mxu0 %v1608_v0 }
  0x45   : > { %1524 = vmatprep.subr.bf16.mxu1 %v1640_v1 }
  0x46   : > { %756 = vmatmul.mubr.bf16.vlgmr.msra.gmra.mrb[4].mxu0 %v1859_v63  ;;  %v1119_v63 = vld [vmem:[%s1974_s2 + $0x3] sm:$0x1] }
  0x47   : > { %1521 = vmatmul.mubr.bf16.vlgmr.msra.gmra.mrb[4].mxu1 %v1870_v3  ;;  %1454 = vmatpush3.bf16.msra.mxu0 %v1609_v2 }
  0x48   : > { %1525 = vmatpush3.bf16.msra.mxu1 %v1610_v4  ;;  %1455 = vmatprep.subr.bf16.mxu0 %v1611_v5  ;;  %v1125_v4 = vld [vmem:[%s1974_s2 + $0x4] sm:$0x1] }
  0x49   : > { %1526 = vmatprep.subr.bf16.mxu1 %v1640_v1  ;;  %1065 = vmatprep.mubr.bf16.mxu0 %v881_v6 }
  0x4a   : > { %1540 = vmatprep.mubr.msk.bf16.mxu1 %vm1641_vm0, %v1640_v1 }
  0x4b   : > { %1456 = vmatpush3.bf16.msra.mxu0 %v1612_v7 }
  0x4c   : > { %1527 = vmatpush3.bf16.msra.mxu1 %v1613_v8  ;;  %1457 = vmatprep.subr.bf16.mxu0 %v1614_v9 }
  0x4d   : > { %1528 = vmatprep.subr.bf16.mxu1 %v1640_v1 }
  0x4f   : > { %1458 = vmatpush3.bf16.msra.mxu0 %v1615_v10 }
  0x50   : > { %1529 = vmatpush3.bf16.msra.mxu1 %v1616_v11  ;;  %1459 = vmatprep.subr.bf16.mxu0 %v1617_v12 }
  0x51   : > { %1530 = vmatprep.subr.bf16.mxu1 %v1640_v1 }
  0x53   : > { %1460 = vmatpush3.bf16.msra.mxu0 %v1618_v13 }
  0x54   : > { %1531 = vmatpush3.bf16.msra.mxu1 %v1619_v14  ;;  %1461 = vmatprep.subr.bf16.mxu0 %v1620_v15 }
  0x55   : > { %1532 = vmatprep.subr.bf16.mxu1 %v1640_v1 }
  0x57   : > { %1462 = vmatpush3.bf16.msra.mxu0 %v1621_v16 }
  0x58   : > { %1533 = vmatpush3.bf16.msra.mxu1 %v1622_v17  ;;  %1463 = vmatprep.subr.bf16.mxu0 %v1623_v18 }
  0x59   : > { %1534 = vmatprep.subr.bf16.mxu1 %v1640_v1 }
  0x5b   : > { %1464 = vmatpush3.bf16.msra.mxu0 %v1624_v19 }
  0x5c   : > { %1535 = vmatpush3.bf16.msra.mxu1 %v1625_v20  ;;  %1465 = vmatprep.subr.bf16.mxu0 %v1626_v21 }
  0x5d   : > { %1536 = vmatprep.subr.bf16.mxu1 %v1640_v1 }
  0x5f   : > { %1466 = vmatpush3.bf16.msra.mxu0 %v1627_v22 }
  0x60   : > { %1537 = vmatpush3.bf16.msra.mxu1 %v1628_v23  ;;  %1467 = vmatprep.subr.bf16.mxu0 %v1629_v24 }
  0x61   : > { %1538 = vmatprep.subr.bf16.mxu1 %v1640_v1 }
  0x63   : > { %1468 = vmatpush3.bf16.msra.mxu0 %v1630_v25 }
  0x64   : > { %1539 = vmatpush3.bf16.msra.mxu1 %v1631_v26 }
  0x66   : > { %1066 = vmatmul.mubr.bf16.vlgmr.msra.gmra.mrb[8].mxu0 %v878_v27 }
  0x67   : > { %1541 = vmatmul.mubr.bf16.vlgmr.msra.gmra.mrb[8].mxu1 %v884_v28 }
  0xf9   : > { %v1407_v29 = vpop.f32.mrb[0].mxu0 }
  0xfa   : > { %v1408_v30 = vpop.f32.mrb[1].mxu0  ;;  %v546_v31 = vpop.f32.mrb[0].mxu1 }
  0xfb   : > { %v1409_v32 = vadd.f32 %v1408_v30, %v1407_v29  ;;  %v1410_v33 = vpop.f32.mrb[2].mxu0  ;;  %v1502_v34 = vpop.f32.mrb[1].mxu1 }
  0xfc   : > { %v1411_v35 = vpop.f32.mrb[3].mxu0  ;;  %v549_v36 = vpop.f32.mrb[2].mxu1 }
  0xfd   : > { %v547_v37 = vadd.f32 %v1409_v32, %v546_v31  ;;  %v1503_v38 = vpop.f32.mrb[3].mxu1 }
 0x119   : > { %v1438_v39 = vpop.f32.mrb[4].mxu0 }
 0x11a   : > { %v1439_v1 = vpop.f32.mrb[5].mxu0  ;;  %v797_v40 = vpop.f32.mrb[4].mxu1 }
 0x11b   : > { %v1440_v41 = vadd.f32 %v1439_v1, %v1438_v39  ;;  %v1441_v42 = vpop.f32.mrb[6].mxu0  ;;  %v1522_v43 = vpop.f32.mrb[5].mxu1 }
 0x11c   : > { %v1442_v44 = vpop.f32.mrb[7].mxu0  ;;  %v800_v45 = vpop.f32.mrb[6].mxu1 }
 0x11d   : > { %v758_v46 = vadd.f32 %v1440_v41, %v547_v37  ;;  %v1523_v47 = vpop.f32.mrb[7].mxu1 }
 0x11f   : > { %v798_v48 = vadd.f32 %v797_v40, %v758_v46 }
 0x139   : > { %v1469_v49 = vpop.f32.mrb[8].mxu0 }
 0x13a   : > { %v1107_v50 = vpop.f32.mrb[8].mxu1  ;;  %v1470_v51 = vpop.f32.mrb[9].mxu0 }
 0x13b   : > { %v1471_v52 = vadd.f32 %v1470_v51, %v1469_v49  ;;  %v1542_v53 = vpop.f32.mrb[9].mxu1  ;;  %v1472_v54 = vpop.f32.mrb[10].mxu0 }
 0x13c   : > { %v1110_v55 = vpop.f32.mrb[10].mxu1  ;;  %v1473_v56 = vpop.f32.mrb[11].mxu0 }
 0x13d   : > { %v1108_v57 = vadd.f32 %v1471_v52, %v1107_v50  ;;  %v1543_v58 = vpop.f32.mrb[11].mxu1 }
 0x13f   : > { %v1113_v60 = vadd.f32 %v1108_v57, %v798_v48 }
 0x141   : > { %v1115_v61 = vadd.f32 %v1114_v59, %v1113_v60 }
 0x143   : > { %vm1116_vm1 = vcmp.ge.f32.partialorder %v1115_v61, 0.0  ;;  %v1117_v62 = vmul.f32 0.2, %v1115_v61 }
 0x145   : > { %v1118_v0 = vsel %vm1116_vm1, %v1115_v61, %v1117_v62 }
 0x146   : > { %v1120_v2 = vmul.f32 %v1119_v63, %v1118_v0 }
 0x148   : > { %v1122_v3 = vsel %vm1121_vm2, %v1120_v2, 0.0 }
 0x149   : > { %1123 = vadd.xlane.f32.xlu0 %v1122_v3 }
 0x1d6   : > { %v1124_v5 = vpop.xlane.xlu0 %1123 }
 0x1d7   : > { %v1126_v6 = vadd.f32 %v1125_v4, %v1124_v5 }
 0x1d9   : > { %v1388_v7 = vadd.f32 -1.0, %v1126_v6  ;;  %v1134_v9 = vmul.f32 %v1126_v6, %v1126_v6 }
 0x1db   : > { %v1128_v8 = vmul.f32 %v1388_v7, %v1388_v7 }
 0x1dd   : > { %1545 = vpush %v1128_v8 }
 0x1de   : > { %1547 = vpush %v1134_v9 }
 0x20e   : > { %s1546_s5 = spop %1545 }
 0x20f   : > { %v1131_v10 = vstv %s1546_s5  ;;  %s1548_s9 = spop %1547 }
 0x210   : > { %1133 = vst.msk [vmem:[%s196_s30] sm:$0x1] %vm1132_vm3, %v1131_v10  ;;  %v1137_v11 = vstv %s1548_s9 }
 0x211   : > { %1138 = vst.msk [vmem:[%s199_s8] sm:$0x1] %vm1132_vm3, %v1137_v11 }
 0x212 PF: > { %s15_s15 = sadd.s32 1, %s1638_s15  }
 0x213   : > { %p12_p4 = scmp.ge.s32.totalorder %s15_s15, 6  }
 0x215   :  { %14 = sbr.rel (!%p12_p4) target bundleno = 1 (0x1), region = 77 }

// kernel: gan_model_losses.37
= control target key start
LH: loop header
LB: loop body
LE: loop exit
PB: predicated region body
PF: predicated region fallthrough
CT: control target
= control target key end

     0   :  { %s170_s0 = inlined_call_operand.vmem [shape: f32[48,128], index: 0, kind: input, shape index: {}]   ;;  %s171_s1 = inlined_call_operand.vmem [shape: f32[48,128], index: 1, kind: input, shape index: {}]   ;;  %s172_s2 = inlined_call_operand.hbm [shape: f32[1,1], index: 2, kind: output, shape index: {}]  }
   0x1   :  { %v18_v0 = vld [vmem:[%s170_s0] sm:$0xff]  ;;  %v19_v1 = vld [vmem:[%s170_s0 + $0x8] sm:$0xff]  ;;  %v20_v2 = vld [vmem:[%s170_s0 + $0x10] sm:$0xff] }
   0x2   :  { %v21_v3 = vld [vmem:[%s170_s0 + $0x18] sm:$0xff]  ;;  %v22_v4 = vld [vmem:[%s170_s0 + $0x20] sm:$0xff]  ;;  %v25_v6 = vld [vmem:[%s171_s1 + $0x8] sm:$0xff] }
   0x3   :  { %v24_v5 = vld [vmem:[%s171_s1] sm:$0xff]  ;;  %v26_v7 = vld [vmem:[%s171_s1 + $0x10] sm:$0xff]  ;;  %v27_v8 = vld [vmem:[%s171_s1 + $0x18] sm:$0xff]  ;;  %v31_v11 = vsub.f32 %v19_v1, %v25_v6 }
   0x4   :  { %v28_v9 = vld [vmem:[%s171_s1 + $0x20] sm:$0xff]  ;;  %v30_v10 = vsub.f32 %v18_v0, %v24_v5  ;;  %v32_v12 = vsub.f32 %v20_v2, %v26_v7  ;;  %v23_v13 = vld [vmem:[%s170_s0 + $0x28] sm:$0xff]  ;;  %v33_v15 = vsub.f32 %v21_v3, %v27_v8 }
   0x5   :  { %v29_v14 = vld [vmem:[%s171_s1 + $0x28] sm:$0xff] }
   0x6   :  { %7 = vsyncpa [#allocation3], 0  ;;  %v34_v16 = vsub.f32 %v22_v4, %v28_v9  ;;  %v36_v17 = vand.u32 2147483647, %v30_v10  ;;  %v37_v18 = vand.u32 2147483647, %v31_v11  ;;  %v35_v20 = vsub.f32 %v23_v13, %v29_v14 }
   0x7   :  { %v38_v19 = vand.u32 2147483647, %v32_v12  ;;  %v39_v21 = vand.u32 2147483647, %v33_v15  ;;  %vm16_vm0 = vcmask 0   ;;  %v103_v29 = vmov 0.0  }
   0x8   :  { %v43_v22 = vadd.f32 %v37_v18, %v36_v17  ;;  %v40_v23 = vand.u32 2147483647, %v34_v16  ;;  %v41_v25 = vand.u32 2147483647, %v35_v20  ;;  %17 = vst.msk [vmem:[#allocation2] sm:$0x1] %vm16_vm0, %v103_v29 }
   0x9   :  { %s104_s0 = smov [#allocation2]  }
   0xa   :  { %v44_v24 = vadd.f32 %v43_v22, %v38_v19  ;;  %s67_s1 = sshll.u32 %s104_s0, 4  ;;  %s68_s1 = int_to_ptr.vmem [resolvable:$true] %s67_s1 }
   0xb   :  { %s79_s6 = scalar_lea.vmem %s68_s1, 16  ;;  %s83_s7 = scalar_lea.vmem %s68_s1, 32 }
   0xc   :  { %v45_v26 = vadd.f32 %v44_v24, %v39_v21  ;;  %p80_p0 = scmp.ne.s32.totalorder %s68_s1, %s79_s6  ;;  %p84_p1 = scmp.lt.s32.totalorder %s68_s1, %s68_s1 }
   0xd   :  { %p85_p2 = scmp.lt.s32.totalorder %s83_s7, %s79_s6 }
   0xe   :  { %v46_v27 = vadd.f32 %v45_v26, %v40_v23 }
   0xf   :  { %v42_v37 = vld [vmem:[#allocation2] sm:$0x1]  ;;  %p86_p3 = por %p85_p2, %p84_p1 }
  0x10   :  { %v47_v28 = vadd.f32 %v46_v27, %v41_v25 }
  0x11   :  { %p87_p4 = pnand %p86_p3, %p80_p0 }
  0x12   :  { %48 = vadd.xlane.f32.xlu0 %v47_v28 }
  0x9f   :  { %v49_v30 = vpop.xlane.xlu0 %48 }
  0xa0   :  { %v50_v31 = vrot.slane %v49_v30, 4 }
  0xa2   :  { %v51_v32 = vadd.f32 %v50_v31, %v49_v30 }
  0xa4   :  { %v52_v33 = vrot.slane %v51_v32, 2 }
  0xa6   :  { %v53_v34 = vadd.f32 %v52_v33, %v51_v32 }
  0xa8   :  { %v54_v35 = vrot.slane %v53_v34, 1 }
  0xaa   :  { %v55_v36 = vadd.f32 %v54_v35, %v53_v34 }
  0xac   :  { %75 = vpush %v55_v36 }
  0xdd   :  { %s76_s5 = spop %75 }
  0xde   :  { %v57_v38 = vstv %s76_s5 }
  0xdf   :  { %v58_v39 = vadd.f32 %v57_v38, %v42_v37 }
  0xe1   :  { %60 = vst.msk [vmem:[#allocation2] sm:$0x1] %vm16_vm0, %v58_v39 }
  0xe2   :  { %90 = shalt.err (!%p87_p4)
}
  0xe3   :  { %s91_s10 = scalar_lea.hbm %s172_s2, 16 }
  0xe4   :  { %p92_p5 = scmp.ne.s32.totalorder %s172_s2, %s91_s10  ;;  %p95_p6 = scmp.lt.u32.totalorder %s91_s10, %s172_s2 }
  0xe6   :  { %p97_p7 = pnand %p95_p6, %p92_p5 }
  0xe8   :  { %100 = shalt.err (!%p97_p7)
}
  0xe9   :  { %70 = dma.vmem_to_hbm [thread:$0]  %s68_s1, 16, %s172_s2, [#allocation3]  }
  0xea   :  { %101 = dma.done.wait [#allocation3], 16  }
  0xeb   :  { %102 = vsyncadd [#allocation3], 4294967280 }
  0xec   :  { %74 = vsyncpa [#allocation3], 1 }

</bundles_post_ra>
